<compile_context>
chip_gen: v5e
topology: v5e:2x2
jax: 0.10.0
libtpu: 0.0.40
codegen_flags: <defaults>
</compile_context>

<pallas_src>
import numpy as np
import jax
import jax.numpy as jnp
from jax.experimental import pallas as pl
from jax.experimental.pallas import tpu as pltpu


def _round_up(n: int, m: int) -> int:
    return ((n + m - 1) // m) * m


def _cdiv(a: int, b: int) -> int:
    return -(-a // b)


# ---------------------------------------------------------------------------
# Kernel
# ---------------------------------------------------------------------------
def _make_critic_kernel(layer_dims, in_rows, out_pad, eps: float = 1e-5):
    """Fused [Linear -> ELU -> LayerNorm]*H -> Linear kernel.

    layer_dims : true widths [obs, h1, ..., 1]
    in_rows    : rows of each layer's packed weight block
                 ([round_up(obs,8), out_pad, ..., out_pad])
    Packed weights : w_ref (sum(in_rows), out_pad) f32, layer i rows start at
                     sum(in_rows[:i]); padded rows/cols are zero.
    Packed rows    : rows_ref (>=3*H+1, out_pad) f32: rows 3i..3i+2 are
                     bias/gamma/beta of hidden layer i (padded lanes zero),
                     row 3H is the final bias.
    Output         : o_ref (1, bt) lane-dense row of value estimates.
    """
    num_hidden = len(layer_dims) - 2
    w_offsets, off = [], 0
    for r in in_rows:
        w_offsets.append(off)
        off += r

    def kernel(x_ref, w_ref, rows_ref, o_ref):
        h = x_ref[...].astype(jnp.float32)                 # (bt, in_rows[0])
        for i in range(num_hidden):
            out_true = layer_dims[i + 1]
            off_i = w_offsets[i]
            w = w_ref[off_i:off_i + in_rows[i], :]         # (in_rows_i, out_pad)
            b = rows_ref[3 * i:3 * i + 1, :]               # (1, out_pad)
            g = rows_ref[3 * i + 1:3 * i + 2, :]
            be = rows_ref[3 * i + 2:3 * i + 3, :]

            # Linear (f32 operands, f32 MXU accumulation).
            h = jnp.dot(h, w, preferred_element_type=jnp.float32) + b
            # ELU (alpha = 1.0); padded lanes stay exactly 0.
            h = jnp.where(h > 0.0, h, jnp.exp(jnp.minimum(h, 0.0)) - 1.0)
            # LayerNorm over the TRUE feature width, one-pass variance.
            # Padded lanes of h are 0, so the sums are already exact; padded
            # gamma/beta lanes are 0, so the affine re-zeros the padded lanes.
            inv_n = jnp.float32(1.0 / out_true)
            mu = jnp.sum(h, axis=-1, keepdims=True) * inv_n
            var = jnp.sum(h * h, axis=-1, keepdims=True) * inv_n - mu * mu
            h = (h - mu) * jax.lax.rsqrt(var + eps) * g + be

        # Final Linear (value head).  Only column 0 of the padded weight block
        # is real; transpose (XLU) the (bt, out_pad) result and keep row 0 so
        # the output is a lane-dense (1, bt) row.
        off_l = w_offsets[num_hidden]
        w = w_ref[off_l:off_l + in_rows[num_hidden], :]
        b0 = rows_ref[3 * num_hidden:3 * num_hidden + 1, 0:1]   # (1, 1)
        v = jnp.dot(h, w, preferred_element_type=jnp.float32)   # (bt, out_pad)
        o_ref[...] = (jnp.transpose(v)[0:1, :] + b0).astype(o_ref.dtype)

    return kernel


# ---------------------------------------------------------------------------
# Param packing (f32, lane-pad hidden widths to 128, zero padded lanes/rows)
# ---------------------------------------------------------------------------
def _pack_params(params, layer_dims):
    num_layers = len(layer_dims) - 1
    num_hidden = num_layers - 1
    obs_rows = _round_up(layer_dims[0], 8)
    out_pad = max(128, _round_up(max(layer_dims[1:]), 128))
    in_rows = [obs_rows] + [out_pad] * num_hidden

    w_blocks, rows = [], []
    for i in range(num_layers):
        layer = params[i]
        w = layer[0]                                        # torch layout (out, in)
        blk = jnp.zeros((in_rows[i], out_pad), jnp.float32)
        blk = blk.at[:w.shape[1], :w.shape[0]].set(
            jnp.transpose(w).astype(jnp.float32))
        w_blocks.append(blk)
        # bias (+ gamma, beta).  Padded lanes MUST stay zero (LayerNorm relies
        # on zero padded gamma/beta to keep padded lanes of h at exactly 0).
        for v in layer[1:]:
            row = jnp.zeros((1, out_pad), jnp.float32)
            row = row.at[0, :v.shape[0]].set(v.astype(jnp.float32))
            rows.append(row)

    w_pack = jnp.concatenate(w_blocks, axis=0)              # f32
    rows_pack = jnp.concatenate(rows, axis=0)               # f32
    n_rows_pad = _round_up(rows_pack.shape[0], 8)
    if n_rows_pad != rows_pack.shape[0]:
        rows_pack = jnp.pad(rows_pack,
                            ((0, n_rows_pad - rows_pack.shape[0]), (0, 0)))
    return w_pack, rows_pack, in_rows, out_pad


# ---------------------------------------------------------------------------
# Batch-tile selection
# ---------------------------------------------------------------------------
def _choose_batch_tile(B, batch_tile):
    """bt multiple of 128 (lane-dense output blocks), >=2 tiles for non-tiny B
    (v7x megacore), tiles evened out to keep last-tile padding waste small."""
    batch_tile = max(128, _round_up(batch_tile, 128))
    n_tiles = max(1, _cdiv(B, batch_tile))
    if B > 256:
        n_tiles = max(2, n_tiles)
    bt = _round_up(_cdiv(B, n_tiles), 128)
    return min(bt, batch_tile)


# ---------------------------------------------------------------------------
# Wrapper
# ---------------------------------------------------------------------------
def critic_mlp_forward(x, params, layer_dims, *, batch_tile=1024, eps=1e-5):
    """x: (B, obs_dim) float32 -> (B, 1) float32 value estimates."""
    B, obs_dim = x.shape
    assert obs_dim == layer_dims[0]

    w_pack, rows_pack, in_rows, out_pad = _pack_params(params, layer_dims)
    obs_rows = in_rows[0]

    bt = _choose_batch_tile(B, batch_tile)
    B_pad = _round_up(B, bt)

    pad_rows = B_pad - B
    pad_feat = obs_rows - obs_dim
    x_p = x.astype(jnp.float32)
    if pad_rows or pad_feat:
        x_p = jnp.pad(x_p, ((0, pad_rows), (0, pad_feat)))

    kernel = _make_critic_kernel(layer_dims, in_rows, out_pad, eps)

    grid = (B_pad // bt,)
    in_specs = [
        pl.BlockSpec((bt, obs_rows), lambda i: (i, 0)),     # batch-tiled input
        pl.BlockSpec(w_pack.shape, lambda i: (0, 0)),       # packed weights
        pl.BlockSpec(rows_pack.shape, lambda i: (0, 0)),    # packed b/gamma/beta
    ]
    # Lane-dense output: one (1, bt) row per grid step of a (1, B_pad) array.
    out_spec = pl.BlockSpec((1, bt), lambda i: (0, i))

    # VMEM budget: double-buffered in/out blocks + params (+activation slack),
    # clamped into [16 MiB, 32 MiB] so it's safe on v5e (16 MiB scoped default)
    # and stays well inside v7x's 64 MiB physical VMEM.
    in_block = bt * obs_rows * 4
    out_block = bt * 4
    param_bytes = (w_pack.size + rows_pack.size) * 4
    act_bytes = bt * out_pad * 4
    vmem_limit = 2 * (in_block + out_block + param_bytes) + 8 * act_bytes
    vmem_limit = int(min(32 * 1024 * 1024, max(16 * 1024 * 1024, 2 * vmem_limit)))

    out_row = pl.pallas_call(
        kernel,
        out_shape=jax.ShapeDtypeStruct((1, B_pad), jnp.float32),
        grid_spec=pltpu.PrefetchScalarGridSpec(
            num_scalar_prefetch=0,
            grid=grid,
            in_specs=in_specs,
            out_specs=out_spec,
        ),
        compiler_params=pltpu.CompilerParams(
            dimension_semantics=("parallel",),
            vmem_limit_bytes=vmem_limit,
        ),
    )(x_p, w_pack, rows_pack)

    return out_row[0, :B].reshape(B, 1)


# ---------------------------------------------------------------------------
# Deterministic parameter init (orthogonal, gain sqrt(2), zero bias,
# LayerNorm gamma=1 beta=0) — mirrors the PyTorch module's init_.
# ---------------------------------------------------------------------------
def _orthogonal(key, out_dim, in_dim, gain):
    n_max, n_min = max(out_dim, in_dim), min(out_dim, in_dim)
    a = np.asarray(jax.random.normal(key, (n_max, n_min), dtype=jnp.float32))
    q, r = np.linalg.qr(a)
    q = q * np.sign(np.diag(r))[None, :]
    if out_dim < in_dim:
        q = q.T
    return jnp.asarray(gain * q[:out_dim, :in_dim], dtype=jnp.float32)


def make_critic_params(key, obs_dim, units, init_gain=2.0 ** 0.5):
    layer_dims = [obs_dim] + list(units) + [1]
    params = []
    for i in range(len(layer_dims) - 1):
        key, sub = jax.random.split(key)
        out_d, in_d = layer_dims[i + 1], layer_dims[i]
        w = _orthogonal(sub, out_d, in_d, init_gain)          # (out, in)
        b = jnp.zeros((out_d,), jnp.float32)
        if i < len(layer_dims) - 2:
            g = jnp.ones((out_d,), jnp.float32)
            be = jnp.zeros((out_d,), jnp.float32)
            params.append((w, b, g, be))
        else:
            params.append((w, b))
    return params, layer_dims


# ---------------------------------------------------------------------------
# Pure-JAX f32 reference (matches the PyTorch module's math).
# ---------------------------------------------------------------------------
def critic_mlp_reference(x, params, eps=1e-5):
    h = x.astype(jnp.float32)
    n = len(params)
    for i, layer in enumerate(params):
        w, b = layer[0], layer[1]
        h = jnp.dot(h, jnp.transpose(w),
                    precision=jax.lax.Precision.HIGHEST) + b
        if i < n - 1:
            g, be = layer[2], layer[3]
            h = jnp.where(h > 0.0, h, jnp.exp(jnp.minimum(h, 0.0)) - 1.0)
            mu = jnp.mean(h, axis=-1, keepdims=True)
            var = jnp.mean((h - mu) ** 2, axis=-1, keepdims=True)
            h = (h - mu) * jax.lax.rsqrt(var + eps) * g + be
    return h


if __name__ == "__main__":
    obs_dim = 32
    units = [64, 64]
    batch = 512            # tile chooser -> bt=256, grid=2 ("parallel" axis)

    key = jax.random.PRNGKey(0)
    key, pkey, xkey = jax.random.split(key, 3)

    params, layer_dims = make_critic_params(pkey, obs_dim, units)
    x = jax.random.normal(xkey, (batch, obs_dim), dtype=jnp.float32)

    out = critic_mlp_forward(x, params, layer_dims, batch_tile=1024)
    out = jax.block_until_ready(out)

    ref = critic_mlp_reference(x, params)
    np.testing.assert_allclose(np.asarray(out), np.asarray(ref),
                               rtol=1e-3, atol=1e-3)
    assert out.shape == (batch, 1)

    print("KERNEL_OK")
</pallas_src>

<mosaic_0001>
module attributes {stable_mosaic.version = 11 : i64} {
  func.func @kernel(%arg0: i32, %arg1: memref<256x32xf32, #tpu.memory_space<vmem>>, %arg2: memref<288x128xf32, #tpu.memory_space<vmem>>, %arg3: memref<8x128xf32, #tpu.memory_space<vmem>>, %arg4: memref<1x256xf32, #tpu.memory_space<vmem>>) attributes {dimension_semantics = [#tpu.dimension_semantics<parallel>], iteration_bounds = array<i64: 2>, scalar_prefetch = 0 : i64, scratch_operands = 0 : i64, tpu.core_type = #tpu.core_type<tc>, window_params = [{transform_indices = @transform_0, window_bounds = array<i64: 256, 32>}, {pipeline_mode = #tpu.pipeline_mode<synchronous>, transform_indices = @transform_1, window_bounds = array<i64: 288, 128>}, {pipeline_mode = #tpu.pipeline_mode<synchronous>, transform_indices = @transform_2, window_bounds = array<i64: 8, 128>}, {transform_indices = @transform_3, window_bounds = array<i64: 1, 256>}]} {
    %c0 = arith.constant 0 : index
    %c0_0 = arith.constant 0 : index
    %0 = vector.load %arg1[%c0, %c0_0] : memref<256x32xf32, #tpu.memory_space<vmem>>, vector<256x32xf32>
    %c0_1 = arith.constant 0 : index
    %c0_2 = arith.constant 0 : index
    %1 = vector.load %arg2[%c0_1, %c0_2] : memref<288x128xf32, #tpu.memory_space<vmem>>, vector<32x128xf32>
    %c0_3 = arith.constant 0 : index
    %c0_4 = arith.constant 0 : index
    %2 = vector.load %arg3[%c0_3, %c0_4] : memref<8x128xf32, #tpu.memory_space<vmem>>, vector<1x128xf32>
    %c1 = arith.constant 1 : index
    %c0_5 = arith.constant 0 : index
    %3 = vector.load %arg3[%c1, %c0_5] : memref<8x128xf32, #tpu.memory_space<vmem>>, vector<1x128xf32>
    %c2 = arith.constant 2 : index
    %c0_6 = arith.constant 0 : index
    %4 = vector.load %arg3[%c2, %c0_6] : memref<8x128xf32, #tpu.memory_space<vmem>>, vector<1x128xf32>
    %cst = arith.constant dense<0.000000e+00> : vector<256x128xf32>
    %5 = tpu.matmul %0, %1, %cst {dimension_numbers = #tpu.dot_dimension_numbers<[1], [0], [0], [1], [0, 0, 1, 1], [], []>} : vector<256x32xf32>, vector<32x128xf32>, vector<256x128xf32> -> vector<256x128xf32>
    %6 = vector.broadcast %2 : vector<1x128xf32> to vector<256x128xf32>
    %7 = arith.addf %5, %6 : vector<256x128xf32>
    %cst_7 = arith.constant 0.000000e+00 : f32
    %8 = vector.broadcast %cst_7 : f32 to vector<256x128xf32>
    %9 = arith.cmpf ogt, %7, %8 : vector<256x128xf32>
    %cst_8 = arith.constant 0.000000e+00 : f32
    %10 = vector.broadcast %cst_8 : f32 to vector<256x128xf32>
    %11 = arith.minimumf %7, %10 : vector<256x128xf32>
    %12 = math.exp %11 : vector<256x128xf32>
    %cst_9 = arith.constant 1.000000e+00 : f32
    %13 = vector.broadcast %cst_9 : f32 to vector<256x128xf32>
    %14 = arith.subf %12, %13 : vector<256x128xf32>
    %15 = arith.select %9, %7, %14 : vector<256x128xi1>, vector<256x128xf32>
    %cst_10 = arith.constant dense<0.000000e+00> : vector<256xf32>
    %16 = vector.multi_reduction <add>, %15, %cst_10 [1] : vector<256x128xf32> to vector<256xf32>
    %17 = vector.shape_cast %16 : vector<256xf32> to vector<256x1xf32>
    %cst_11 = arith.constant 1.562500e-02 : f32
    %18 = vector.broadcast %cst_11 : f32 to vector<256x1xf32>
    %19 = arith.mulf %17, %18 : vector<256x1xf32>
    %20 = arith.mulf %15, %15 : vector<256x128xf32>
    %cst_12 = arith.constant dense<0.000000e+00> : vector<256xf32>
    %21 = vector.multi_reduction <add>, %20, %cst_12 [1] : vector<256x128xf32> to vector<256xf32>
    %22 = vector.shape_cast %21 : vector<256xf32> to vector<256x1xf32>
    %cst_13 = arith.constant 1.562500e-02 : f32
    %23 = vector.broadcast %cst_13 : f32 to vector<256x1xf32>
    %24 = arith.mulf %22, %23 : vector<256x1xf32>
    %25 = arith.mulf %19, %19 : vector<256x1xf32>
    %26 = arith.subf %24, %25 : vector<256x1xf32>
    %27 = vector.broadcast %19 : vector<256x1xf32> to vector<256x128xf32>
    %28 = arith.subf %15, %27 : vector<256x128xf32>
    %cst_14 = arith.constant 9.99999974E-6 : f32
    %29 = vector.broadcast %cst_14 : f32 to vector<256x1xf32>
    %30 = arith.addf %26, %29 : vector<256x1xf32>
    %31 = math.rsqrt %30 : vector<256x1xf32>
    %32 = vector.broadcast %31 : vector<256x1xf32> to vector<256x128xf32>
    %33 = arith.mulf %28, %32 : vector<256x128xf32>
    %34 = vector.broadcast %3 : vector<1x128xf32> to vector<256x128xf32>
    %35 = arith.mulf %33, %34 : vector<256x128xf32>
    %36 = vector.broadcast %4 : vector<1x128xf32> to vector<256x128xf32>
    %37 = arith.addf %35, %36 : vector<256x128xf32>
    %c32 = arith.constant 32 : index
    %c0_15 = arith.constant 0 : index
    %38 = vector.load %arg2[%c32, %c0_15] : memref<288x128xf32, #tpu.memory_space<vmem>>, vector<128x128xf32>
    %c3 = arith.constant 3 : index
    %c0_16 = arith.constant 0 : index
    %39 = vector.load %arg3[%c3, %c0_16] : memref<8x128xf32, #tpu.memory_space<vmem>>, vector<1x128xf32>
    %c4 = arith.constant 4 : index
    %c0_17 = arith.constant 0 : index
    %40 = vector.load %arg3[%c4, %c0_17] : memref<8x128xf32, #tpu.memory_space<vmem>>, vector<1x128xf32>
    %c5 = arith.constant 5 : index
    %c0_18 = arith.constant 0 : index
    %41 = vector.load %arg3[%c5, %c0_18] : memref<8x128xf32, #tpu.memory_space<vmem>>, vector<1x128xf32>
    %cst_19 = arith.constant dense<0.000000e+00> : vector<256x128xf32>
    %42 = tpu.matmul %37, %38, %cst_19 {dimension_numbers = #tpu.dot_dimension_numbers<[1], [0], [0], [1], [0, 0, 1, 1], [], []>} : vector<256x128xf32>, vector<128x128xf32>, vector<256x128xf32> -> vector<256x128xf32>
    %43 = vector.broadcast %39 : vector<1x128xf32> to vector<256x128xf32>
    %44 = arith.addf %42, %43 : vector<256x128xf32>
    %cst_20 = arith.constant 0.000000e+00 : f32
    %45 = vector.broadcast %cst_20 : f32 to vector<256x128xf32>
    %46 = arith.cmpf ogt, %44, %45 : vector<256x128xf32>
    %cst_21 = arith.constant 0.000000e+00 : f32
    %47 = vector.broadcast %cst_21 : f32 to vector<256x128xf32>
    %48 = arith.minimumf %44, %47 : vector<256x128xf32>
    %49 = math.exp %48 : vector<256x128xf32>
    %cst_22 = arith.constant 1.000000e+00 : f32
    %50 = vector.broadcast %cst_22 : f32 to vector<256x128xf32>
    %51 = arith.subf %49, %50 : vector<256x128xf32>
    %52 = arith.select %46, %44, %51 : vector<256x128xi1>, vector<256x128xf32>
    %cst_23 = arith.constant dense<0.000000e+00> : vector<256xf32>
    %53 = vector.multi_reduction <add>, %52, %cst_23 [1] : vector<256x128xf32> to vector<256xf32>
    %54 = vector.shape_cast %53 : vector<256xf32> to vector<256x1xf32>
    %cst_24 = arith.constant 1.562500e-02 : f32
    %55 = vector.broadcast %cst_24 : f32 to vector<256x1xf32>
    %56 = arith.mulf %54, %55 : vector<256x1xf32>
    %57 = arith.mulf %52, %52 : vector<256x128xf32>
    %cst_25 = arith.constant dense<0.000000e+00> : vector<256xf32>
    %58 = vector.multi_reduction <add>, %57, %cst_25 [1] : vector<256x128xf32> to vector<256xf32>
    %59 = vector.shape_cast %58 : vector<256xf32> to vector<256x1xf32>
    %cst_26 = arith.constant 1.562500e-02 : f32
    %60 = vector.broadcast %cst_26 : f32 to vector<256x1xf32>
    %61 = arith.mulf %59, %60 : vector<256x1xf32>
    %62 = arith.mulf %56, %56 : vector<256x1xf32>
    %63 = arith.subf %61, %62 : vector<256x1xf32>
    %64 = vector.broadcast %56 : vector<256x1xf32> to vector<256x128xf32>
    %65 = arith.subf %52, %64 : vector<256x128xf32>
    %cst_27 = arith.constant 9.99999974E-6 : f32
    %66 = vector.broadcast %cst_27 : f32 to vector<256x1xf32>
    %67 = arith.addf %63, %66 : vector<256x1xf32>
    %68 = math.rsqrt %67 : vector<256x1xf32>
    %69 = vector.broadcast %68 : vector<256x1xf32> to vector<256x128xf32>
    %70 = arith.mulf %65, %69 : vector<256x128xf32>
    %71 = vector.broadcast %40 : vector<1x128xf32> to vector<256x128xf32>
    %72 = arith.mulf %70, %71 : vector<256x128xf32>
    %73 = vector.broadcast %41 : vector<1x128xf32> to vector<256x128xf32>
    %74 = arith.addf %72, %73 : vector<256x128xf32>
    %c160 = arith.constant 160 : index
    %c0_28 = arith.constant 0 : index
    %75 = vector.load %arg2[%c160, %c0_28] : memref<288x128xf32, #tpu.memory_space<vmem>>, vector<128x128xf32>
    %c6 = arith.constant 6 : index
    %c0_29 = arith.constant 0 : index
    %76 = vector.load %arg3[%c6, %c0_29] : memref<8x128xf32, #tpu.memory_space<vmem>>, vector<1x1xf32>
    %cst_30 = arith.constant dense<0.000000e+00> : vector<256x128xf32>
    %77 = tpu.matmul %74, %75, %cst_30 {dimension_numbers = #tpu.dot_dimension_numbers<[1], [0], [0], [1], [0, 0, 1, 1], [], []>} : vector<256x128xf32>, vector<128x128xf32>, vector<256x128xf32> -> vector<256x128xf32>
    %78 = tpu.transpose %77, [1, 0] : vector<256x128xf32> -> vector<128x256xf32>
    %79 = vector.extract_strided_slice %78 {offsets = [0, 0], sizes = [1, 256], strides = [1, 1]} : vector<128x256xf32> to vector<1x256xf32>
    %80 = vector.broadcast %76 : vector<1x1xf32> to vector<1x256xf32>
    %81 = arith.addf %79, %80 : vector<1x256xf32>
    %c0_31 = arith.constant 0 : index
    %c0_32 = arith.constant 0 : index
    %82 = vector.load %arg4[%c0_31, %c0_32] : memref<1x256xf32, #tpu.memory_space<vmem>>, vector<1x256xf32>
    tpu.vector_store %arg4[%c0_31, %c0_32], %81 {strides = array<i32>} : memref<1x256xf32, #tpu.memory_space<vmem>>, vector<1x256xf32>,
    return
  }
  func.func @transform_0(%arg0: i32) -> (i32, i32) {
    %c0_i32 = arith.constant 0 : i32
    %c0_i32_0 = arith.constant 0 : i32
    return %arg0, %c0_i32 : i32, i32
  }
  func.func @transform_1(%arg0: i32) -> (i32, i32) {
    %c0_i32 = arith.constant 0 : i32
    %c0_i32_0 = arith.constant 0 : i32
    %c0_i32_1 = arith.constant 0 : i32
    return %c0_i32, %c0_i32_0 : i32, i32
  }
  func.func @transform_2(%arg0: i32) -> (i32, i32) {
    %c0_i32 = arith.constant 0 : i32
    %c0_i32_0 = arith.constant 0 : i32
    %c0_i32_1 = arith.constant 0 : i32
    return %c0_i32, %c0_i32_0 : i32, i32
  }
  func.func @transform_3(%arg0: i32) -> (i32, i32) {
    %c0_i32 = arith.constant 0 : i32
    %c0_i32_0 = arith.constant 0 : i32
    return %c0_i32, %arg0 : i32, i32
  }
}

</mosaic_0001>

<bundles_post_ra>
// kernel: tpu_custom_call.1
= control target key start
LH: loop header
LB: loop body
LE: loop exit
PB: predicated region body
PF: predicated region fallthrough
CT: control target
= control target key end

     0   :  { %8 = vsyncpa [#allocation3], 0  ;;  %s5417_s0 = inlined_call_operand.vmem [shape: f32[512,32], index: 0, kind: input, shape index: {}]   ;;  %s5418_s1 = inlined_call_operand.vmem [shape: f32[288,128], index: 1, kind: input, shape index: {}]   ;;  %s5419_s2 = inlined_call_operand.vmem [shape: f32[8,128], index: 2, kind: input, shape index: {}]   ;;  %s5420_s3 = inlined_call_operand.hbm [shape: f32[1,512], index: 3, kind: output, shape index: {}]  }
   0x1   :  { %10 = vsyncpa [#allocation3 + $0x1], 0  ;;  %s3305_s12 = smov 0   ;;  %s3307_s13 = smov 0  }
   0x2   :  { %s3309_s14 = smov 0   ;;  %s3311_s15 = smov 0  }
   0x3 LB: > { %s3326_s16 = sadd.s32 4294967295, %s3282_s15   ;;  %s2766_s17 = sadd.s32 4294967294, %s3282_s15   ;;  %s3282_s15 = sphi %s3311_s15, %s5474_s15   ;;  %s3278_s14 = sphi %s3309_s14, %s5473_s14   ;;  %s3274_s13 = sphi %s3307_s13, %s5472_s13   ;;  %s3270_s12 = sphi %s3305_s12, %s5471_s12  }
   0x4   : > { %s3330_s18 = sadd.s32 1, %s3282_s15   ;;  %s91_s19 = sadd.s32 1, %s3278_s14 }
   0x5   : > { %s88_s20 = ssub.s32 %s3282_s15, %s3330_s18  ;;  %p101_p0 = scmp.ne.s32.totalorder %s3278_s14, %s3274_s13 }
   0x6   : > { %p89_p1 = scmp.eq.s32.totalorder %s88_s20, 0  ;;  %p102_p2 = scmp.eq.s32.totalorder %s3326_s16, 1 }
   0x7   : > { %p107_p3 = scmp.ne.s32.totalorder %s3274_s13, %s3270_s12  ;;  %p108_p4 = scmp.eq.s32.totalorder %s2766_s17, 1 }
   0x8   : > { %s3341_s21 = scalar_select %p89_p1, %s3278_s14, %s91_s19  }
   0x9   : > { %p3343_p5 = por %p102_p2, %p101_p0  ;;  %p3347_p6 = por %p108_p4, %p107_p3 }
   0xa   : > { %p2769_p7 = scmp.ge.s32.totalorder %s3282_s15, 1  ;;  %p141_p8 = scmp.lt.s32.totalorder %s3282_s15, 3 }
   0xc   : > { %p142_p9 = pnand %p2769_p7, %p141_p8 }
   0xd   : > { %s2771_s28 = sshll.u32 (!%p142_p9), %s3326_s16, 5  ;;  %s162_s17 = sand.u32 (!%p142_p9), 1, %s3274_s13  }
   0xe   : > { %145 = sbr.rel (%p142_p9) target bundleno = 1157 (0x485), region = 32  ;;  %p166_p10 = scmp.lt.s32.totalorder (!%p142_p9), %s2771_s28, 63 }
   0xf   : > { %s2770_s19 = sshll.u32 (!%p142_p9), %s162_s17, 1  ;;  %s2870_s20 = sshll.u32 (!%p142_p9), %s3326_s16, 1 }
  0x10   : > { %s2702_s26 = scalar_lea.hbm (!%p142_p9), %s5420_s3, %s2870_s20  ;;  %s164_s27 = scalar_lea.vmem (!%p142_p9), [#allocation2], %s2770_s19 }
  0x11   : > { %s2706_s29 = sshll.u32 (!%p142_p9), %s2702_s26, 4  ;;  %s2692_s30 = scalar_lea.sflag (!%p142_p9), [#allocation3], %s162_s17  ;;  %s2707_s29 = int_to_ptr.hbm [resolvable:$true] %s2706_s29 }
  0x12   : > { %s3234_s16 = sshra.s32 (!%p142_p9), %s2707_s29, 4  ;;  %s3240_s7 = scalar_lea.hbm (!%p142_p9), %s5420_s3, 4  ;;  %s3235_s16 = int_to_ptr.hbm [resolvable:$true] %s3234_s16 }
  0x13   : > { %v207_v0 = vld [vmem:[%s5418_s1 + $0x18] sm:$0xff]  ;;  %v206_v1 = vld [vmem:[%s5418_s1 + $0x10] sm:$0xff]  ;;  %v205_v2 = vld [vmem:[%s5418_s1 + $0x8] sm:$0xff]  ;;  %s5476_s28 = smov (!%p166_p10, %s2771_s28), 63  ;;  %vm212_vm0 = vcmask 261120   ;;  %s3236_s4 = scalar_lea.hbm %s3235_s16, 2 }
  0x14   : > { %321 = vmatpush.msra.mxu0 %v207_v0  ;;  %2873 = vmatpush.msra.mxu3 %v207_v0  ;;  %v204_v3 = vld [vmem:[%s5418_s1] sm:$0xff]  ;;  %s2772_s6 = sshll.u32 %s5476_s28, 3  ;;  %s2704_s28 = sshll.u32 %s164_s27, 4  ;;  %s2705_s28 = int_to_ptr.vmem [resolvable:$true] %s2704_s28 }
  0x15   : > { %s3369_s9 = scalar_lea.vmem %s5417_s0, %s2772_s6  ;;  %v3406_v20 = vld [vmem:[%s5419_s2] ss:$0 sm:$0xff]  ;;  %p3237_p11 = scmp.ne.s32.totalorder %s3235_s16, %s3236_s4 }
  0x16   : > { %322 = vmatpush.msra.mxu0 %v206_v1  ;;  %2874 = vmatpush.msra.mxu3 %v206_v1  ;;  %v172_v4 = vld [vmem:[%s3369_s9] sm:$0xff]  ;;  %v173_v5 = vld [vmem:[%s3369_s9 + $0x8] sm:$0xff]  ;;  %v174_v6 = vld [vmem:[%s3369_s9 + $0x10] sm:$0xff]  ;;  %p3241_p0 = scmp.lt.s32.totalorder %s3235_s16, %s5420_s3  ;;  %p3242_p1 = scmp.lt.s32.totalorder %s3240_s7, %s3236_s4 }
  0x17   : > { %v175_v7 = vld [vmem:[%s3369_s9 + $0x18] sm:$0xff]  ;;  %v176_v8 = vld [vmem:[%s3369_s9 + $0x20] sm:$0xff]  ;;  %v177_v9 = vld [vmem:[%s3369_s9 + $0x28] sm:$0xff]  ;;  %p3238_p12 = pnand %p3237_p11, %p3343_p5 }
  0x18   : > { %323 = vmatpush.msra.mxu0 %v205_v2  ;;  %2875 = vmatpush.msra.mxu3 %v205_v2  ;;  %v178_v10 = vld [vmem:[%s3369_s9 + $0x30] sm:$0xff]  ;;  %v179_v11 = vld [vmem:[%s3369_s9 + $0x38] sm:$0xff]  ;;  %v180_v12 = vld [vmem:[%s3369_s9 + $0x40] sm:$0xff]  ;;  %p3243_p2 = por %p3242_p1, %p3241_p0 }
  0x19   : > { %v181_v13 = vld [vmem:[%s3369_s9 + $0x48] sm:$0xff]  ;;  %v182_v14 = vld [vmem:[%s3369_s9 + $0x50] sm:$0xff]  ;;  %v183_v15 = vld [vmem:[%s3369_s9 + $0x58] sm:$0xff]  ;;  %p3239_p13 = pneg %p3238_p12 }
  0x1a   : > { %324 = vmatpush.msra.mxu0 %v204_v3  ;;  %2876 = vmatpush.msra.mxu3 %v204_v3  ;;  %v184_v16 = vld [vmem:[%s3369_s9 + $0x60] sm:$0xff]  ;;  %v185_v17 = vld [vmem:[%s3369_s9 + $0x68] sm:$0xff]  ;;  %v186_v18 = vld [vmem:[%s3369_s9 + $0x70] sm:$0xff] }
  0x1b   : > { %2773 = vmatmul.msk.f32.vlgmr.msra.gmra.mxu0 %vm212_vm0, %v172_v4  ;;  %v187_v19 = vld [vmem:[%s3369_s9 + $0x78] sm:$0xff]  ;;  %v188_v22 = vld [vmem:[%s3369_s9 + $0x80] sm:$0xff]  ;;  %v189_v27 = vld [vmem:[%s3369_s9 + $0x88] sm:$0xff]  ;;  %p3244_p3 = pnand %p3243_p2, %p3239_p13 }
  0x1c   : > { %v190_v35 = vld [vmem:[%s3369_s9 + $0x90] sm:$0xff]  ;;  %v191_v44 = vld [vmem:[%s3369_s9 + $0x98] sm:$0xff]  ;;  %v192_v54 = vld [vmem:[%s3369_s9 + $0xa0] sm:$0xff] }
  0x1d   : > { %v198_v49 = vld [vmem:[%s3369_s9 + $0xd0] sm:$0xff]  ;;  %v193_v63 = vld [vmem:[%s3369_s9 + $0xa8] sm:$0xff] }
  0x1e   : > { %2799 = vmatmul.msk.f32.vlgmr.msra.gmra.mxu3 %vm212_vm0, %v198_v49 }
  0x23   : > { %2774 = vmatmul.msk.f32.gmra.mxu0 %vm212_vm0, %v173_v5  ;;  %v199_v5 = vld [vmem:[%s3369_s9 + $0xd8] sm:$0xff] }
  0x26   : > { %2800 = vmatmul.msk.f32.gmra.mxu3 %vm212_vm0, %v199_v5 }
  0x2b   : > { %2775 = vmatmul.msk.f32.gmra.mxu0 %vm212_vm0, %v174_v6 }
  0x33   : > { %2776 = vmatmul.msk.f32.gmra.mxu0 %vm212_vm0, %v175_v7 }
  0x3b   : > { %2777 = vmatmul.msk.f32.gmra.mxu0 %vm212_vm0, %v176_v8 }
  0x43   : > { %2778 = vmatmul.msk.f32.gmra.mxu0 %vm212_vm0, %v177_v9  ;;  %v194_v9 = vld [vmem:[%s3369_s9 + $0xb0] sm:$0xff] }
  0x4b   : > { %2779 = vmatmul.msk.f32.gmra.mxu0 %vm212_vm0, %v178_v10 }
  0x53   : > { %2780 = vmatmul.msk.f32.gmra.mxu0 %vm212_vm0, %v179_v11 }
  0x5b   : > { %2781 = vmatmul.msk.f32.gmra.mxu0 %vm212_vm0, %v180_v12 }
  0x63   : > { %2782 = vmatmul.msk.f32.gmra.mxu0 %vm212_vm0, %v181_v13 }
  0x6b   : > { %2783 = vmatmul.msk.f32.gmra.mxu0 %vm212_vm0, %v182_v14 }
  0x73   : > { %2784 = vmatmul.msk.f32.gmra.mxu0 %vm212_vm0, %v183_v15 }
  0x7b   : > { %2785 = vmatmul.msk.f32.gmra.mxu0 %vm212_vm0, %v184_v16 }
  0x83   : > { %2786 = vmatmul.msk.f32.gmra.mxu0 %vm212_vm0, %v185_v17 }
  0x8b   : > { %2787 = vmatmul.msk.f32.gmra.mxu0 %vm212_vm0, %v186_v18  ;;  %v195_v18 = vld [vmem:[%s3369_s9 + $0xb8] sm:$0xff] }
  0x93   : > { %2788 = vmatmul.msk.f32.gmra.mxu0 %vm212_vm0, %v187_v19 }
  0x98   : > { %v326_v21 = vpop.f32.mrf.mxu0 }
  0x99   : > { %v327_v23 = vadd.f32 %v3406_v20, %v326_v21 }
  0x9b   : > { %v454_v24 = vmin.f32 %v327_v23, 0.0  ;;  %2789 = vmatmul.msk.f32.gmra.mxu0 %vm212_vm0, %v188_v22  ;;  %vm422_vm1 = vcmp.gt.f32.partialorder %v327_v23, 0.0 }
  0x9d   : > { %v486_v25 = vmul.f32 1.442695, %v454_v24 }
  0x9f   : > { %2957 = vpow2.f32 %v486_v25 }
  0xa0   : > { %v329_v26 = vpop.f32.mrf.mxu0 }
  0xa1   : > { %v330_v28 = vadd.f32 %v3406_v20, %v329_v26 }
  0xa3   : > { %v455_v29 = vmin.f32 %v330_v28, 0.0  ;;  %2790 = vmatmul.msk.f32.gmra.mxu0 %vm212_vm0, %v189_v27  ;;  %vm423_vm2 = vcmp.gt.f32.partialorder %v330_v28, 0.0 }
  0xa5   : > { %v2958_v30 = vpop.eup %2957  ;;  %v488_v31 = vmul.f32 1.442695, %v455_v29  ;;  %v196_v29 = vld [vmem:[%s3369_s9 + $0xc0] sm:$0xff] }
  0xa6   : > { %v2805_v32 = vadd.f32 -1.0, %v2958_v30 }
  0xa7   : > { %2959 = vpow2.f32 %v488_v31 }
  0xa8   : > { %v332_v33 = vpop.f32.mrf.mxu0  ;;  %v3414_v34 = vsel %vm422_vm1, %v327_v23, %v2805_v32  ;;  %v200_v23 = vld [vmem:[%s3369_s9 + $0xe0] sm:$0xff] }
  0xa9   : > { %v333_v36 = vadd.f32 %v3406_v20, %v332_v33  ;;  %614 = vadd.xlane.f32.xlu0 %v3414_v34  ;;  %v710_v41 = vmul.f32 %v3414_v34, %v3414_v34  ;;  %2801 = vmatmul.msk.f32.gmra.mxu3 %vm212_vm0, %v200_v23  ;;  %v201_v33 = vld [vmem:[%s3369_s9 + $0xe8] sm:$0xff]  ;;  %v1398_v23 = vld [vmem:[%s5418_s1 + $0x90] sm:$0xff] }
  0xab   : > { %v456_v37 = vmin.f32 %v333_v36, 0.0  ;;  %2791 = vmatmul.msk.f32.gmra.mxu0 %vm212_vm0, %v190_v35  ;;  %vm424_vm3 = vcmp.gt.f32.partialorder %v333_v36, 0.0 }
  0xad   : > { %v2960_v38 = vpop.eup %2959  ;;  %v490_v39 = vmul.f32 1.442695, %v456_v37 }
  0xae   : > { %v2806_v40 = vadd.f32 -1.0, %v2960_v38 }
  0xaf   : > { %2961 = vpow2.f32 %v490_v39 }
  0xb0   : > { %v335_v42 = vpop.f32.mrf.mxu0  ;;  %v3422_v43 = vsel %vm423_vm2, %v330_v28, %v2806_v40  ;;  %v197_v40 = vld [vmem:[%s3369_s9 + $0xc8] sm:$0xff] }
  0xb1   : > { %v336_v45 = vadd.f32 %v3406_v20, %v335_v42  ;;  %616 = vadd.xlane.f32.xlu1 %v3422_v43  ;;  %742 = vadd.xlane.f32.xlu0 %v710_v41  ;;  %v711_v51 = vmul.f32 %v3422_v43, %v3422_v43 }
  0xb2   : > { %2802 = vmatmul.msk.f32.gmra.mxu3 %vm212_vm0, %v201_v33  ;;  %v1395_v33 = vld [vmem:[%s5418_s1 + $0x78] sm:$0xff] }
  0xb3   : > { %v457_v46 = vmin.f32 %v336_v45, 0.0  ;;  %2792 = vmatmul.msk.f32.gmra.mxu0 %vm212_vm0, %v191_v44  ;;  %vm425_vm4 = vcmp.gt.f32.partialorder %v336_v45, 0.0 }
  0xb5   : > { %v2962_v47 = vpop.eup %2961  ;;  %v492_v48 = vmul.f32 1.442695, %v457_v46 }
  0xb6   : > { %v2807_v50 = vadd.f32 -1.0, %v2962_v47 }
  0xb7   : > { %2963 = vpow2.f32 %v492_v48 }
  0xb8   : > { %v338_v52 = vpop.f32.mrf.mxu0  ;;  %v3432_v53 = vsel %vm424_vm3, %v333_v36, %v2807_v50 }
  0xb9   : > { %v339_v55 = vadd.f32 %v3406_v20, %v338_v52  ;;  %618 = vadd.xlane.f32.xlu2 %v3432_v53  ;;  %744 = vadd.xlane.f32.xlu1 %v711_v51  ;;  %v712_v60 = vmul.f32 %v3432_v53, %v3432_v53 }
  0xbb   : > { %v458_v56 = vmin.f32 %v339_v55, 0.0  ;;  %2793 = vmatmul.msk.f32.gmra.mxu0 %vm212_vm0, %v192_v54  ;;  %vm426_vm5 = vcmp.gt.f32.partialorder %v339_v55, 0.0 }
  0xbd   : > { %v2964_v57 = vpop.eup %2963  ;;  %v494_v58 = vmul.f32 1.442695, %v458_v56 }
  0xbe   : > { %v2808_v59 = vadd.f32 -1.0, %v2964_v57 }
  0xbf   : > { %2965 = vpow2.f32 %v494_v58 }
  0xc0   : > { %v341_v61 = vpop.f32.mrf.mxu0  ;;  %v3440_v62 = vsel %vm425_vm4, %v336_v45, %v2808_v59  ;;  %v202_v45 = vld [vmem:[%s3369_s9 + $0xf0] sm:$0xff] }
  0xc1   : > { %v342_v0 = vadd.f32 %v3406_v20, %v341_v61  ;;  %746 = vadd.xlane.f32.xlu2 %v712_v60  ;;  %620 = vadd.xlane.f32.xlu0 %v3440_v62  ;;  %v713_v1 = vmul.f32 %v3440_v62, %v3440_v62 }
  0xc2   : > { %2803 = vmatmul.msk.f32.gmra.mxu3 %vm212_vm0, %v202_v45 }
  0xc3   : > { %v459_v2 = vmin.f32 %v342_v0, 0.0  ;;  %2794 = vmatmul.msk.f32.gmra.mxu0 %vm212_vm0, %v193_v63  ;;  %748 = vadd.xlane.f32.xlu1 %v713_v1  ;;  %vm427_vm6 = vcmp.gt.f32.partialorder %v342_v0, 0.0 }
  0xc5   : > { %v2966_v3 = vpop.eup %2965  ;;  %v496_v4 = vmul.f32 1.442695, %v459_v2 }
  0xc6   : > { %v2809_v6 = vadd.f32 -1.0, %v2966_v3 }
  0xc7   : > { %2967 = vpow2.f32 %v496_v4 }
  0xc8   : > { %v344_v7 = vpop.f32.mrf.mxu0  ;;  %v3450_v8 = vsel %vm426_vm5, %v339_v55, %v2809_v6  ;;  %v203_v55 = vld [vmem:[%s3369_s9 + $0xf8] sm:$0xff] }
  0xc9   : > { %v345_v10 = vadd.f32 %v3406_v20, %v344_v7  ;;  %622 = vadd.xlane.f32.xlu2 %v3450_v8  ;;  %v714_v11 = vmul.f32 %v3450_v8, %v3450_v8 }
  0xca   : > { %2804 = vmatmul.msk.f32.gmra.mxu3 %vm212_vm0, %v203_v55 }
  0xcb   : > { %v460_v12 = vmin.f32 %v345_v10, 0.0  ;;  %2795 = vmatmul.msk.f32.gmra.mxu0 %vm212_vm0, %v194_v9  ;;  %750 = vadd.xlane.f32.xlu0 %v714_v11  ;;  %vm428_vm7 = vcmp.gt.f32.partialorder %v345_v10, 0.0 }
  0xcd   : > { %v2968_v13 = vpop.eup %2967  ;;  %v498_v14 = vmul.f32 1.442695, %v460_v12 }
  0xce   : > { %v2810_v15 = vadd.f32 -1.0, %v2968_v13 }
  0xcf   : > { %2969 = vpow2.f32 %v498_v14 }
  0xd0   : > { %v347_v16 = vpop.f32.mrf.mxu0  ;;  %v3458_v17 = vsel %vm427_vm6, %v342_v0, %v2810_v15 }
  0xd1   : > { %v348_v19 = vadd.f32 %v3406_v20, %v347_v16  ;;  %624 = vadd.xlane.f32.xlu1 %v3458_v17  ;;  %v715_v21 = vmul.f32 %v3458_v17, %v3458_v17 }
  0xd3   : > { %v461_v22 = vmin.f32 %v348_v19, 0.0  ;;  %2796 = vmatmul.msk.f32.gmra.mxu0 %vm212_vm0, %v195_v18  ;;  %752 = vadd.xlane.f32.xlu2 %v715_v21  ;;  %vm429_vm8 = vcmp.gt.f32.partialorder %v348_v19, 0.0 }
  0xd5   : > { %v2970_v24 = vpop.eup %2969  ;;  %v500_v25 = vmul.f32 1.442695, %v461_v22 }
  0xd6   : > { %v2811_v26 = vadd.f32 -1.0, %v2970_v24 }
  0xd7   : > { %2971 = vpow2.f32 %v500_v25  ;;  %v1397_v25 = vld [vmem:[%s5418_s1 + $0x88] sm:$0xff] }
  0xd8   : > { %v350_v27 = vpop.f32.mrf.mxu0  ;;  %v3468_v28 = vsel %vm428_vm7, %v345_v10, %v2811_v26 }
  0xd9   : > { %v351_v30 = vadd.f32 %v3406_v20, %v350_v27  ;;  %626 = vadd.xlane.f32.xlu0 %v3468_v28  ;;  %v716_v31 = vmul.f32 %v3468_v28, %v3468_v28 }
  0xdb   : > { %v462_v32 = vmin.f32 %v351_v30, 0.0  ;;  %2797 = vmatmul.msk.f32.gmra.mxu0 %vm212_vm0, %v196_v29  ;;  %754 = vadd.xlane.f32.xlu1 %v716_v31  ;;  %vm430_vm9 = vcmp.gt.f32.partialorder %v351_v30, 0.0  ;;  %v1396_v31 = vld [vmem:[%s5418_s1 + $0x80] sm:$0xff] }
  0xdd   : > { %v2972_v35 = vpop.eup %2971  ;;  %v502_v36 = vmul.f32 1.442695, %v462_v32 }
  0xde   : > { %v2812_v37 = vadd.f32 -1.0, %v2972_v35 }
  0xdf   : > { %2973 = vpow2.f32 %v502_v36 }
  0xe0   : > { %v353_v38 = vpop.f32.mrf.mxu0  ;;  %v3478_v39 = vsel %vm429_vm8, %v348_v19, %v2812_v37  ;;  %v1399_v19 = vld [vmem:[%s5418_s1 + $0x98] sm:$0xff]  ;;  %v1394_v37 = vld [vmem:[%s5418_s1 + $0x70] sm:$0xff] }
  0xe1   : > { %v354_v41 = vadd.f32 %v3406_v20, %v353_v38  ;;  %628 = vadd.xlane.f32.xlu2 %v3478_v39  ;;  %v717_v42 = vmul.f32 %v3478_v39, %v3478_v39  ;;  %1404 = vmatpush.msra.mxu1 %v1399_v19 }
  0xe2   : > { %2877 = vmatpush.msrb.mxu3 %v1399_v19 }
  0xe3   : > { %v463_v44 = vmin.f32 %v354_v41, 0.0  ;;  %2798 = vmatmul.msk.f32.gmra.mxu0 %vm212_vm0, %v197_v40  ;;  %756 = vadd.xlane.f32.xlu0 %v717_v42  ;;  %vm431_vm10 = vcmp.gt.f32.partialorder %v354_v41, 0.0  ;;  %v1393_v40 = vld [vmem:[%s5418_s1 + $0x68] sm:$0xff] }
  0xe4   : > { %1405 = vmatpush.msra.mxu1 %v1398_v23  ;;  %2878 = vmatpush.msrb.mxu3 %v1398_v23 }
  0xe5   : > { %v2974_v46 = vpop.eup %2973  ;;  %v504_v47 = vmul.f32 1.442695, %v463_v44 }
  0xe6   : > { %v2813_v48 = vadd.f32 -1.0, %v2974_v46  ;;  %1406 = vmatpush.msra.mxu1 %v1397_v25  ;;  %2879 = vmatpush.msrb.mxu3 %v1397_v25  ;;  %v1392_v46 = vld [vmem:[%s5418_s1 + $0x60] sm:$0xff] }
  0xe7   : > { %2975 = vpow2.f32 %v504_v47 }
  0xe8   : > { %v356_v49 = vpop.f32.mrf.mxu0  ;;  %v3488_v50 = vsel %vm430_vm9, %v351_v30, %v2813_v48  ;;  %1407 = vmatpush.msra.mxu1 %v1396_v31  ;;  %2880 = vmatpush.msrb.mxu3 %v1396_v31  ;;  %v1391_v48 = vld [vmem:[%s5418_s1 + $0x58] sm:$0xff] }
  0xe9   : > { %v357_v51 = vadd.f32 %v3406_v20, %v356_v49  ;;  %630 = vadd.xlane.f32.xlu1 %v3488_v50  ;;  %v718_v52 = vmul.f32 %v3488_v50, %v3488_v50 }
  0xea   : > { %1408 = vmatpush.msra.mxu1 %v1395_v33  ;;  %2881 = vmatpush.msrb.mxu3 %v1395_v33 }
  0xeb   : > { %v464_v54 = vmin.f32 %v357_v51, 0.0  ;;  %758 = vadd.xlane.f32.xlu2 %v718_v52  ;;  %vm432_vm11 = vcmp.gt.f32.partialorder %v357_v51, 0.0  ;;  %v1390_v52 = vld [vmem:[%s5418_s1 + $0x50] sm:$0xff] }
  0xec   : > { %1409 = vmatpush.msra.mxu1 %v1394_v37  ;;  %2882 = vmatpush.msrb.mxu3 %v1394_v37 }
  0xed   : > { %v2976_v56 = vpop.eup %2975  ;;  %v506_v57 = vmul.f32 1.442695, %v464_v54 }
  0xee   : > { %v2814_v58 = vadd.f32 -1.0, %v2976_v56  ;;  %1410 = vmatpush.msra.mxu1 %v1393_v40  ;;  %2883 = vmatpush.msrb.mxu3 %v1393_v40 }
  0xef   : > { %2977 = vpow2.f32 %v506_v57  ;;  %v1389_v57 = vld [vmem:[%s5418_s1 + $0x48] sm:$0xff] }
  0xf0   : > { %v359_v59 = vpop.f32.mrf.mxu0  ;;  %v3496_v60 = vsel %vm431_vm10, %v354_v41, %v2814_v58  ;;  %1411 = vmatpush.msra.mxu1 %v1392_v46  ;;  %2884 = vmatpush.msrb.mxu3 %v1392_v46 }
  0xf1   : > { %v360_v61 = vadd.f32 %v3406_v20, %v359_v59  ;;  %632 = vadd.xlane.f32.xlu0 %v3496_v60  ;;  %v719_v63 = vmul.f32 %v3496_v60, %v3496_v60 }
  0xf2   : > { %1412 = vmatpush.msra.mxu1 %v1391_v48  ;;  %2885 = vmatpush.msrb.mxu3 %v1391_v48 }
  0xf3   : > { %v465_v0 = vmin.f32 %v360_v61, 0.0  ;;  %760 = vadd.xlane.f32.xlu1 %v719_v63  ;;  %vm433_vm12 = vcmp.gt.f32.partialorder %v360_v61, 0.0 }
  0xf4   : > { %1413 = vmatpush.msra.mxu1 %v1390_v52  ;;  %2886 = vmatpush.msrb.mxu3 %v1390_v52 }
  0xf5   : > { %v2978_v1 = vpop.eup %2977  ;;  %v508_v2 = vmul.f32 1.442695, %v465_v0 }
  0xf6   : > { %v2815_v3 = vadd.f32 -1.0, %v2978_v1  ;;  %1414 = vmatpush.msra.mxu1 %v1389_v57  ;;  %2887 = vmatpush.msrb.mxu3 %v1389_v57  ;;  %v1387_v1 = vld [vmem:[%s5418_s1 + $0x38] sm:$0xff] }
  0xf7   : > { %2979 = vpow2.f32 %v508_v2 }
  0xf8   : > { %v362_v4 = vpop.f32.mrf.mxu0  ;;  %v3502_v5 = vsel %vm432_vm11, %v357_v51, %v2815_v3 }
  0xf9   : > { %v363_v6 = vadd.f32 %v3406_v20, %v362_v4  ;;  %634 = vadd.xlane.f32.xlu2 %v3502_v5  ;;  %v720_v7 = vmul.f32 %v3502_v5, %v3502_v5 }
  0xfb   : > { %v466_v9 = vmin.f32 %v363_v6, 0.0  ;;  %762 = vadd.xlane.f32.xlu0 %v720_v7  ;;  %vm434_vm13 = vcmp.gt.f32.partialorder %v363_v6, 0.0 }
  0xfd   : > { %v2980_v10 = vpop.eup %2979  ;;  %v510_v11 = vmul.f32 1.442695, %v466_v9 }
  0xfe   : > { %v2816_v12 = vadd.f32 -1.0, %v2980_v10  ;;  %v1385_v10 = vld [vmem:[%s5418_s1 + $0x28] sm:$0xff] }
  0xff   : > { %2981 = vpow2.f32 %v510_v11 }
 0x100   : > { %v365_v13 = vpop.f32.mrf.mxu0  ;;  %v3508_v14 = vsel %vm433_vm12, %v360_v61, %v2816_v12  ;;  %v1388_v61 = vld [vmem:[%s5418_s1 + $0x40] sm:$0xff] }
 0x101   : > { %v366_v15 = vadd.f32 %v3406_v20, %v365_v13  ;;  %636 = vadd.xlane.f32.xlu1 %v3508_v14  ;;  %v721_v16 = vmul.f32 %v3508_v14, %v3508_v14  ;;  %1415 = vmatpush.msra.mxu1 %v1388_v61 }
 0x102   : > { %2888 = vmatpush.msrb.mxu3 %v1388_v61 }
 0x103   : > { %v467_v18 = vmin.f32 %v366_v15, 0.0  ;;  %764 = vadd.xlane.f32.xlu2 %v721_v16  ;;  %vm435_vm14 = vcmp.gt.f32.partialorder %v366_v15, 0.0  ;;  %1416 = vmatpush.msra.mxu1 %v1387_v1 }
 0x104   : > { %2889 = vmatpush.msrb.mxu3 %v1387_v1 }
 0x105   : > { %v2982_v21 = vpop.eup %2981  ;;  %v512_v22 = vmul.f32 1.442695, %v467_v18 }
 0x106   : > { %v2817_v24 = vadd.f32 -1.0, %v2982_v21 }
 0x107   : > { %2983 = vpow2.f32 %v512_v22 }
 0x108   : > { %v368_v26 = vpop.f32.mrf.mxu0  ;;  %v3523_v27 = vsel %vm434_vm13, %v363_v6, %v2817_v24  ;;  %v1386_v6 = vld [vmem:[%s5418_s1 + $0x30] sm:$0xff] }
 0x109   : > { %v369_v29 = vadd.f32 %v3406_v20, %v368_v26  ;;  %638 = vadd.xlane.f32.xlu0 %v3523_v27  ;;  %v722_v30 = vmul.f32 %v3523_v27, %v3523_v27  ;;  %1417 = vmatpush.msra.mxu1 %v1386_v6 }
 0x10a   : > { %2890 = vmatpush.msrb.mxu3 %v1386_v6 }
 0x10b   : > { %v468_v32 = vmin.f32 %v369_v29, 0.0  ;;  %766 = vadd.xlane.f32.xlu1 %v722_v30  ;;  %vm436_vm15 = vcmp.gt.f32.partialorder %v369_v29, 0.0  ;;  %1418 = vmatpush.msra.mxu1 %v1385_v10 }
 0x10c   : > { %2891 = vmatpush.msrb.mxu3 %v1385_v10 }
 0x10d   : > { %v2984_v35 = vpop.eup %2983  ;;  %v514_v36 = vmul.f32 1.442695, %v468_v32 }
 0x10e   : > { %v2818_v38 = vadd.f32 -1.0, %v2984_v35 }
 0x10f   : > { %2985 = vpow2.f32 %v514_v36 }
 0x110   : > { %v371_v41 = vpop.f32.mrf.mxu0  ;;  %v3541_v42 = vsel %vm435_vm14, %v366_v15, %v2818_v38  ;;  %v1384_v15 = vld [vmem:[%s5418_s1 + $0x20] sm:$0xff] }
 0x111   : > { %v372_v44 = vadd.f32 %v3406_v20, %v371_v41  ;;  %640 = vadd.xlane.f32.xlu2 %v3541_v42  ;;  %v723_v45 = vmul.f32 %v3541_v42, %v3541_v42  ;;  %1419 = vmatpush.msra.mxu1 %v1384_v15 }
 0x112   : > { %2892 = vmatpush.msrb.mxu3 %v1384_v15 }
 0x113   : > { %v469_v47 = vmin.f32 %v372_v44, 0.0  ;;  %768 = vadd.xlane.f32.xlu0 %v723_v45  ;;  %vm437_vm0 = vcmp.gt.f32.partialorder %v372_v44, 0.0 }
 0x115   : > { %v2986_v49 = vpop.eup %2985  ;;  %v516_v51 = vmul.f32 1.442695, %v469_v47 }
 0x116   : > { %v2819_v54 = vadd.f32 -1.0, %v2986_v49 }
 0x117   : > { %2987 = vpow2.f32 %v516_v51 }
 0x118   : > { %v374_v55 = vpop.f32.mrf.mxu0  ;;  %v3556_v56 = vsel %vm436_vm15, %v369_v29, %v2819_v54 }
 0x119   : > { %v375_v58 = vadd.f32 %v3406_v20, %v374_v55  ;;  %642 = vadd.xlane.f32.xlu1 %v3556_v56  ;;  %v724_v59 = vmul.f32 %v3556_v56, %v3556_v56 }
 0x11b   : > { %v470_v63 = vmin.f32 %v375_v58, 0.0  ;;  %770 = vadd.xlane.f32.xlu2 %v724_v59  ;;  %vm438_vm1 = vcmp.gt.f32.partialorder %v375_v58, 0.0 }
 0x11c   : > { %v615_v0 = vpop.xlane.xlu0 %614 }
 0x11d   : > { %v2988_v2 = vpop.eup %2987  ;;  %v518_v3 = vmul.f32 1.442695, %v470_v63  ;;  %v3579_v11 = vmul.f32 0.015625, %v615_v0 }
 0x11e   : > { %v2820_v4 = vadd.f32 -1.0, %v2988_v2 }
 0x11f   : > { %2989 = vpow2.f32 %v518_v3  ;;  %v838_v22 = vmul.f32 %v3579_v11, %v3579_v11 }
 0x120   : > { %v377_v7 = vpop.f32.mrf.mxu0  ;;  %v3574_v9 = vsel %vm437_vm0, %v372_v44, %v2820_v4 }
 0x121   : > { %v378_v12 = vadd.f32 %v3406_v20, %v377_v7  ;;  %644 = vadd.xlane.f32.xlu0 %v3574_v9  ;;  %v725_v13 = vmul.f32 %v3574_v9, %v3574_v9 }
 0x123   : > { %v471_v16 = vmin.f32 %v378_v12, 0.0  ;;  %772 = vadd.xlane.f32.xlu1 %v725_v13  ;;  %vm439_vm2 = vcmp.gt.f32.partialorder %v378_v12, 0.0 }
 0x124   : > { %v617_v18 = vpop.xlane.xlu1 %616  ;;  %v743_v19 = vpop.xlane.xlu0 %742 }
 0x125   : > { %v2990_v21 = vpop.eup %2989  ;;  %v520_v23 = vmul.f32 1.442695, %v471_v16  ;;  %v806_v24 = vmul.f32 0.015625, %v743_v19  ;;  %v3592_v31 = vmul.f32 0.015625, %v617_v18 }
 0x126   : > { %v2821_v25 = vadd.f32 -1.0, %v2990_v21 }
 0x127   : > { %2991 = vpow2.f32 %v520_v23  ;;  %v870_v26 = vsub.f32 %v806_v24, %v838_v22  ;;  %v839_v41 = vmul.f32 %v3592_v31, %v3592_v31 }
 0x128   : > { %v380_v29 = vpop.f32.mrf.mxu0  ;;  %v3590_v30 = vsel %vm438_vm1, %v375_v58, %v2821_v25 }
 0x129   : > { %v934_v32 = vadd.f32 1e-05, %v870_v26  ;;  %v381_v33 = vadd.f32 %v3406_v20, %v380_v29  ;;  %646 = vadd.xlane.f32.xlu2 %v3590_v30  ;;  %v726_v35 = vmul.f32 %v3590_v30, %v3590_v30 }
 0x12b   : > { %2993 = vrsqrt.f32 %v934_v32  ;;  %v472_v36 = vmin.f32 %v381_v33, 0.0  ;;  %774 = vadd.xlane.f32.xlu0 %v726_v35  ;;  %vm440_vm3 = vcmp.gt.f32.partialorder %v381_v33, 0.0  ;;  %vm972_vm5 = vweird.f32 %v934_v32 }
 0x12c   : > { %v619_v37 = vpop.xlane.xlu2 %618  ;;  %v745_v38 = vpop.xlane.xlu1 %744 }
 0x12d   : > { %v2992_v40 = vpop.eup %2991  ;;  %v522_v44 = vmul.f32 1.442695, %v472_v36  ;;  %v807_v45 = vmul.f32 0.015625, %v745_v38  ;;  %v3602_v52 = vmul.f32 0.015625, %v619_v37 }
 0x12e   : > { %v2822_v46 = vadd.f32 -1.0, %v2992_v40 }
 0x12f   : > { %2995 = vpow2.f32 %v522_v44  ;;  %v871_v47 = vsub.f32 %v807_v45, %v839_v41  ;;  %v840_v2 = vmul.f32 %v3602_v52, %v3602_v52  ;;  %v3644_v41 = vld [vmem:[%s5419_s2 + $0x1] ss:$0 sm:$0xff] }
 0x130   : > { %v383_v48 = vpop.f32.mrf.mxu0  ;;  %v3600_v49 = vsel %vm439_vm2, %v378_v12, %v2822_v46 }
 0x131   : > { %v2994_v51 = vpop.eup %2993  ;;  %v3604_v54 = vadd.f32 1e-05, %v871_v47  ;;  %v3607_v55 = vadd.f32 %v3406_v20, %v383_v48  ;;  %648 = vadd.xlane.f32.xlu1 %v3600_v49  ;;  %v727_v57 = vmul.f32 %v3600_v49, %v3600_v49 }
 0x132   : > { %v967_v58 = vmul.f32 %v2994_v51, %v934_v32  ;;  %vm973_vm4 = vweird.f32 %v2994_v51 }
 0x133   : > { %2997 = vrsqrt.f32 %v3604_v54  ;;  %v473_v59 = vmin.f32 %v3607_v55, 0.0  ;;  %776 = vadd.xlane.f32.xlu2 %v727_v57  ;;  %vm974_vm6 = vmor %vm972_vm5, %vm973_vm4  ;;  %v3652_v57 = vld [vmem:[%s5419_s2 + $0x2] ss:$0 sm:$0xff]  ;;  %vm441_vm7 = vcmp.gt.f32.partialorder %v3607_v55, 0.0  ;;  %vm982_vm9 = vweird.f32 %v3604_v54 }
 0x134   : > { %v968_v61 = vmul.f32 %v2994_v51, %v967_v58  ;;  %v747_v63 = vpop.xlane.xlu2 %746  ;;  %v621_v0 = vpop.xlane.xlu0 %620 }
 0x135   : > { %v2996_v1 = vpop.eup %2995  ;;  %v524_v3 = vmul.f32 1.442695, %v473_v59  ;;  %v808_v4 = vmul.f32 0.015625, %v747_v63  ;;  %v3616_v6 = vmul.f32 0.015625, %v621_v0 }
 0x136   : > { %v969_v7 = vmul.f32 0.5, %v968_v61  ;;  %v749_v10 = vpop.xlane.xlu1 %748  ;;  %v2823_v12 = vadd.f32 -1.0, %v2996_v1 }
 0x137   : > { %2999 = vpow2.f32 %v524_v3  ;;  %v872_v13 = vsub.f32 %v808_v4, %v840_v2  ;;  %v841_v15 = vmul.f32 %v3616_v6, %v3616_v6  ;;  %v809_v18 = vmul.f32 0.015625, %v749_v10 }
 0x138   : > { %v970_v16 = vsub.f32 1.5, %v969_v7  ;;  %v386_v19 = vpop.f32.mrf.mxu0  ;;  %v3620_v21 = vsel %vm440_vm3, %v381_v33, %v2823_v12  ;;  %v902_v33 = vsub.f32 %v3414_v34, %v3579_v11 }
 0x139   : > { %v3622_v22 = vpop.eup %2997  ;;  %v3624_v23 = vadd.f32 1e-05, %v872_v13  ;;  %v3627_v24 = vadd.f32 %v3406_v20, %v386_v19  ;;  %650 = vadd.xlane.f32.xlu0 %v3620_v21  ;;  %v728_v25 = vmul.f32 %v3620_v21, %v3620_v21  ;;  %v873_v29 = vsub.f32 %v809_v18, %v841_v15 }
 0x13a   : > { %v977_v26 = vmul.f32 %v3622_v22, %v3604_v54  ;;  %v971_v35 = vmul.f32 %v2994_v51, %v970_v16  ;;  %vm983_vm8 = vweird.f32 %v3622_v22  ;;  %v903_v19 = vsub.f32 %v3422_v43, %v3592_v31 }
 0x13b   : > { %3001 = vrsqrt.f32 %v3624_v23  ;;  %v474_v36 = vmin.f32 %v3627_v24, 0.0  ;;  %778 = vadd.xlane.f32.xlu2 %v728_v25  ;;  %v3639_v38 = vadd.f32 1e-05, %v873_v29  ;;  %vm3671_vm10 = vmor %vm982_vm9, %vm983_vm8  ;;  %vm442_vm12 = vcmp.gt.f32.partialorder %v3627_v24, 0.0 }
 0x13c   : > { %v978_v37 = vmul.f32 %v3622_v22, %v977_v26  ;;  %v623_v40 = vpop.xlane.xlu2 %622  ;;  %v975_v32 = vsel %vm974_vm6, %v2994_v51, %v971_v35  ;;  %vm992_vm13 = vweird.f32 %v3624_v23 }
 0x13d   : > { %v3000_v44 = vpop.eup %2999  ;;  %v526_v45 = vmul.f32 1.442695, %v474_v36  ;;  %v3646_v34 = vmul.f32 0.015625, %v623_v40  ;;  %v1286_v11 = vmul.f32 %v975_v32, %v902_v33  ;;  %3003 = vrsqrt.f32 %v3639_v38 }
 0x13e   : > { %v979_v46 = vmul.f32 0.5, %v978_v37  ;;  %v751_v47 = vpop.xlane.xlu0 %750  ;;  %v2824_v48 = vadd.f32 -1.0, %v3000_v44  ;;  %vm1002_vm0 = vweird.f32 %v3639_v38 }
 0x13f   : > { %3005 = vpow2.f32 %v526_v45  ;;  %v842_v51 = vmul.f32 %v3646_v34, %v3646_v34  ;;  %v810_v58 = vmul.f32 0.015625, %v751_v47  ;;  %v1319_v0 = vmul.f32 %v3644_v41, %v1286_v11 }
 0x140   : > { %v980_v59 = vsub.f32 1.5, %v979_v46  ;;  %v3658_v61 = vpop.f32.mrf.mxu0  ;;  %v3661_v63 = vsel %vm441_vm7, %v3607_v55, %v2824_v48  ;;  %v904_v48 = vsub.f32 %v3432_v53, %v3602_v52 }
 0x141   : > { %v3002_v1 = vpop.eup %3001  ;;  %v874_v2 = vsub.f32 %v810_v58, %v842_v51  ;;  %652 = vadd.xlane.f32.xlu1 %v3661_v63  ;;  %v729_v3 = vmul.f32 %v3661_v63, %v3661_v63  ;;  %v1352_v7 = vadd.f32 %v3652_v57, %v1319_v0 }
 0x142   : > { %v987_v4 = vmul.f32 %v3002_v1, %v3624_v23  ;;  %v981_v10 = vmul.f32 %v3622_v22, %v980_v59  ;;  %vm993_vm11 = vweird.f32 %v3002_v1 }
 0x143   : > { %v3675_v12 = vadd.f32 1e-05, %v874_v2  ;;  %780 = vadd.xlane.f32.xlu0 %v729_v3  ;;  %v3004_v13 = vpop.eup %3003  ;;  %1420 = vmatmul.f32.vlgmr.msra.gmra.mxu1 %v1352_v7  ;;  %vm994_vm14 = vmor %vm992_vm13, %vm993_vm11 }
 0x144   : > { %v988_v15 = vmul.f32 %v3002_v1, %v987_v4  ;;  %v625_v16 = vpop.xlane.xlu1 %624  ;;  %v985_v54 = vsel %vm3671_vm10, %v3622_v22, %v981_v10  ;;  %v997_v25 = vmul.f32 %v3004_v13, %v3639_v38  ;;  %vm1003_vm15 = vweird.f32 %v3004_v13 }
 0x145   : > { %v3006_v18 = vpop.eup %3005  ;;  %3007 = vrsqrt.f32 %v3675_v12  ;;  %v3684_v29 = vmul.f32 0.015625, %v625_v16  ;;  %v1287_v40 = vmul.f32 %v985_v54, %v903_v19  ;;  %vm1004_vm1 = vmor %vm1002_vm0, %vm1003_vm15  ;;  %v905_v54 = vsub.f32 %v3440_v62, %v3616_v6 }
 0x146   : > { %v989_v26 = vmul.f32 0.5, %v988_v15  ;;  %v753_v35 = vpop.xlane.xlu2 %752  ;;  %v2825_v33 = vadd.f32 -1.0, %v3006_v18  ;;  %v998_v36 = vmul.f32 %v3004_v13, %v997_v25  ;;  %v404_v25 = vpop.f32.mrf.mxu3  ;;  %vm1012_vm3 = vweird.f32 %v3675_v12 }
 0x147   : > { %v811_v37 = vmul.f32 0.015625, %v753_v35  ;;  %v843_v22 = vmul.f32 %v3684_v29, %v3684_v29  ;;  %v1320_v45 = vmul.f32 %v3644_v41, %v1287_v40 }
 0x148   : > { %v990_v32 = vsub.f32 1.5, %v989_v26  ;;  %v3688_v44 = vpop.f32.mrf.mxu0  ;;  %v999_v43 = vmul.f32 0.5, %v998_v36  ;;  %v3692_v31 = vsel %vm442_vm12, %v3627_v24, %v2825_v33 }
 0x149   : > { %v875_v11 = vsub.f32 %v811_v37, %v843_v22  ;;  %654 = vadd.xlane.f32.xlu2 %v3692_v31  ;;  %v1353_v58 = vadd.f32 %v3652_v57, %v1320_v45 }
 0x14a   : > { %v991_v46 = vmul.f32 %v3002_v1, %v990_v32  ;;  %v1000_v51 = vsub.f32 1.5, %v999_v43 }
 0x14b   : > { %v3008_v47 = vpop.eup %3007  ;;  %v3701_v59 = vadd.f32 1e-05, %v875_v11  ;;  %1423 = vmatmul.f32.gmra.mxu1 %v1353_v58 }
 0x14c   : > { %v1007_v24 = vmul.f32 %v3008_v47, %v3675_v12  ;;  %v627_v0 = vpop.xlane.xlu0 %626  ;;  %v995_v2 = vsel %vm994_vm14, %v3002_v1, %v991_v46  ;;  %v1001_v4 = vmul.f32 %v3004_v13, %v1000_v51  ;;  %vm1013_vm2 = vweird.f32 %v3008_v47 }
 0x14d   : > { %v3703_v23 = vmul.f32 0.015625, %v627_v0  ;;  %v1288_v3 = vmul.f32 %v995_v2, %v904_v48  ;;  %3009 = vrsqrt.f32 %v3701_v59  ;;  %vm3725_vm4 = vmor %vm1012_vm3, %vm1013_vm2  ;;  %v3734_v46 = vadd.f32 %v3406_v20, %v404_v25 }
 0x14e   : > { %v1008_v7 = vmul.f32 %v3008_v47, %v1007_v24  ;;  %v755_v53 = vpop.xlane.xlu1 %754  ;;  %v1005_v16 = vsel %vm1004_vm1, %v3004_v13, %v1001_v4  ;;  %v906_v48 = vsub.f32 %v3450_v8, %v3646_v34  ;;  %v3745_v24 = vadd.f32 %v3406_v20, %v3658_v61  ;;  %v407_v2 = vpop.f32.mrf.mxu3 }
 0x14f   : > { %v844_v52 = vmul.f32 %v3703_v23, %v3703_v23  ;;  %v812_v10 = vmul.f32 0.015625, %v755_v53  ;;  %v1321_v1 = vmul.f32 %v3644_v41, %v1288_v3  ;;  %v1289_v35 = vmul.f32 %v1005_v16, %v905_v54 }
 0x150   : > { %v1009_v55 = vmul.f32 0.5, %v1008_v7  ;;  %v3709_v15 = vpop.f32.mrf.mxu0  ;;  %v480_v61 = vmin.f32 %v3734_v46, 0.0  ;;  %v475_v16 = vmin.f32 %v3745_v24, 0.0  ;;  %vm1022_vm6 = vweird.f32 %v3701_v59 }
 0x151   : > { %v876_v18 = vsub.f32 %v812_v10, %v844_v52  ;;  %v1354_v19 = vadd.f32 %v3652_v57, %v1321_v1  ;;  %v1322_v43 = vmul.f32 %v3644_v41, %v1289_v35  ;;  %v3778_v13 = vadd.f32 %v3406_v20, %v3688_v44 }
 0x152   : > { %v1010_v38 = vsub.f32 1.5, %v1009_v55  ;;  %v528_v44 = vmul.f32 1.442695, %v475_v16  ;;  %vm448_vm12 = vcmp.gt.f32.partialorder %v3734_v46, 0.0  ;;  %vm443_vm2 = vcmp.gt.f32.partialorder %v3745_v24, 0.0 }
 0x153   : > { %v3715_v26 = vadd.f32 1e-05, %v876_v18  ;;  %v3717_v33 = vpop.eup %3009  ;;  %1426 = vmatmul.f32.gmra.mxu1 %v1354_v19 }
 0x154   : > { %v629_v36 = vpop.xlane.xlu2 %628  ;;  %v1011_v37 = vmul.f32 %v3008_v47, %v1010_v38  ;;  %v1017_v40 = vmul.f32 %v3717_v33, %v3701_v59  ;;  %vm1023_vm5 = vweird.f32 %v3717_v33  ;;  %v908_v38 = vsub.f32 %v3468_v28, %v3703_v23 }
 0x155   : > { %3011 = vrsqrt.f32 %v3715_v26  ;;  %v3723_v62 = vmul.f32 0.015625, %v629_v36  ;;  %vm3764_vm7 = vmor %vm1022_vm6, %vm1023_vm5  ;;  %v907_v36 = vsub.f32 %v3458_v17, %v3684_v29  ;;  %vm1032_vm9 = vweird.f32 %v3715_v26 }
 0x156   : > { %v757_v6 = vpop.xlane.xlu0 %756  ;;  %v1018_v32 = vmul.f32 %v3717_v33, %v1017_v40  ;;  %v1015_v12 = vsel %vm3725_vm4, %v3008_v47, %v1011_v37  ;;  %v1355_v47 = vadd.f32 %v3652_v57, %v1322_v43  ;;  %v538_v37 = vmul.f32 1.442695, %v480_v61  ;;  %v410_v17 = vpop.f32.mrf.mxu3 }
 0x157   : > { %v813_v22 = vmul.f32 0.015625, %v757_v6  ;;  %v845_v45 = vmul.f32 %v3723_v62, %v3723_v62  ;;  %v1290_v53 = vmul.f32 %v1015_v12, %v906_v48  ;;  %v3784_v43 = vadd.f32 %v3406_v20, %v407_v2 }
 0x158   : > { %v398_v11 = vpop.f32.mrf.mxu0  ;;  %v1019_v51 = vmul.f32 0.5, %v1018_v32  ;;  %v476_v2 = vmin.f32 %v3778_v13, 0.0 }
 0x159   : > { %v3741_v58 = vadd.f32 %v3406_v20, %v398_v11  ;;  %v877_v0 = vsub.f32 %v813_v22, %v845_v45  ;;  %v1323_v35 = vmul.f32 %v3644_v41, %v1290_v53  ;;  %vm449_vm5 = vcmp.gt.f32.partialorder %v3784_v43, 0.0 }
 0x15a   : > { %v1020_v4 = vsub.f32 1.5, %v1019_v51 }
 0x15b   : > { %v3747_v3 = vpop.eup %3011  ;;  %v478_v7 = vmin.f32 %v3741_v58, 0.0  ;;  %v3754_v34 = vadd.f32 1e-05, %v877_v0  ;;  %1429 = vmatmul.f32.gmra.mxu1 %v1355_v47  ;;  %v1356_v12 = vadd.f32 %v3652_v57, %v1323_v35  ;;  %vm446_vm11 = vcmp.gt.f32.partialorder %v3741_v58, 0.0 }
 0x15c   : > { %v1027_v8 = vmul.f32 %v3747_v3, %v3715_v26  ;;  %v631_v52 = vpop.xlane.xlu1 %630  ;;  %v1021_v1 = vmul.f32 %v3717_v33, %v1020_v4  ;;  %vm1033_vm8 = vweird.f32 %v3747_v3 }
 0x15d   : > { %v534_v10 = vmul.f32 1.442695, %v478_v7  ;;  %v3757_v55 = vmul.f32 0.015625, %v631_v52  ;;  %3013 = vrsqrt.f32 %v3754_v34  ;;  %v481_v7 = vmin.f32 %v3784_v43, 0.0  ;;  %vm3804_vm10 = vmor %vm1032_vm9, %vm1033_vm8 }
 0x15e   : > { %v1028_v54 = vmul.f32 %v3747_v3, %v1027_v8  ;;  %v759_v18 = vpop.xlane.xlu2 %758  ;;  %v1025_v6 = vsel %vm3764_vm7, %v3717_v33, %v1021_v1  ;;  %vm1042_vm14 = vweird.f32 %v3754_v34 }
 0x15f   : > { %3015 = vpow2.f32 %v534_v10  ;;  %v846_v19 = vmul.f32 %v3757_v55, %v3757_v55  ;;  %v814_v25 = vmul.f32 0.015625, %v759_v18  ;;  %v1291_v33 = vmul.f32 %v1025_v6, %v907_v36 }
 0x160   : > { %v1029_v59 = vmul.f32 0.5, %v1028_v54  ;;  %v401_v40 = vpop.f32.mrf.mxu0  ;;  %3017 = vpow2.f32 %v538_v37 }
 0x161   : > { %v878_v32 = vsub.f32 %v814_v25, %v846_v19  ;;  %v3781_v22 = vadd.f32 %v3406_v20, %v401_v40  ;;  %v1324_v16 = vmul.f32 %v3644_v41, %v1291_v33  ;;  %v540_v25 = vmul.f32 1.442695, %v481_v7 }
 0x162   : > { %v1030_v45 = vsub.f32 1.5, %v1029_v59  ;;  %v530_v33 = vmul.f32 1.442695, %v476_v2 }
 0x163   : > { %v3786_v29 = vadd.f32 1e-05, %v878_v32  ;;  %v479_v11 = vmin.f32 %v3781_v22, 0.0  ;;  %v3790_v48 = vpop.eup %3013  ;;  %1432 = vmatmul.f32.gmra.mxu1 %v1356_v12  ;;  %v413_v12 = vpop.f32.mrf.mxu3  ;;  %vm447_vm0 = vcmp.gt.f32.partialorder %v3781_v22, 0.0 }
 0x164   : > { %v633_v51 = vpop.xlane.xlu0 %632  ;;  %v1031_v0 = vmul.f32 %v3747_v3, %v1030_v45  ;;  %v1037_v4 = vmul.f32 %v3790_v48, %v3754_v34  ;;  %vm1043_vm13 = vweird.f32 %v3790_v48  ;;  %v3838_v45 = vld [vmem:[%s5419_s2] ss:$0 sm:$0xff] }
 0x165   : > { %v3016_v20 = vpop.eup %3015  ;;  %3019 = vrsqrt.f32 %v3786_v29  ;;  %v536_v47 = vmul.f32 1.442695, %v479_v11  ;;  %v3800_v53 = vmul.f32 0.015625, %v633_v51  ;;  %v3841_v11 = vadd.f32 %v3838_v45, %v410_v17  ;;  %vm3851_vm15 = vmor %vm1042_vm14, %vm1043_vm13 }
 0x166   : > { %v761_v8 = vpop.xlane.xlu1 %760  ;;  %v2829_v61 = vadd.f32 -1.0, %v3016_v20  ;;  %v1038_v10 = vmul.f32 %v3790_v48, %v1037_v4  ;;  %v1035_v18 = vsel %vm3804_vm10, %v3747_v3, %v1031_v0  ;;  %v3018_v36 = vpop.eup %3017  ;;  %v1357_v3 = vadd.f32 %v3652_v57, %v1324_v16 }
 0x167   : > { %v815_v1 = vmul.f32 0.015625, %v761_v8  ;;  %3021 = vpow2.f32 %v536_v47  ;;  %v847_v26 = vmul.f32 %v3800_v53, %v3800_v53  ;;  %v1292_v28 = vmul.f32 %v1035_v18, %v908_v38 }
 0x168   : > { %v3814_v54 = vsel %vm446_vm11, %v3741_v58, %v2829_v61  ;;  %v1039_v19 = vmul.f32 0.5, %v1038_v10  ;;  %3023 = vpow2.f32 %v528_v44  ;;  %v730_v58 = vmul.f32 %v3692_v31, %v3692_v31 }
 0x169   : > { %662 = vadd.xlane.f32.xlu1 %v3814_v54  ;;  %v734_v35 = vmul.f32 %v3814_v54, %v3814_v54  ;;  %v879_v59 = vsub.f32 %v815_v1, %v847_v26  ;;  %3025 = vpow2.f32 %v540_v25  ;;  %v2831_v7 = vadd.f32 -1.0, %v3018_v36 }
 0x16a   : > { %v1040_v40 = vsub.f32 1.5, %v1039_v19  ;;  %v1325_v61 = vmul.f32 %v3644_v41, %v1292_v28  ;;  %v482_v10 = vmin.f32 %v3841_v11, 0.0  ;;  %v909_v16 = vsub.f32 %v3478_v39, %v3723_v62 }
 0x16b   : > { %v3826_v37 = vpop.eup %3019  ;;  %790 = vadd.xlane.f32.xlu0 %v734_v35  ;;  %v3833_v6 = vadd.f32 1e-05, %v879_v59  ;;  %1435 = vmatmul.f32.gmra.mxu1 %v1357_v3  ;;  %v3872_v19 = vsel %vm448_vm12, %v3734_v46, %v2831_v7  ;;  %vm1052_vm3 = vweird.f32 %v3786_v29  ;;  %v910_v7 = vsub.f32 %v3488_v50, %v3757_v55 }
 0x16c   : > { %v1047_v23 = vmul.f32 %v3826_v37, %v3786_v29  ;;  %v635_v32 = vpop.xlane.xlu2 %634  ;;  %v1041_v51 = vmul.f32 %v3790_v48, %v1040_v40  ;;  %v1358_v39 = vadd.f32 %v3652_v57, %v1325_v61  ;;  %vm1053_vm1 = vweird.f32 %v3826_v37 }
 0x16d   : > { %v3843_v44 = vmul.f32 0.015625, %v635_v32  ;;  %v3022_v0 = vpop.eup %3021  ;;  %3027 = vrsqrt.f32 %v3833_v6  ;;  %v542_v36 = vmul.f32 1.442695, %v482_v10  ;;  %v3891_v40 = vadd.f32 %v3838_v45, %v3709_v15  ;;  %v416_v32 = vpop.f32.mrf.mxu3  ;;  %vm3898_vm4 = vmor %vm1052_vm3, %vm1053_vm1 }
 0x16e   : > { %v1048_v20 = vmul.f32 %v3826_v37, %v1047_v23  ;;  %v763_v4 = vpop.xlane.xlu0 %762  ;;  %v2830_v8 = vadd.f32 -1.0, %v3022_v0  ;;  %v3024_v34 = vpop.eup %3023  ;;  %v1045_v1 = vsel %vm3851_vm15, %v3790_v48, %v1041_v51  ;;  %3029 = vpow2.f32 %v530_v33 }
 0x16f   : > { %v848_v2 = vmul.f32 %v3843_v44, %v3843_v44  ;;  %v816_v47 = vmul.f32 0.015625, %v763_v4  ;;  %v3026_v25 = vpop.eup %3025  ;;  %v1293_v62 = vmul.f32 %v1045_v1, %v909_v16  ;;  %v2826_v23 = vadd.f32 -1.0, %v3024_v34 }
 0x170   : > { %v1049_v52 = vmul.f32 0.5, %v1048_v20  ;;  %v3866_v18 = vsel %vm447_vm0, %v3781_v22, %v2830_v8  ;;  %v736_v20 = vmul.f32 %v3872_v19, %v3872_v19  ;;  %vm1062_vm7 = vweird.f32 %v3833_v6 }
 0x171   : > { %v880_v26 = vsub.f32 %v816_v47, %v848_v2  ;;  %782 = vadd.xlane.f32.xlu1 %v730_v58  ;;  %664 = vadd.xlane.f32.xlu2 %v3866_v18  ;;  %v3887_v58 = vadd.f32 %v3838_v45, %v413_v12  ;;  %v735_v15 = vmul.f32 %v3866_v18, %v3866_v18  ;;  %v2832_v47 = vadd.f32 -1.0, %v3026_v25 }
 0x172   : > { %v1050_v38 = vsub.f32 1.5, %v1049_v52  ;;  %v1326_v0 = vmul.f32 %v3644_v41, %v1293_v62  ;;  %v3919_v34 = vsel %vm443_vm2, %v3745_v24, %v2826_v23  ;;  %vm450_vm9 = vcmp.gt.f32.partialorder %v3841_v11, 0.0 }
 0x173   : > { %v3874_v35 = vadd.f32 1e-05, %v880_v26  ;;  %666 = vadd.xlane.f32.xlu0 %v3872_v19  ;;  %v3878_v48 = vpop.eup %3027  ;;  %1438 = vmatmul.f32.gmra.mxu1 %v1358_v39  ;;  %v483_v2 = vmin.f32 %v3887_v58, 0.0  ;;  %v3935_v25 = vsel %vm449_vm5, %v3784_v43, %v2832_v47  ;;  %vm444_vm11 = vcmp.gt.f32.partialorder %v3778_v13, 0.0 }
 0x174   : > { %v637_v22 = vpop.xlane.xlu1 %636  ;;  %v1051_v59 = vmul.f32 %v3826_v37, %v1050_v38  ;;  %v1057_v46 = vmul.f32 %v3878_v48, %v3833_v6  ;;  %v3030_v8 = vpop.eup %3029  ;;  %v1359_v55 = vadd.f32 %v3652_v57, %v1326_v0  ;;  %vm1063_vm6 = vweird.f32 %v3878_v48 }
 0x175   : > { %3031 = vrsqrt.f32 %v3874_v35  ;;  %v3894_v3 = vmul.f32 0.015625, %v637_v22  ;;  %v544_v38 = vmul.f32 1.442695, %v483_v2  ;;  %vm3946_vm8 = vmor %vm1062_vm7, %vm1063_vm6  ;;  %v911_v0 = vsub.f32 %v3496_v60, %v3800_v53 }
 0x176   : > { %v765_v28 = vpop.xlane.xlu2 %764  ;;  %v1058_v12 = vmul.f32 %v3878_v48, %v1057_v46  ;;  %3033 = vpow2.f32 %v542_v36  ;;  %v1055_v4 = vsel %vm3898_vm4, %v3826_v37, %v1051_v59  ;;  %v477_v37 = vmin.f32 %v3891_v40, 0.0 }
 0x177   : > { %v817_v51 = vmul.f32 0.015625, %v765_v28  ;;  %v849_v29 = vmul.f32 %v3894_v3, %v3894_v3  ;;  %v1294_v10 = vmul.f32 %v1055_v4, %v910_v7  ;;  %v3942_v59 = vadd.f32 %v3838_v45, %v416_v32 }
 0x178   : > { %v1059_v17 = vmul.f32 0.5, %v1058_v12  ;;  %v532_v46 = vmul.f32 1.442695, %v477_v37  ;;  %v731_v12 = vmul.f32 %v3919_v34, %v3919_v34  ;;  %vm1072_vm12 = vweird.f32 %v3874_v35 }
 0x179   : > { %792 = vadd.xlane.f32.xlu1 %v735_v15  ;;  %v881_v61 = vsub.f32 %v817_v51, %v849_v29  ;;  %794 = vadd.xlane.f32.xlu2 %v736_v20  ;;  %v1327_v6 = vmul.f32 %v3644_v41, %v1294_v10  ;;  %v2827_v51 = vadd.f32 -1.0, %v3030_v8  ;;  %v419_v15 = vpop.f32.mrf.mxu3  ;;  %v737_v20 = vmul.f32 %v3935_v25, %v3935_v25 }
 0x17a   : > { %v1060_v50 = vsub.f32 1.5, %v1059_v17  ;;  %v484_v17 = vmin.f32 %v3942_v59, 0.0  ;;  %v3969_v53 = vadd.f32 %v3838_v45, %v419_v15  ;;  %vm451_vm15 = vcmp.gt.f32.partialorder %v3887_v58, 0.0 }
 0x17b   : > { %v3922_v52 = vpop.eup %3031  ;;  %656 = vadd.xlane.f32.xlu0 %v3919_v34  ;;  %v3930_v16 = vadd.f32 1e-05, %v881_v61  ;;  %1441 = vmatmul.f32.gmra.mxu1 %v1359_v55  ;;  %vm445_vm2 = vcmp.gt.f32.partialorder %v3891_v40, 0.0  ;;  %vm452_vm4 = vcmp.gt.f32.partialorder %v3942_v59, 0.0 }
 0x17c   : > { %v1067_v1 = vmul.f32 %v3922_v52, %v3874_v35  ;;  %v639_v24 = vpop.xlane.xlu0 %638  ;;  %v1061_v39 = vmul.f32 %v3878_v48, %v1060_v50  ;;  %v3034_v62 = vpop.eup %3033  ;;  %vm1073_vm10 = vweird.f32 %v3922_v52  ;;  %v3980_v50 = vsel %vm444_vm11, %v3778_v13, %v2827_v51 }
 0x17d   : > { %v3932_v26 = vmul.f32 0.015625, %v639_v24  ;;  %3035 = vrsqrt.f32 %v3930_v16  ;;  %v2833_v4 = vadd.f32 -1.0, %v3034_v62  ;;  %v546_v10 = vmul.f32 1.442695, %v484_v17  ;;  %vm3990_vm13 = vmor %vm1072_vm12, %vm1073_vm10 }
 0x17e   : > { %v1068_v22 = vmul.f32 %v3922_v52, %v1067_v1  ;;  %v767_v36 = vpop.xlane.xlu1 %766  ;;  %v1065_v32 = vsel %vm3946_vm8, %v3878_v48, %v1061_v39  ;;  %3037 = vpow2.f32 %v544_v38  ;;  %v1360_v48 = vadd.f32 %v3652_v57, %v1327_v6 }
 0x17f   : > { %v850_v43 = vmul.f32 %v3932_v26, %v3932_v26  ;;  %v818_v23 = vmul.f32 0.015625, %v767_v36  ;;  %v1295_v60 = vmul.f32 %v1065_v32, %v911_v0  ;;  %3039 = vpow2.f32 %v532_v46 }
 0x180   : > { %v1069_v33 = vmul.f32 0.5, %v1068_v22  ;;  %v3988_v1 = vsel %vm450_vm9, %v3841_v11, %v2833_v4  ;;  %v485_v35 = vmin.f32 %v3969_v53, 0.0  ;;  %v912_v36 = vsub.f32 %v3502_v5, %v3843_v44 }
 0x181   : > { %v882_v29 = vsub.f32 %v818_v23, %v850_v43  ;;  %668 = vadd.xlane.f32.xlu1 %v3935_v25  ;;  %784 = vadd.xlane.f32.xlu2 %v731_v12  ;;  %v1328_v13 = vmul.f32 %v3644_v41, %v1295_v60  ;;  %v732_v28 = vmul.f32 %v3980_v50, %v3980_v50  ;;  %vm1082_vm0 = vweird.f32 %v3930_v16 }
 0x182   : > { %v1070_v7 = vsub.f32 1.5, %v1069_v33  ;;  %v548_v12 = vmul.f32 1.442695, %v485_v35  ;;  %v738_v17 = vmul.f32 %v3988_v1, %v3988_v1  ;;  %v913_v24 = vsub.f32 %v3508_v14, %v3894_v3 }
 0x183   : > { %v3965_v2 = vadd.f32 1e-05, %v882_v29  ;;  %796 = vadd.xlane.f32.xlu0 %v737_v20  ;;  %v3971_v47 = vpop.eup %3035  ;;  %1444 = vmatmul.f32.gmra.mxu1 %v1360_v48  ;;  %vm453_vm7 = vcmp.gt.f32.partialorder %v3969_v53, 0.0 }
 0x184   : > { %v641_v8 = vpop.xlane.xlu2 %640  ;;  %v1071_v61 = vmul.f32 %v3922_v52, %v1070_v7  ;;  %v1077_v37 = vmul.f32 %v3971_v47, %v3930_v16  ;;  %v3038_v62 = vpop.eup %3037  ;;  %vm1083_vm14 = vweird.f32 %v3971_v47 }
 0x185   : > { %3041 = vrsqrt.f32 %v3965_v2  ;;  %v3983_v45 = vmul.f32 0.015625, %v641_v8  ;;  %v3040_v43 = vpop.eup %3039  ;;  %v2834_v15 = vadd.f32 -1.0, %v3038_v62  ;;  %vm4027_vm1 = vmor %vm1082_vm0, %vm1083_vm14  ;;  %vm1092_vm5 = vweird.f32 %v3965_v2 }
 0x186   : > { %v769_v55 = vpop.xlane.xlu0 %768  ;;  %v1078_v38 = vmul.f32 %v3971_v47, %v1077_v37  ;;  %v1075_v11 = vsel %vm3990_vm13, %v3922_v52, %v1071_v61  ;;  %3043 = vpow2.f32 %v546_v10  ;;  %v1361_v52 = vadd.f32 %v3652_v57, %v1328_v13 }
 0x187   : > { %v819_v39 = vmul.f32 0.015625, %v769_v55  ;;  %v851_v22 = vmul.f32 %v3983_v45, %v3983_v45  ;;  %v1296_v51 = vmul.f32 %v1075_v11, %v912_v36  ;;  %v2828_v29 = vadd.f32 -1.0, %v3040_v43 }
 0x188   : > { %v1079_v46 = vmul.f32 0.5, %v1078_v38  ;;  %v4036_v55 = vsel %vm451_vm15, %v3887_v58, %v2834_v15  ;;  %v914_v15 = vsub.f32 %v3523_v27, %v3932_v26 }
 0x189   : > { %658 = vadd.xlane.f32.xlu1 %v3980_v50  ;;  %v883_v23 = vsub.f32 %v819_v39, %v851_v22  ;;  %670 = vadd.xlane.f32.xlu2 %v3988_v1  ;;  %v1329_v16 = vmul.f32 %v3644_v41, %v1296_v51  ;;  %v4044_v39 = vsel %vm445_vm2, %v3891_v40, %v2828_v29 }
 0x18a   : > { %v1080_v33 = vsub.f32 1.5, %v1079_v46 }
 0x18b   : > { %v4008_v6 = vpop.eup %3041  ;;  %786 = vadd.xlane.f32.xlu0 %v732_v28  ;;  %v4014_v44 = vadd.f32 1e-05, %v883_v23  ;;  %1447 = vmatmul.f32.gmra.mxu1 %v1361_v52  ;;  %v1362_v58 = vadd.f32 %v3652_v57, %v1329_v16  ;;  %v739_v28 = vmul.f32 %v4036_v55, %v4036_v55  ;;  %v733_v52 = vmul.f32 %v4044_v39, %v4044_v39 }
 0x18c   : > { %v1087_v5 = vmul.f32 %v4008_v6, %v3965_v2  ;;  %v643_v32 = vpop.xlane.xlu1 %642  ;;  %v1081_v20 = vmul.f32 %v3971_v47, %v1080_v33  ;;  %v3044_v61 = vpop.eup %3043  ;;  %vm1093_vm3 = vweird.f32 %v4008_v6 }
 0x18d   : > { %v4016_v0 = vmul.f32 0.015625, %v643_v32  ;;  %3045 = vrsqrt.f32 %v4014_v44  ;;  %v2835_v3 = vadd.f32 -1.0, %v3044_v61  ;;  %vm4064_vm6 = vmor %vm1092_vm5, %vm1093_vm3  ;;  %vm1102_vm9 = vweird.f32 %v4014_v44 }
 0x18e   : > { %v1088_v4 = vmul.f32 %v4008_v6, %v1087_v5  ;;  %v771_v7 = vpop.xlane.xlu2 %770  ;;  %3047 = vpow2.f32 %v548_v12  ;;  %v1085_v10 = vsel %vm4027_vm1, %v3971_v47, %v1081_v20 }
 0x18f   : > { %v852_v60 = vmul.f32 %v4016_v0, %v4016_v0  ;;  %v820_v8 = vmul.f32 0.015625, %v771_v7  ;;  %v1297_v62 = vmul.f32 %v1085_v10, %v913_v24  ;;  %v4075_v51 = vsel %vm452_vm4, %v3942_v59, %v2835_v3 }
 0x190   : > { %v1089_v37 = vmul.f32 0.5, %v1088_v4 }
 0x191   : > { %v884_v38 = vsub.f32 %v820_v8, %v852_v60  ;;  %798 = vadd.xlane.f32.xlu1 %v738_v17  ;;  %660 = vadd.xlane.f32.xlu2 %v4044_v39  ;;  %v1330_v12 = vmul.f32 %v3644_v41, %v1297_v62  ;;  %v740_v8 = vmul.f32 %v4075_v51, %v4075_v51 }
 0x192   : > { %v1090_v13 = vsub.f32 1.5, %v1089_v37  ;;  %v915_v62 = vsub.f32 %v3541_v42, %v3983_v45 }
 0x193   : > { %v4047_v35 = vadd.f32 1e-05, %v884_v38  ;;  %672 = vadd.xlane.f32.xlu0 %v4036_v55  ;;  %v4051_v22 = vpop.eup %3045  ;;  %1450 = vmatmul.f32.gmra.mxu1 %v1362_v58  ;;  %v1363_v59 = vadd.f32 %v3652_v57, %v1330_v12 }
 0x194   : > { %v645_v14 = vpop.xlane.xlu0 %644  ;;  %v1091_v40 = vmul.f32 %v4008_v6, %v1090_v13  ;;  %v3048_v47 = vpop.eup %3047  ;;  %v1097_v11 = vmul.f32 %v4051_v22, %v4014_v44  ;;  %vm1103_vm8 = vweird.f32 %v4051_v22 }
 0x195   : > { %3049 = vrsqrt.f32 %v4047_v35  ;;  %v4060_v36 = vmul.f32 0.015625, %v645_v14  ;;  %v2836_v5 = vadd.f32 -1.0, %v3048_v47  ;;  %vm1104_vm10 = vmor %vm1102_vm9, %vm1103_vm8  ;;  %vm1112_vm12 = vweird.f32 %v4047_v35 }
 0x196   : > { %v773_v46 = vpop.xlane.xlu1 %772  ;;  %v1098_v23 = vmul.f32 %v4051_v22, %v1097_v11  ;;  %v1095_v32 = vsel %vm4064_vm6, %v4008_v6, %v1091_v40 }
 0x197   : > { %v821_v33 = vmul.f32 0.015625, %v773_v46  ;;  %v853_v2 = vmul.f32 %v4060_v36, %v4060_v36  ;;  %v1298_v17 = vmul.f32 %v1095_v32, %v914_v15  ;;  %v4088_v27 = vsel %vm453_vm7, %v3969_v53, %v2836_v5 }
 0x198   : > { %v1099_v29 = vmul.f32 0.5, %v1098_v23  ;;  %v741_v53 = vmul.f32 %v4088_v27, %v4088_v27 }
 0x199   : > { %788 = vadd.xlane.f32.xlu1 %v733_v52  ;;  %v885_v20 = vsub.f32 %v821_v33, %v853_v2  ;;  %800 = vadd.xlane.f32.xlu2 %v739_v28  ;;  %v1331_v38 = vmul.f32 %v3644_v41, %v1298_v17  ;;  %v916_v2 = vsub.f32 %v3556_v56, %v4016_v0 }
 0x19a   : > { %v1100_v7 = vsub.f32 1.5, %v1099_v29 }
 0x19b   : > { %v3050_v4 = vpop.eup %3049  ;;  %674 = vadd.xlane.f32.xlu0 %v4075_v51  ;;  %v949_v48 = vadd.f32 1e-05, %v885_v20  ;;  %1453 = vmatmul.f32.gmra.mxu1 %v1363_v59  ;;  %v1364_v40 = vadd.f32 %v3652_v57, %v1331_v38 }
 0x19c   : > { %v1107_v6 = vmul.f32 %v3050_v4, %v4047_v35  ;;  %v647_v60 = vpop.xlane.xlu2 %646  ;;  %v1101_v16 = vmul.f32 %v4051_v22, %v1100_v7  ;;  %vm1113_vm11 = vweird.f32 %v3050_v4 }
 0x19d   : > { %v4090_v26 = vmul.f32 0.015625, %v647_v60  ;;  %3051 = vrsqrt.f32 %v949_v48  ;;  %vm1114_vm13 = vmor %vm1112_vm12, %vm1113_vm11  ;;  %vm1122_vm15 = vweird.f32 %v949_v48 }
 0x19e   : > { %v1108_v61 = vmul.f32 %v3050_v4, %v1107_v6  ;;  %v775_v37 = vpop.xlane.xlu0 %774  ;;  %v1105_v58 = vsel %vm1104_vm10, %v4051_v22, %v1101_v16 }
 0x19f   : > { %v854_v10 = vmul.f32 %v4090_v26, %v4090_v26  ;;  %v822_v24 = vmul.f32 0.015625, %v775_v37  ;;  %v1299_v47 = vmul.f32 %v1105_v58, %v915_v62 }
 0x1a0   : > { %v1109_v13 = vmul.f32 0.5, %v1108_v61 }
 0x1a1   : > { %v886_v44 = vsub.f32 %v822_v24, %v854_v10  ;;  %802 = vadd.xlane.f32.xlu1 %v740_v8  ;;  %676 = vadd.xlane.f32.xlu2 %v4088_v27  ;;  %v1332_v33 = vmul.f32 %v3644_v41, %v1299_v47  ;;  %v917_v10 = vsub.f32 %v3574_v9, %v4060_v36 }
 0x1a2   : > { %v1110_v14 = vsub.f32 1.5, %v1109_v13 }
 0x1a3   : > { %v950_v3 = vadd.f32 1e-05, %v886_v44  ;;  %804 = vadd.xlane.f32.xlu0 %v741_v53  ;;  %v3052_v11 = vpop.eup %3051  ;;  %1456 = vmatmul.f32.gmra.mxu1 %v1364_v40  ;;  %v1365_v35 = vadd.f32 %v3652_v57, %v1332_v33 }
 0x1a4   : > { %v649_v46 = vpop.xlane.xlu1 %648  ;;  %v1111_v28 = vmul.f32 %v3050_v4, %v1110_v14  ;;  %v1117_v43 = vmul.f32 %v3052_v11, %v949_v48  ;;  %vm1123_vm14 = vweird.f32 %v3052_v11 }
 0x1a5   : > { %3053 = vrsqrt.f32 %v950_v3  ;;  %v4107_v42 = vmul.f32 0.015625, %v649_v46  ;;  %vm1124_vm0 = vmor %vm1122_vm15, %vm1123_vm14  ;;  %vm1132_vm2 = vweird.f32 %v950_v3 }
 0x1a6   : > { %v777_v45 = vpop.xlane.xlu2 %776  ;;  %v1118_v22 = vmul.f32 %v3052_v11, %v1117_v43  ;;  %v1115_v12 = vsel %vm1114_vm13, %v3050_v4, %v1111_v28  ;;  %v918_v43 = vsub.f32 %v3590_v30, %v4090_v26  ;;  %v4139_v30 = vld [vmem:[%s5419_s2 + $0x1] ss:$0 sm:$0xff] }
 0x1a7   : > { %v823_v23 = vmul.f32 0.015625, %v777_v45  ;;  %v855_v52 = vmul.f32 %v4107_v42, %v4107_v42  ;;  %v1300_v20 = vmul.f32 %v1115_v12, %v916_v2 }
 0x1a8   : > { %v1119_v5 = vmul.f32 0.5, %v1118_v22 }
 0x1a9   : > { %v887_v32 = vsub.f32 %v823_v23, %v855_v52  ;;  %v1333_v16 = vmul.f32 %v3644_v41, %v1300_v20 }
 0x1aa   : > { %v1120_v29 = vsub.f32 1.5, %v1119_v5 }
 0x1ab   : > { %v3054_v15 = vpop.eup %3053  ;;  %v951_v59 = vadd.f32 1e-05, %v887_v32  ;;  %1459 = vmatmul.f32.gmra.mxu1 %v1365_v35  ;;  %v1366_v48 = vadd.f32 %v3652_v57, %v1333_v16  ;;  %v4134_v32 = vld [vmem:[%s5419_s2 + $0x3] ss:$0 sm:$0xff] }
 0x1ac   : > { %v1127_v7 = vmul.f32 %v3054_v15, %v950_v3  ;;  %v651_v17 = vpop.xlane.xlu0 %650  ;;  %v1121_v60 = vmul.f32 %v3052_v11, %v1120_v29  ;;  %vm1133_vm1 = vweird.f32 %v3054_v15  ;;  %v919_v29 = vsub.f32 %v3600_v49, %v4107_v42 }
 0x1ad   : > { %v4115_v6 = vmul.f32 0.015625, %v651_v17  ;;  %3055 = vrsqrt.f32 %v951_v59  ;;  %vm1134_vm3 = vmor %vm1132_vm2, %vm1133_vm1  ;;  %vm1142_vm5 = vweird.f32 %v951_v59 }
 0x1ae   : > { %v1128_v4 = vmul.f32 %v3054_v15, %v1127_v7  ;;  %v779_v8 = vpop.xlane.xlu2 %778  ;;  %v1125_v37 = vsel %vm1124_vm0, %v3052_v11, %v1121_v60 }
 0x1af   : > { %v856_v56 = vmul.f32 %v4115_v6, %v4115_v6  ;;  %v824_v0 = vmul.f32 0.015625, %v779_v8  ;;  %v1301_v13 = vmul.f32 %v1125_v37, %v917_v10  ;;  %v920_v37 = vsub.f32 %v3620_v21, %v4115_v6 }
 0x1b0   : > { %v1129_v61 = vmul.f32 0.5, %v1128_v4 }
 0x1b1   : > { %v888_v24 = vsub.f32 %v824_v0, %v856_v56  ;;  %v1334_v36 = vmul.f32 %v3644_v41, %v1301_v13 }
 0x1b2   : > { %v1130_v53 = vsub.f32 1.5, %v1129_v61 }
 0x1b3   : > { %v952_v38 = vadd.f32 1e-05, %v888_v24  ;;  %v3056_v58 = vpop.eup %3055  ;;  %1462 = vmatmul.f32.gmra.mxu1 %v1366_v48  ;;  %v1367_v3 = vadd.f32 %v3652_v57, %v1334_v36 }
 0x1b4   : > { %v653_v62 = vpop.xlane.xlu1 %652  ;;  %v1131_v44 = vmul.f32 %v3054_v15, %v1130_v53  ;;  %v1137_v14 = vmul.f32 %v3056_v58, %v951_v59  ;;  %vm1143_vm4 = vweird.f32 %v3056_v58  ;;  %v4148_v59 = vld [vmem:[%s5419_s2 + $0x2] ss:$0 sm:$0xff] }
 0x1b5   : > { %3057 = vrsqrt.f32 %v952_v38  ;;  %v4123_v40 = vmul.f32 0.015625, %v653_v62  ;;  %vm1144_vm6 = vmor %vm1142_vm5, %vm1143_vm4  ;;  %vm1152_vm8 = vweird.f32 %v952_v38 }
 0x1b6   : > { %v781_v47 = vpop.xlane.xlu0 %780  ;;  %v1138_v11 = vmul.f32 %v3056_v58, %v1137_v14  ;;  %v1135_v28 = vsel %vm1134_vm3, %v3054_v15, %v1131_v44 }
 0x1b7   : > { %v825_v9 = vmul.f32 0.015625, %v781_v47  ;;  %v857_v46 = vmul.f32 %v4123_v40, %v4123_v40  ;;  %v1302_v52 = vmul.f32 %v1135_v28, %v918_v43  ;;  %v921_v6 = vsub.f32 %v3661_v63, %v4123_v40 }
 0x1b8   : > { %v1139_v45 = vmul.f32 0.5, %v1138_v11 }
 0x1b9   : > { %v889_v22 = vsub.f32 %v825_v9, %v857_v46  ;;  %v1335_v57 = vmul.f32 %v4139_v30, %v1302_v52 }
 0x1ba   : > { %v1140_v33 = vsub.f32 1.5, %v1139_v45 }
 0x1bb   : > { %v3058_v23 = vpop.eup %3057  ;;  %v953_v2 = vadd.f32 1e-05, %v889_v22  ;;  %1465 = vmatmul.f32.gmra.mxu1 %v1367_v3  ;;  %v1368_v17 = vadd.f32 %v4148_v59, %v1335_v57 }
 0x1bc   : > { %v1147_v12 = vmul.f32 %v3058_v23, %v952_v38  ;;  %v1141_v5 = vmul.f32 %v3056_v58, %v1140_v33  ;;  %vm1153_vm7 = vweird.f32 %v3058_v23  ;;  %v655_v57 = vpop.xlane.xlu2 %654 }
 0x1bd   : > { %3059 = vrsqrt.f32 %v953_v2  ;;  %vm1154_vm9 = vmor %vm1152_vm8, %vm1153_vm7  ;;  %vm1162_vm11 = vweird.f32 %v953_v2 }
 0x1be   : > { %v1148_v41 = vmul.f32 %v3058_v23, %v1147_v12  ;;  %v1145_v15 = vsel %vm1144_vm6, %v3056_v58, %v1141_v5 }
 0x1bf   : > { %v1303_v60 = vmul.f32 %v1145_v15, %v919_v29 }
 0x1c0   : > { %v1149_v26 = vmul.f32 0.5, %v1148_v41  ;;  %v1421_v35 = vpop.f32.mrf.mxu1 }
 0x1c1   : > { %v1422_v7 = vadd.f32 %v4134_v32, %v1421_v35  ;;  %v1336_v16 = vmul.f32 %v4139_v30, %v1303_v60 }
 0x1c2   : > { %v1150_v20 = vsub.f32 1.5, %v1149_v26 }
 0x1c3   : > { %v3060_v4 = vpop.eup %3059  ;;  %v1549_v8 = vmin.f32 %v1422_v7, 0.0  ;;  %1468 = vmatmul.f32.gmra.mxu1 %v1368_v17  ;;  %v1369_v13 = vadd.f32 %v4148_v59, %v1336_v16  ;;  %vm1517_vm13 = vcmp.gt.f32.partialorder %v1422_v7, 0.0 }
 0x1c4   : > { %v1151_v56 = vmul.f32 %v3058_v23, %v1150_v20  ;;  %v1157_v0 = vmul.f32 %v3060_v4, %v953_v2  ;;  %vm1163_vm10 = vweird.f32 %v3060_v4 }
 0x1c5   : > { %v1581_v49 = vmul.f32 1.442695, %v1549_v8  ;;  %vm1164_vm12 = vmor %vm1162_vm11, %vm1163_vm10 }
 0x1c6   : > { %v1158_v42 = vmul.f32 %v3060_v4, %v1157_v0  ;;  %v1155_v61 = vsel %vm1154_vm9, %v3058_v23, %v1151_v56 }
 0x1c7   : > { %3061 = vpow2.f32 %v1581_v49  ;;  %v1304_v58 = vmul.f32 %v1155_v61, %v920_v37 }
 0x1c8   : > { %v1159_v10 = vmul.f32 0.5, %v1158_v42  ;;  %v1424_v24 = vpop.f32.mrf.mxu1 }
 0x1c9   : > { %v1425_v48 = vadd.f32 %v4134_v32, %v1424_v24  ;;  %v1337_v11 = vmul.f32 %v4139_v30, %v1304_v58 }
 0x1ca   : > { %v1160_v53 = vsub.f32 1.5, %v1159_v10 }
 0x1cb   : > { %v1550_v38 = vmin.f32 %v1425_v48, 0.0  ;;  %1471 = vmatmul.f32.gmra.mxu1 %v1369_v13  ;;  %v1370_v43 = vadd.f32 %v4148_v59, %v1337_v11  ;;  %vm1518_vm14 = vcmp.gt.f32.partialorder %v1425_v48, 0.0 }
 0x1cc   : > { %v1161_v62 = vmul.f32 %v3060_v4, %v1160_v53 }
 0x1cd   : > { %v3062_v44 = vpop.eup %3061  ;;  %v1583_v14 = vmul.f32 1.442695, %v1550_v38 }
 0x1ce   : > { %v2837_v47 = vadd.f32 -1.0, %v3062_v44  ;;  %v1165_v21 = vsel %vm1164_vm12, %v3060_v4, %v1161_v62  ;;  %v4178_v4 = vmul.f32 0.015625, %v655_v57 }
 0x1cf   : > { %3063 = vpow2.f32 %v1583_v14  ;;  %v1305_v45 = vmul.f32 %v1165_v21, %v921_v6 }
 0x1d0   : > { %v4159_v9 = vsel %vm1517_vm13, %v1422_v7, %v2837_v47  ;;  %v1427_v36 = vpop.f32.mrf.mxu1  ;;  %v858_v37 = vmul.f32 %v4178_v4, %v4178_v4 }
 0x1d1   : > { %1709 = vadd.xlane.f32.xlu1 %v4159_v9  ;;  %v1805_v46 = vmul.f32 %v4159_v9, %v4159_v9  ;;  %v1428_v28 = vadd.f32 %v4134_v32, %v1427_v36  ;;  %v1338_v63 = vmul.f32 %v4139_v30, %v1305_v45 }
 0x1d3   : > { %1837 = vadd.xlane.f32.xlu2 %v1805_v46  ;;  %v1551_v22 = vmin.f32 %v1428_v28, 0.0  ;;  %1474 = vmatmul.f32.gmra.mxu1 %v1370_v43  ;;  %v1371_v5 = vadd.f32 %v4148_v59, %v1338_v63  ;;  %vm1519_vm15 = vcmp.gt.f32.partialorder %v1428_v28, 0.0 }
 0x1d5   : > { %v3064_v23 = vpop.eup %3063  ;;  %v1585_v33 = vmul.f32 1.442695, %v1551_v22 }
 0x1d6   : > { %v2838_v40 = vadd.f32 -1.0, %v3064_v23 }
 0x1d7   : > { %3065 = vpow2.f32 %v1585_v33 }
 0x1d8   : > { %v1430_v3 = vpop.f32.mrf.mxu1  ;;  %v4167_v52 = vsel %vm1518_vm14, %v1425_v48, %v2838_v40 }
 0x1d9   : > { %v1431_v12 = vadd.f32 %v4134_v32, %v1430_v3  ;;  %1711 = vadd.xlane.f32.xlu0 %v4167_v52  ;;  %v1806_v2 = vmul.f32 %v4167_v52, %v4167_v52 }
 0x1db   : > { %v1552_v26 = vmin.f32 %v1431_v12, 0.0  ;;  %1839 = vadd.xlane.f32.xlu1 %v1806_v2  ;;  %1477 = vmatmul.f32.gmra.mxu1 %v1371_v5  ;;  %vm1520_vm0 = vcmp.gt.f32.partialorder %v1431_v12, 0.0 }
 0x1dc   : > { %v663_v41 = vpop.xlane.xlu1 %662 }
 0x1dd   : > { %v4174_v15 = vmul.f32 0.015625, %v663_v41  ;;  %v3066_v35 = vpop.eup %3065  ;;  %v1587_v20 = vmul.f32 1.442695, %v1552_v26 }
 0x1de   : > { %v791_v29 = vpop.xlane.xlu0 %790  ;;  %v2839_v60 = vadd.f32 -1.0, %v3066_v35 }
 0x1df   : > { %v862_v7 = vmul.f32 %v4174_v15, %v4174_v15  ;;  %v830_v17 = vmul.f32 0.015625, %v791_v29  ;;  %3067 = vpow2.f32 %v1587_v20 }
 0x1e0   : > { %v1433_v56 = vpop.f32.mrf.mxu1  ;;  %v4180_v0 = vsel %vm1519_vm15, %v1428_v28, %v2839_v60 }
 0x1e1   : > { %v894_v8 = vsub.f32 %v830_v17, %v862_v7  ;;  %v1434_v42 = vadd.f32 %v4134_v32, %v1433_v56  ;;  %1713 = vadd.xlane.f32.xlu2 %v4180_v0  ;;  %v1807_v16 = vmul.f32 %v4180_v0, %v4180_v0 }
 0x1e3   : > { %v4182_v49 = vadd.f32 1e-05, %v894_v8  ;;  %v1553_v10 = vmin.f32 %v1434_v42, 0.0  ;;  %1841 = vadd.xlane.f32.xlu0 %v1807_v16  ;;  %vm1521_vm1 = vcmp.gt.f32.partialorder %v1434_v42, 0.0 }
 0x1e4   : > { %v783_v61 = vpop.xlane.xlu1 %782  ;;  %v665_v24 = vpop.xlane.xlu2 %664 }
 0x1e5   : > { %3069 = vrsqrt.f32 %v4182_v49  ;;  %v826_v53 = vmul.f32 0.015625, %v783_v61  ;;  %v3068_v13 = vpop.eup %3067  ;;  %v1589_v58 = vmul.f32 1.442695, %v1553_v10  ;;  %v4191_v44 = vmul.f32 0.015625, %v665_v24 }
 0x1e6   : > { %v667_v48 = vpop.xlane.xlu0 %666  ;;  %v2840_v62 = vadd.f32 -1.0, %v3068_v13  ;;  %vm1212_vm3 = vweird.f32 %v4182_v49 }
 0x1e7   : > { %v890_v38 = vsub.f32 %v826_v53, %v858_v37  ;;  %3071 = vpow2.f32 %v1589_v58  ;;  %v4195_v47 = vmul.f32 0.015625, %v667_v48  ;;  %v863_v45 = vmul.f32 %v4191_v44, %v4191_v44 }
 0x1e8   : > { %v1436_v11 = vpop.f32.mrf.mxu1  ;;  %v4197_v21 = vsel %vm1520_vm0, %v1431_v12, %v2840_v62 }
 0x1e9   : > { %v4193_v14 = vadd.f32 1e-05, %v890_v38  ;;  %v4203_v36 = vadd.f32 %v4134_v32, %v1436_v11  ;;  %1715 = vadd.xlane.f32.xlu1 %v4197_v21  ;;  %v1808_v46 = vmul.f32 %v4197_v21, %v4197_v21  ;;  %v864_v40 = vmul.f32 %v4195_v47, %v4195_v47 }
 0x1eb   : > { %v4199_v6 = vpop.eup %3069  ;;  %3073 = vrsqrt.f32 %v4193_v14  ;;  %v1554_v22 = vmin.f32 %v4203_v36, 0.0  ;;  %1843 = vadd.xlane.f32.xlu2 %v1808_v46  ;;  %vm1522_vm5 = vcmp.gt.f32.partialorder %v4203_v36, 0.0  ;;  %vm1172_vm7 = vweird.f32 %v4193_v14 }
 0x1ec   : > { %v1207_v28 = vmul.f32 %v4199_v6, %v4182_v49  ;;  %v793_v43 = vpop.xlane.xlu1 %792  ;;  %v795_v23 = vpop.xlane.xlu2 %794  ;;  %vm1213_vm2 = vweird.f32 %v4199_v6 }
 0x1ed   : > { %v831_v33 = vmul.f32 0.015625, %v793_v43  ;;  %v832_v3 = vmul.f32 0.015625, %v795_v23  ;;  %v3072_v2 = vpop.eup %3071  ;;  %v1591_v5 = vmul.f32 1.442695, %v1554_v22  ;;  %vm4243_vm4 = vmor %vm1212_vm3, %vm1213_vm2  ;;  %v926_v23 = vsub.f32 %v3814_v54, %v4174_v15 }
 0x1ee   : > { %v1208_v63 = vmul.f32 %v4199_v6, %v1207_v28  ;;  %v657_v12 = vpop.xlane.xlu0 %656  ;;  %v2841_v29 = vadd.f32 -1.0, %v3072_v2 }
 0x1ef   : > { %v895_v41 = vsub.f32 %v831_v33, %v863_v45  ;;  %v896_v26 = vsub.f32 %v832_v3, %v864_v40  ;;  %3075 = vpow2.f32 %v1591_v5  ;;  %v4224_v8 = vmul.f32 0.015625, %v657_v12 }
 0x1f0   : > { %v1209_v57 = vmul.f32 0.5, %v1208_v63  ;;  %v1439_v56 = vpop.f32.mrf.mxu1  ;;  %v4231_v61 = vsel %vm1521_vm1, %v1434_v42, %v2841_v29 }
 0x1f1   : > { %v4216_v35 = vpop.eup %3073  ;;  %v4218_v20 = vadd.f32 1e-05, %v895_v41  ;;  %v4222_v60 = vadd.f32 1e-05, %v896_v26  ;;  %v4229_v16 = vadd.f32 %v4134_v32, %v1439_v56  ;;  %1717 = vadd.xlane.f32.xlu0 %v4231_v61  ;;  %v1809_v48 = vmul.f32 %v4231_v61, %v4231_v61 }
 0x1f2   : > { %v1210_v7 = vsub.f32 1.5, %v1209_v57  ;;  %v1167_v17 = vmul.f32 %v4216_v35, %v4193_v14  ;;  %v859_v62 = vmul.f32 %v4224_v8, %v4224_v8  ;;  %vm1173_vm6 = vweird.f32 %v4216_v35 }
 0x1f3   : > { %3077 = vrsqrt.f32 %v4218_v20  ;;  %v1555_v53 = vmin.f32 %v4229_v16, 0.0  ;;  %1845 = vadd.xlane.f32.xlu1 %v1809_v48  ;;  %vm4299_vm8 = vmor %vm1172_vm7, %vm1173_vm6  ;;  %vm1523_vm9 = vcmp.gt.f32.partialorder %v4229_v16, 0.0  ;;  %vm1222_vm10 = vweird.f32 %v4218_v20 }
 0x1f4   : > { %v1211_v37 = vmul.f32 %v4199_v6, %v1210_v7  ;;  %v1168_v10 = vmul.f32 %v4216_v35, %v1167_v17  ;;  %3079 = vrsqrt.f32 %v4222_v60  ;;  %v669_v24 = vpop.xlane.xlu1 %668  ;;  %v785_v13 = vpop.xlane.xlu2 %784  ;;  %vm1232_vm14 = vweird.f32 %v4222_v60 }
 0x1f5   : > { %v4241_v58 = vmul.f32 0.015625, %v669_v24  ;;  %v827_v11 = vmul.f32 0.015625, %v785_v13  ;;  %v3076_v28 = vpop.eup %3075  ;;  %v1593_v49 = vmul.f32 1.442695, %v1555_v53  ;;  %v927_v24 = vsub.f32 %v3866_v18, %v4191_v44 }
 0x1f6   : > { %v1169_v38 = vmul.f32 0.5, %v1168_v10  ;;  %v797_v46 = vpop.xlane.xlu0 %796  ;;  %v1215_v22 = vsel %vm4243_vm4, %v4199_v6, %v1211_v37  ;;  %v2842_v63 = vadd.f32 -1.0, %v3076_v28 }
 0x1f7   : > { %v865_v43 = vmul.f32 %v4241_v58, %v4241_v58  ;;  %v833_v45 = vmul.f32 0.015625, %v797_v46  ;;  %v891_v33 = vsub.f32 %v827_v11, %v859_v62  ;;  %3081 = vpow2.f32 %v1593_v49 }
 0x1f8   : > { %v1442_v41 = vpop.f32.mrf.mxu1  ;;  %v4266_v6 = vsel %vm1522_vm5, %v4203_v36, %v2842_v63  ;;  %v1310_v54 = vmul.f32 %v1215_v22, %v926_v23  ;;  %v1170_v15 = vsub.f32 1.5, %v1169_v38  ;;  %v922_v36 = vsub.f32 %v3692_v31, %v4178_v4 }
 0x1f9   : > { %v4256_v40 = vpop.eup %3077  ;;  %v897_v3 = vsub.f32 %v833_v45, %v865_v43  ;;  %v4263_v5 = vadd.f32 1e-05, %v891_v33  ;;  %v4271_v26 = vadd.f32 %v4134_v32, %v1442_v41  ;;  %1719 = vadd.xlane.f32.xlu2 %v4266_v6  ;;  %v1810_v7 = vmul.f32 %v4266_v6, %v4266_v6 }
 0x1fa   : > { %v4259_v12 = vpop.eup %3079  ;;  %v1217_v2 = vmul.f32 %v4256_v40, %v4218_v20  ;;  %v1343_v48 = vmul.f32 %v4139_v30, %v1310_v54  ;;  %v1171_v62 = vmul.f32 %v4216_v35, %v1170_v15  ;;  %v923_v46 = vsub.f32 %v3919_v34, %v4224_v8 }
 0x1fb   : > { %v4268_v57 = vadd.f32 1e-05, %v897_v3  ;;  %v1227_v29 = vmul.f32 %v4259_v12, %v4222_v60  ;;  %3083 = vrsqrt.f32 %v4263_v5  ;;  %v1556_v37 = vmin.f32 %v4271_v26, 0.0  ;;  %1847 = vadd.xlane.f32.xlu0 %v1810_v7 }
 0x1fc   : > { %v659_v17 = vpop.xlane.xlu1 %658  ;;  %v1218_v56 = vmul.f32 %v4256_v40, %v1217_v2  ;;  %v671_v10 = vpop.xlane.xlu2 %670  ;;  %v1376_v45 = vadd.f32 %v4148_v59, %v1343_v48  ;;  %v1175_v3 = vsel %vm4299_vm8, %v4216_v35, %v1171_v62  ;;  %vm1223_vm11 = vweird.f32 %v4256_v40 }
 0x1fd   : > { %3085 = vrsqrt.f32 %v4268_v57  ;;  %v4287_v53 = vmul.f32 0.015625, %v659_v17  ;;  %v3082_v42 = vpop.eup %3081  ;;  %v1595_v4 = vmul.f32 1.442695, %v1556_v37  ;;  %v1228_v11 = vmul.f32 %v4259_v12, %v1227_v29  ;;  %vm4361_vm1 = vmor %vm1222_vm10, %vm1223_vm11 }
 0x1fe   : > { %v787_v13 = vpop.xlane.xlu0 %786  ;;  %v1219_v43 = vmul.f32 0.5, %v1218_v56  ;;  %v4308_v14 = vmul.f32 0.015625, %v671_v10  ;;  %v2843_v63 = vadd.f32 -1.0, %v3082_v42  ;;  %1492 = vmatmul.f32.vlgmr.msrb.gmra.mxu3 %v1376_v45  ;;  %v1306_v29 = vmul.f32 %v1175_v3, %v922_v36 }
 0x1ff   : > { %v828_v38 = vmul.f32 0.015625, %v787_v13  ;;  %v860_v28 = vmul.f32 %v4287_v53, %v4287_v53  ;;  %3087 = vpow2.f32 %v1595_v4  ;;  %v4322_v7 = vmul.f32 0.5, %v1228_v11 }
 0x200   : > { %v1445_v33 = vpop.f32.mrf.mxu1  ;;  %v4330_v35 = vsel %vm1523_vm9, %v4229_v16, %v2843_v63  ;;  %v1339_v48 = vmul.f32 %v4139_v30, %v1306_v29  ;;  %v1220_v42 = vsub.f32 1.5, %v1219_v43  ;;  %v866_v16 = vmul.f32 %v4308_v14, %v4308_v14 }
 0x201   : > { %v4305_v22 = vpop.eup %3083  ;;  %v892_v23 = vsub.f32 %v828_v38, %v860_v28  ;;  %v4320_v15 = vadd.f32 %v4134_v32, %v1445_v33  ;;  %1721 = vadd.xlane.f32.xlu1 %v4330_v35  ;;  %v1811_v36 = vmul.f32 %v4330_v35, %v4330_v35  ;;  %vm1233_vm12 = vweird.f32 %v4259_v12 }
 0x202   : > { %v1177_v41 = vmul.f32 %v4305_v22, %v4263_v5  ;;  %v1372_v49 = vadd.f32 %v4148_v59, %v1339_v48  ;;  %v1230_v43 = vsub.f32 1.5, %v4322_v7  ;;  %vm1182_vm13 = vweird.f32 %v4263_v5  ;;  %vm4421_vm4 = vmor %vm1232_vm14, %vm1233_vm12 }
 0x203   : > { %v4313_v2 = vpop.eup %3085  ;;  %v4325_v17 = vadd.f32 1e-05, %v892_v23  ;;  %v1557_v10 = vmin.f32 %v4320_v15, 0.0  ;;  %1849 = vadd.xlane.f32.xlu2 %v1811_v36  ;;  %vm1183_vm15 = vweird.f32 %v4305_v22  ;;  %vm1524_vm0 = vcmp.gt.f32.partialorder %v4271_v26, 0.0 }
 0x204   : > { %v799_v56 = vpop.xlane.xlu1 %798  ;;  %v1178_v37 = vmul.f32 %v4305_v22, %v1177_v41  ;;  %v661_v13 = vpop.xlane.xlu2 %660  ;;  %v1237_v4 = vmul.f32 %v4313_v2, %v4268_v57  ;;  %1480 = vmatmul.f32.gmra.mxu1 %v1372_v49  ;;  %v1221_v7 = vmul.f32 %v4256_v40, %v1220_v42  ;;  %vm4396_vm2 = vmor %vm1182_vm13, %vm1183_vm15  ;;  %vm1525_vm3 = vcmp.gt.f32.partialorder %v4320_v15, 0.0 }
 0x205   : > { %3089 = vrsqrt.f32 %v4325_v17  ;;  %v3088_v62 = vpop.eup %3087  ;;  %v1597_v28 = vmul.f32 1.442695, %v1557_v10  ;;  %v834_v45 = vmul.f32 0.015625, %v799_v56  ;;  %v4349_v33 = vmul.f32 0.015625, %v661_v13 }
 0x206   : > { %v673_v38 = vpop.xlane.xlu0 %672  ;;  %v1179_v11 = vmul.f32 0.5, %v1178_v37  ;;  %v2844_v41 = vadd.f32 -1.0, %v3088_v62  ;;  %v1238_v10 = vmul.f32 %v4313_v2, %v1237_v4  ;;  %v1225_v4 = vsel %vm4361_vm1, %v4256_v40, %v1221_v7 }
 0x207   : > { %3091 = vpow2.f32 %v1597_v28  ;;  %v898_v3 = vsub.f32 %v834_v45, %v866_v16  ;;  %v4353_v29 = vmul.f32 0.015625, %v673_v38  ;;  %v861_v28 = vmul.f32 %v4349_v33, %v4349_v33 }
 0x208   : > { %v1180_v63 = vsub.f32 1.5, %v1179_v11  ;;  %v1448_v56 = vpop.f32.mrf.mxu1  ;;  %v4372_v13 = vsel %vm1524_vm0, %v4271_v26, %v2844_v41  ;;  %v4404_v37 = vmul.f32 0.5, %v1238_v10  ;;  %v1231_v26 = vmul.f32 %v4259_v12, %v1230_v43 }
 0x209   : > { %v4366_v36 = vadd.f32 1e-05, %v898_v3  ;;  %v4369_v48 = vadd.f32 %v4134_v32, %v1448_v56  ;;  %v867_v42 = vmul.f32 %v4353_v29, %v4353_v29  ;;  %1723 = vadd.xlane.f32.xlu0 %v4372_v13  ;;  %v1812_v20 = vmul.f32 %v4372_v13, %v4372_v13 }
 0x20a   : > { %v1181_v62 = vmul.f32 %v4305_v22, %v1180_v63  ;;  %v1311_v63 = vmul.f32 %v1225_v4, %v927_v24  ;;  %v925_v44 = vsub.f32 %v4044_v39, %v4349_v33  ;;  %vm1243_vm5 = vweird.f32 %v4313_v2 }
 0x20b   : > { %v4374_v16 = vpop.eup %3089  ;;  %3093 = vrsqrt.f32 %v4366_v36  ;;  %v1558_v45 = vmin.f32 %v4369_v48, 0.0  ;;  %1851 = vadd.xlane.f32.xlu1 %v1812_v20  ;;  %vm1242_vm6 = vweird.f32 %v4268_v57  ;;  %vm1192_vm7 = vweird.f32 %v4325_v17 }
 0x20c   : > { %v789_v38 = vpop.xlane.xlu1 %788  ;;  %v1187_v11 = vmul.f32 %v4374_v16, %v4325_v17  ;;  %v801_v49 = vpop.xlane.xlu2 %800  ;;  %v1185_v5 = vsel %vm4396_vm2, %v4305_v22, %v1181_v62  ;;  %v1344_v20 = vmul.f32 %v4139_v30, %v1311_v63  ;;  %vm1193_vm8 = vweird.f32 %v4374_v16  ;;  %vm1244_vm13 = vmor %vm1242_vm6, %vm1243_vm5 }
 0x20d   : > { %v835_v3 = vmul.f32 0.015625, %v801_v49  ;;  %v829_v41 = vmul.f32 0.015625, %v789_v38  ;;  %v3092_v7 = vpop.eup %3091  ;;  %v1599_v54 = vmul.f32 1.442695, %v1558_v45  ;;  %v5453_v45 = vsub.f32 %v3872_v19, %v4195_v47  ;;  %vm1194_vm15 = vmor %vm1192_vm7, %vm1193_vm8 }
 0x20e   : > { %v675_v56 = vpop.xlane.xlu0 %674  ;;  %v1188_v23 = vmul.f32 %v4374_v16, %v1187_v11  ;;  %v2845_v10 = vadd.f32 -1.0, %v3092_v7  ;;  %v1377_v43 = vadd.f32 %v4148_v59, %v1344_v20  ;;  %vm1252_vm9 = vweird.f32 %v4366_v36 }
 0x20f   : > { %v899_v31 = vsub.f32 %v835_v3, %v867_v42  ;;  %v893_v18 = vsub.f32 %v829_v41, %v861_v28  ;;  %v4414_v24 = vmul.f32 0.015625, %v675_v56  ;;  %3095 = vpow2.f32 %v1599_v54 }
 0x210   : > { %v1451_v38 = vpop.f32.mrf.mxu1  ;;  %v4437_v60 = vsel %vm1525_vm3, %v4320_v15, %v2845_v10  ;;  %v1307_v54 = vmul.f32 %v1185_v5, %v923_v46  ;;  %v1240_v28 = vsub.f32 1.5, %v4404_v37  ;;  %v4446_v49 = vmul.f32 0.5, %v1188_v23  ;;  %1495 = vmatmul.f32.gmra.mxu3 %v1377_v43 }
 0x211   : > { %v4426_v42 = vadd.f32 1e-05, %v899_v31  ;;  %v4428_v4 = vadd.f32 1e-05, %v893_v18  ;;  %v4430_v62 = vpop.eup %3093  ;;  %v4434_v11 = vadd.f32 %v4134_v32, %v1451_v38  ;;  %v1235_v31 = vsel %vm4421_vm4, %v4259_v12, %v1231_v26  ;;  %1725 = vadd.xlane.f32.xlu2 %v4437_v60 }
 0x212   : > { %v1247_v40 = vmul.f32 %v4430_v62, %v4366_v36  ;;  %v868_v34 = vmul.f32 %v4414_v24, %v4414_v24  ;;  %v1813_v12 = vmul.f32 %v4437_v60, %v4437_v60  ;;  %v1340_v26 = vmul.f32 %v4139_v30, %v1307_v54 }
 0x213   : > { %3097 = vrsqrt.f32 %v4426_v42  ;;  %v1559_v8 = vmin.f32 %v4434_v11, 0.0  ;;  %v1312_v63 = vmul.f32 %v1235_v31, %v5453_v45  ;;  %v1190_v20 = vsub.f32 1.5, %v4446_v49 }
 0x214   : > { %v803_v15 = vpop.xlane.xlu1 %802  ;;  %3099 = vrsqrt.f32 %v4428_v4  ;;  %v677_v46 = vpop.xlane.xlu2 %676  ;;  %v1248_v23 = vmul.f32 %v4430_v62, %v1247_v40  ;;  %1853 = vadd.xlane.f32.xlu0 %v1813_v12  ;;  %v1373_v18 = vadd.f32 %v4148_v59, %v1340_v26  ;;  %vm1253_vm10 = vweird.f32 %v4430_v62 }
 0x215   : > { %v4464_v3 = vmul.f32 0.015625, %v677_v46  ;;  %v1601_v56 = vmul.f32 1.442695, %v1559_v8  ;;  %v836_v7 = vmul.f32 0.015625, %v803_v15  ;;  %v3096_v5 = vpop.eup %3095  ;;  %v1345_v10 = vmul.f32 %v4139_v30, %v1312_v63  ;;  %vm4526_vm1 = vmor %vm1252_vm9, %vm1253_vm10 }
 0x216   : > { %v805_v41 = vpop.xlane.xlu0 %804  ;;  %v1249_v47 = vmul.f32 0.5, %v1248_v23  ;;  %v2846_v43 = vadd.f32 -1.0, %v3096_v5  ;;  %1483 = vmatmul.f32.gmra.mxu1 %v1373_v18  ;;  %vm1526_vm11 = vcmp.gt.f32.partialorder %v4369_v48, 0.0  ;;  %v1241_v12 = vmul.f32 %v4313_v2, %v1240_v28 }
 0x217   : > { %v837_v37 = vmul.f32 0.015625, %v805_v41  ;;  %v869_v19 = vmul.f32 %v4464_v3, %v4464_v3  ;;  %3101 = vpow2.f32 %v1601_v56  ;;  %v900_v22 = vsub.f32 %v836_v7, %v868_v34 }
 0x218   : > { %v1378_v54 = vadd.f32 %v4148_v59, %v1345_v10  ;;  %v1454_v49 = vpop.f32.mrf.mxu1  ;;  %vm1262_vm12 = vweird.f32 %v4426_v42  ;;  %v4495_v26 = vsel %vm1526_vm11, %v4369_v48, %v2846_v43  ;;  %v1250_v45 = vsub.f32 1.5, %v1249_v47 }
 0x219   : > { %v4474_v38 = vpop.eup %3097  ;;  %v901_v31 = vsub.f32 %v837_v37, %v869_v19  ;;  %v4483_v8 = vadd.f32 1e-05, %v900_v22  ;;  %v4486_v34 = vadd.f32 %v4134_v32, %v1454_v49  ;;  %1727 = vadd.xlane.f32.xlu1 %v4495_v26  ;;  %v1814_v48 = vmul.f32 %v4495_v26, %v4495_v26 }
 0x21a   : > { %v4479_v40 = vpop.eup %3099  ;;  %v1257_v15 = vmul.f32 %v4474_v38, %v4426_v42  ;;  %1498 = vmatmul.f32.gmra.mxu3 %v1378_v54  ;;  %vm1263_vm14 = vweird.f32 %v4474_v38  ;;  %v1245_v5 = vsel %vm1244_vm13, %v4313_v2, %v1241_v12  ;;  %v1191_v18 = vmul.f32 %v4374_v16, %v1190_v20 }
 0x21b   : > { %v1197_v46 = vmul.f32 %v4479_v40, %v4428_v4  ;;  %v4492_v23 = vadd.f32 1e-05, %v901_v31  ;;  %3103 = vrsqrt.f32 %v4483_v8  ;;  %v1560_v41 = vmin.f32 %v4486_v34, 0.0  ;;  %1855 = vadd.xlane.f32.xlu2 %v1814_v48  ;;  %vm4561_vm3 = vmor %vm1262_vm12, %vm1263_vm14 }
 0x21c   : > { %v1258_v63 = vmul.f32 %v4474_v38, %v1257_v15  ;;  %v5454_v10 = vsub.f32 %v3935_v25, %v4241_v58  ;;  %vm1527_vm0 = vcmp.gt.f32.partialorder %v4434_v11, 0.0  ;;  %v1195_v2 = vsel %vm1194_vm15, %v4374_v16, %v1191_v18 }
 0x21d   : > { %v1198_v28 = vmul.f32 %v4479_v40, %v1197_v46  ;;  %3105 = vrsqrt.f32 %v4492_v23  ;;  %v3102_v56 = vpop.eup %3101  ;;  %v1603_v37 = vmul.f32 1.442695, %v1560_v41  ;;  %v1251_v20 = vmul.f32 %v4430_v62, %v1250_v45 }
 0x21e   : > { %v1259_v7 = vmul.f32 0.5, %v1258_v63  ;;  %v1313_v19 = vmul.f32 %v1245_v5, %v5454_v10  ;;  %v2847_v47 = vadd.f32 -1.0, %v3102_v56  ;;  %v5457_v58 = vsub.f32 %v3980_v50, %v4287_v53 }
 0x21f   : > { %v1199_v57 = vmul.f32 0.5, %v1198_v28  ;;  %3107 = vpow2.f32 %v1603_v37  ;;  %v931_v36 = vsub.f32 %v4036_v55, %v4353_v29  ;;  %v1255_v50 = vsel %vm4526_vm1, %v4430_v62, %v1251_v20 }
 0x220   : > { %v1260_v22 = vsub.f32 1.5, %v1259_v7  ;;  %v1346_v25 = vmul.f32 %v4139_v30, %v1313_v19  ;;  %v1308_v54 = vmul.f32 %v1195_v2, %v5457_v58  ;;  %v1457_v31 = vpop.f32.mrf.mxu1  ;;  %v4535_v16 = vsel %vm1527_vm0, %v4434_v11, %v2847_v47  ;;  %v2494_v19 = vld [vmem:[%s5418_s1 + $0x118] sm:$0xff] }
 0x221   : > { %v1200_v43 = vsub.f32 1.5, %v1199_v57  ;;  %v4537_v49 = vpop.eup %3103  ;;  %v4542_v15 = vadd.f32 %v4134_v32, %v1457_v31  ;;  %1729 = vadd.xlane.f32.xlu0 %v4535_v16  ;;  %v1815_v12 = vmul.f32 %v4535_v16, %v4535_v16  ;;  %vm1203_vm2 = vweird.f32 %v4479_v40  ;;  %2496 = vmatpush.msra.mxu2 %v2494_v19 }
 0x222   : > { %v1267_v11 = vmul.f32 %v4537_v49, %v4483_v8  ;;  %v1379_v55 = vadd.f32 %v4148_v59, %v1346_v25  ;;  %v1341_v29 = vmul.f32 %v4139_v30, %v1308_v54  ;;  %vm1202_vm4 = vweird.f32 %v4428_v4  ;;  %2893 = vmatpush.msra.mxu3 %v2494_v19  ;;  %v2489_v19 = vld [vmem:[%s5418_s1 + $0xf0] sm:$0xff] }
 0x223   : > { %v4550_v53 = vpop.eup %3105  ;;  %v1561_v45 = vmin.f32 %v4542_v15, 0.0  ;;  %1857 = vadd.xlane.f32.xlu1 %v1815_v12  ;;  %v5460_v63 = vsub.f32 %v3988_v1, %v4308_v14  ;;  %v1201_v48 = vmul.f32 %v4479_v40, %v1200_v43  ;;  %v1261_v56 = vmul.f32 %v4474_v38, %v1260_v22  ;;  %vm1204_vm5 = vmor %vm1202_vm4, %vm1203_vm2 }
 0x224   : > { %v1277_v62 = vmul.f32 %v4550_v53, %v4492_v23  ;;  %v1268_v28 = vmul.f32 %v4537_v49, %v1267_v11  ;;  %1501 = vmatmul.f32.gmra.mxu3 %v1379_v55  ;;  %v1374_v42 = vadd.f32 %v4148_v59, %v1341_v29  ;;  %vm1272_vm6 = vweird.f32 %v4483_v8 }
 0x225   : > { %v1314_v41 = vmul.f32 %v1255_v50, %v5460_v63  ;;  %v3108_v4 = vpop.eup %3107  ;;  %v1605_v7 = vmul.f32 1.442695, %v1561_v45  ;;  %vm1528_vm7 = vcmp.gt.f32.partialorder %v4486_v34, 0.0  ;;  %v1205_v5 = vsel %vm1204_vm5, %v4479_v40, %v1201_v48  ;;  %v2482_v45 = vld [vmem:[%s5418_s1 + $0xb8] sm:$0xff] }
 0x226   : > { %v1269_v1 = vmul.f32 0.5, %v1268_v28  ;;  %1486 = vmatmul.f32.gmra.mxu1 %v1374_v42  ;;  %v2848_v14 = vadd.f32 -1.0, %v3108_v4  ;;  %v1265_v18 = vsel %vm4561_vm3, %v4474_v38, %v1261_v56  ;;  %vm1273_vm8 = vweird.f32 %v4537_v49  ;;  %v2493_v28 = vld [vmem:[%s5418_s1 + $0x110] sm:$0xff] }
 0x227   : > { %v1347_v37 = vmul.f32 %v4139_v30, %v1314_v41  ;;  %v1278_v57 = vmul.f32 %v4550_v53, %v1277_v62  ;;  %3109 = vpow2.f32 %v1605_v7  ;;  %v1309_v10 = vmul.f32 %v1205_v5, %v925_v44  ;;  %vm4606_vm9 = vmor %vm1272_vm6, %vm1273_vm8  ;;  %2497 = vmatpush.msra.mxu2 %v2493_v28  ;;  %2894 = vmatpush.msra.mxu3 %v2493_v28  ;;  %v2486_v44 = vld [vmem:[%s5418_s1 + $0xd8] sm:$0xff] }
 0x228   : > { %v1270_v47 = vsub.f32 1.5, %v1269_v1  ;;  %v1460_v22 = vpop.f32.mrf.mxu1  ;;  %v4595_v2 = vsel %vm1528_vm7, %v4486_v34, %v2848_v14  ;;  %v1315_v38 = vmul.f32 %v1265_v18, %v931_v36  ;;  %v932_v36 = vsub.f32 %v4075_v51, %v4414_v24  ;;  %v2490_v14 = vld [vmem:[%s5418_s1 + $0xf8] sm:$0xff] }
 0x229   : > { %v1380_v40 = vadd.f32 %v4148_v59, %v1347_v37  ;;  %v1461_v20 = vadd.f32 %v4134_v32, %v1460_v22  ;;  %1731 = vadd.xlane.f32.xlu2 %v4595_v2  ;;  %v1816_v39 = vmul.f32 %v4595_v2, %v4595_v2  ;;  %v1342_v33 = vmul.f32 %v4139_v30, %v1309_v10  ;;  %v2492_v37 = vld [vmem:[%s5418_s1 + $0x108] sm:$0xff] }
 0x22a   : > { %v1271_v34 = vmul.f32 %v4537_v49, %v1270_v47  ;;  %v1279_v17 = vmul.f32 0.5, %v1278_v57  ;;  %v1348_v58 = vmul.f32 %v4139_v30, %v1315_v38  ;;  %vm1529_vm10 = vcmp.gt.f32.partialorder %v4542_v15, 0.0  ;;  %2498 = vmatpush.msra.mxu2 %v2492_v37  ;;  %2895 = vmatpush.msra.mxu3 %v2492_v37  ;;  %v2488_v22 = vld [vmem:[%s5418_s1 + $0xe8] sm:$0xff] }
 0x22b   : > { %v1562_v43 = vmin.f32 %v1461_v20, 0.0  ;;  %1859 = vadd.xlane.f32.xlu0 %v1816_v39  ;;  %v1375_v25 = vadd.f32 %v4148_v59, %v1342_v33  ;;  %vm1282_vm11 = vweird.f32 %v4492_v23  ;;  %vm1283_vm12 = vweird.f32 %v4550_v53  ;;  %v2487_v33 = vld [vmem:[%s5418_s1 + $0xe0] sm:$0xff] }
 0x22c   : > { %1504 = vmatmul.f32.gmra.mxu3 %v1380_v40  ;;  %v1275_v8 = vsel %vm4606_vm9, %v4537_v49, %v1271_v34  ;;  %v1280_v50 = vsub.f32 1.5, %v1279_v17  ;;  %v1381_v11 = vadd.f32 %v4148_v59, %v1348_v58  ;;  %vm4630_vm13 = vmor %vm1282_vm11, %vm1283_vm12  ;;  %vm1530_vm14 = vcmp.gt.f32.partialorder %v1461_v20, 0.0 }
 0x22d   : > { %v3110_v54 = vpop.eup %3109  ;;  %v1607_v31 = vmul.f32 1.442695, %v1562_v43  ;;  %v1316_v46 = vmul.f32 %v1275_v8, %v932_v36  ;;  %v933_v48 = vsub.f32 %v4088_v27, %v4464_v3  ;;  %v2491_v27 = vld [vmem:[%s5418_s1 + $0x100] sm:$0xff]  ;;  %v2485_v36 = vld [vmem:[%s5418_s1 + $0xd0] sm:$0xff] }
 0x22e   : > { %1489 = vmatmul.f32.gmra.mxu1 %v1375_v25  ;;  %v2849_v12 = vadd.f32 -1.0, %v3110_v54  ;;  %v1281_v62 = vmul.f32 %v4550_v53, %v1280_v50  ;;  %2499 = vmatpush.msra.mxu2 %v2491_v27 }
 0x22f   : > { %3111 = vpow2.f32 %v1607_v31  ;;  %v1349_v23 = vmul.f32 %v4139_v30, %v1316_v46  ;;  %2896 = vmatpush.msra.mxu3 %v2491_v27 }
 0x230   : > { %v1463_v55 = vpop.f32.mrf.mxu1  ;;  %v4621_v29 = vsel %vm1529_vm10, %v4542_v15, %v2849_v12  ;;  %v1285_v42 = vsel %vm4630_vm13, %v4550_v53, %v1281_v62  ;;  %2500 = vmatpush.msra.mxu2 %v2490_v14 }
 0x231   : > { %v1464_v49 = vadd.f32 %v4134_v32, %v1463_v55  ;;  %1733 = vadd.xlane.f32.xlu1 %v4621_v29  ;;  %v1817_v51 = vmul.f32 %v4621_v29, %v4621_v29  ;;  %v1382_v56 = vadd.f32 %v4148_v59, %v1349_v23  ;;  %v1317_v3 = vmul.f32 %v1285_v42, %v933_v48  ;;  %v2484_v55 = vld [vmem:[%s5418_s1 + $0xc8] sm:$0xff]  ;;  %v2481_v48 = vld [vmem:[%s5418_s1 + $0xb0] sm:$0xff] }
 0x232   : > { %2501 = vmatpush.msra.mxu2 %v2489_v19  ;;  %2897 = vmatpush.msra.mxu3 %v2490_v14 }
 0x233   : > { %v1563_v24 = vmin.f32 %v1464_v49, 0.0  ;;  %1861 = vadd.xlane.f32.xlu2 %v1817_v51  ;;  %v1350_v57 = vmul.f32 %v4139_v30, %v1317_v3  ;;  %vm1531_vm15 = vcmp.gt.f32.partialorder %v1464_v49, 0.0  ;;  %v4671_v30 = vld [vmem:[%s5419_s2 + $0x3] ss:$0 sm:$0xff] }
 0x234   : > { %1507 = vmatmul.f32.gmra.mxu3 %v1381_v11  ;;  %2502 = vmatpush.msra.mxu2 %v2488_v22 }
 0x235   : > { %v3112_v15 = vpop.eup %3111  ;;  %v1609_v63 = vmul.f32 1.442695, %v1563_v24  ;;  %v1383_v39 = vadd.f32 %v4148_v59, %v1350_v57  ;;  %2898 = vmatpush.msra.mxu3 %v2489_v19  ;;  %v2483_v24 = vld [vmem:[%s5418_s1 + $0xc0] sm:$0xff] }
 0x236   : > { %v2850_v41 = vadd.f32 -1.0, %v3112_v15  ;;  %2503 = vmatpush.msra.mxu2 %v2487_v33 }
 0x237   : > { %3113 = vpow2.f32 %v1609_v63  ;;  %2899 = vmatpush.msra.mxu3 %v2488_v22 }
 0x238   : > { %v1466_v4 = vpop.f32.mrf.mxu1  ;;  %v4644_v7 = vsel %vm1530_vm14, %v1461_v20, %v2850_v41  ;;  %2504 = vmatpush.msra.mxu2 %v2486_v44 }
 0x239   : > { %v1467_v1 = vadd.f32 %v4134_v32, %v1466_v4  ;;  %1735 = vadd.xlane.f32.xlu0 %v4644_v7  ;;  %v1818_v53 = vmul.f32 %v4644_v7, %v4644_v7  ;;  %2900 = vmatpush.msra.mxu3 %v2487_v33 }
 0x23a   : > { %2505 = vmatpush.msra.mxu2 %v2485_v36 }
 0x23b   : > { %v1564_v5 = vmin.f32 %v1467_v1, 0.0  ;;  %1863 = vadd.xlane.f32.xlu1 %v1818_v53  ;;  %vm1532_vm0 = vcmp.gt.f32.partialorder %v1467_v1, 0.0  ;;  %2901 = vmatpush.msra.mxu3 %v2486_v44  ;;  %v2480_v53 = vld [vmem:[%s5418_s1 + $0xa8] sm:$0xff] }
 0x23c   : > { %1510 = vmatmul.f32.gmra.mxu3 %v1382_v56  ;;  %2506 = vmatpush.msra.mxu2 %v2484_v55 }
 0x23d   : > { %v3114_v32 = vpop.eup %3113  ;;  %v1611_v18 = vmul.f32 1.442695, %v1564_v5  ;;  %2902 = vmatpush.msra.mxu3 %v2485_v36 }
 0x23e   : > { %v2851_v10 = vadd.f32 -1.0, %v3114_v32  ;;  %2507 = vmatpush.msra.mxu2 %v2483_v24  ;;  %v2479_v32 = vld [vmem:[%s5418_s1 + $0xa0] sm:$0xff] }
 0x23f   : > { %3115 = vpow2.f32 %v1611_v18  ;;  %2903 = vmatpush.msra.mxu3 %v2484_v55 }
 0x240   : > { %v1469_v47 = vpop.f32.mrf.mxu1  ;;  %v4663_v40 = vsel %vm1531_vm15, %v1464_v49, %v2851_v10  ;;  %2508 = vmatpush.msra.mxu2 %v2482_v45 }
 0x241   : > { %v1470_v38 = vadd.f32 %v4671_v30, %v1469_v47  ;;  %1737 = vadd.xlane.f32.xlu2 %v4663_v40  ;;  %v1819_v20 = vmul.f32 %v4663_v40, %v4663_v40  ;;  %2904 = vmatpush.msra.mxu3 %v2483_v24 }
 0x242   : > { %2509 = vmatpush.msra.mxu2 %v2481_v48 }
 0x243   : > { %v1565_v34 = vmin.f32 %v1470_v38, 0.0  ;;  %1865 = vadd.xlane.f32.xlu0 %v1819_v20  ;;  %vm1533_vm1 = vcmp.gt.f32.partialorder %v1470_v38, 0.0  ;;  %2905 = vmatpush.msra.mxu3 %v2482_v45 }
 0x244   : > { %v1710_v17 = vpop.xlane.xlu1 %1709  ;;  %1513 = vmatmul.f32.gmra.mxu3 %v1383_v39  ;;  %2510 = vmatpush.msra.mxu2 %v2480_v53 }
 0x245   : > { %v4684_v43 = vmul.f32 0.015625, %v1710_v17  ;;  %v3116_v25 = vpop.eup %3115  ;;  %v1613_v58 = vmul.f32 1.442695, %v1565_v34  ;;  %2906 = vmatpush.msra.mxu3 %v2481_v48  ;;  %v4760_v48 = vld [vmem:[%s5419_s2 + $0x4] ss:$0 sm:$0xff] }
 0x246   : > { %v1838_v54 = vpop.xlane.xlu2 %1837  ;;  %v2852_v8 = vadd.f32 -1.0, %v3116_v25  ;;  %2511 = vmatpush.msra.mxu2 %v2479_v32 }
 0x247   : > { %v1933_v59 = vmul.f32 %v4684_v43, %v4684_v43  ;;  %v1901_v31 = vmul.f32 0.015625, %v1838_v54  ;;  %3117 = vpow2.f32 %v1613_v58  ;;  %2907 = vmatpush.msra.mxu3 %v2480_v53 }
 0x248   : > { %v1472_v50 = vpop.f32.mrf.mxu1  ;;  %v4691_v11 = vsel %vm1532_vm0, %v1467_v1, %v2852_v8 }
 0x249   : > { %v1965_v12 = vsub.f32 %v1901_v31, %v1933_v59  ;;  %v1473_v46 = vadd.f32 %v4671_v30, %v1472_v50  ;;  %1739 = vadd.xlane.f32.xlu1 %v4691_v11  ;;  %v1820_v49 = vmul.f32 %v4691_v11, %v4691_v11  ;;  %2908 = vmatpush.msra.mxu3 %v2479_v32 }
 0x24b   : > { %v4700_v51 = vadd.f32 1e-05, %v1965_v12  ;;  %v1566_v62 = vmin.f32 %v1473_v46, 0.0  ;;  %1867 = vadd.xlane.f32.xlu2 %v1820_v49  ;;  %vm1534_vm2 = vcmp.gt.f32.partialorder %v1473_v46, 0.0 }
 0x24c   : > { %v1712_v23 = vpop.xlane.xlu0 %1711 }
 0x24d   : > { %3119 = vrsqrt.f32 %v4700_v51  ;;  %v3118_v15 = vpop.eup %3117  ;;  %v1615_v63 = vmul.f32 1.442695, %v1566_v62  ;;  %v4709_v41 = vmul.f32 0.015625, %v1712_v23  ;;  %vm2067_vm4 = vweird.f32 %v4700_v51 }
 0x24e   : > { %v1840_v28 = vpop.xlane.xlu1 %1839  ;;  %v2853_v42 = vadd.f32 -1.0, %v3118_v15 }
 0x24f   : > { %3121 = vpow2.f32 %v1615_v63  ;;  %v1934_v56 = vmul.f32 %v4709_v41, %v4709_v41  ;;  %v1902_v4 = vmul.f32 0.015625, %v1840_v28 }
 0x250   : > { %v1475_v37 = vpop.f32.mrf.mxu1  ;;  %v4716_v1 = vsel %vm1533_vm1, %v1470_v38, %v2853_v42 }
 0x251   : > { %v1966_v27 = vsub.f32 %v1902_v4, %v1934_v56  ;;  %v1476_v3 = vadd.f32 %v4671_v30, %v1475_v37  ;;  %1741 = vadd.xlane.f32.xlu0 %v4716_v1  ;;  %v1821_v14 = vmul.f32 %v4716_v1, %v4716_v1 }
 0x253   : > { %v3120_v5 = vpop.eup %3119  ;;  %v4729_v57 = vadd.f32 1e-05, %v1966_v27  ;;  %v1567_v10 = vmin.f32 %v1476_v3, 0.0  ;;  %1869 = vadd.xlane.f32.xlu1 %v1821_v14  ;;  %vm1535_vm6 = vcmp.gt.f32.partialorder %v1476_v3, 0.0 }
 0x254   : > { %v2062_v18 = vmul.f32 %v3120_v5, %v4700_v51  ;;  %v1714_v19 = vpop.xlane.xlu2 %1713  ;;  %vm2068_vm3 = vweird.f32 %v3120_v5  ;;  %v1997_v51 = vsub.f32 %v4159_v9, %v4684_v43  ;;  %v4769_v43 = vld [vmem:[%s5419_s2 + $0x5] ss:$0 sm:$0xff] }
 0x255   : > { %v3122_v47 = vpop.eup %3121  ;;  %3123 = vrsqrt.f32 %v4729_v57  ;;  %v1617_v38 = vmul.f32 1.442695, %v1567_v10  ;;  %v4732_v20 = vmul.f32 0.015625, %v1714_v19  ;;  %vm4743_vm5 = vmor %vm2067_vm4, %vm2068_vm3  ;;  %vm2077_vm8 = vweird.f32 %v4729_v57 }
 0x256   : > { %v2063_v22 = vmul.f32 %v3120_v5, %v2062_v18  ;;  %v1842_v39 = vpop.xlane.xlu0 %1841  ;;  %v2854_v33 = vadd.f32 -1.0, %v3122_v47 }
 0x257   : > { %3125 = vpow2.f32 %v1617_v38  ;;  %v1903_v34 = vmul.f32 0.015625, %v1842_v39  ;;  %v1935_v17 = vmul.f32 %v4732_v20, %v4732_v20 }
 0x258   : > { %v2064_v44 = vmul.f32 0.5, %v2063_v22  ;;  %v1478_v25 = vpop.f32.mrf.mxu1  ;;  %v4736_v58 = vsel %vm1534_vm2, %v1473_v46, %v2854_v33  ;;  %v1998_v22 = vsub.f32 %v4167_v52, %v4709_v41 }
 0x259   : > { %v1479_v59 = vadd.f32 %v4671_v30, %v1478_v25  ;;  %1743 = vadd.xlane.f32.xlu2 %v4736_v58  ;;  %v1822_v31 = vmul.f32 %v4736_v58, %v4736_v58  ;;  %v1967_v8 = vsub.f32 %v1903_v34, %v1935_v17 }
 0x25a   : > { %v2065_v54 = vsub.f32 1.5, %v2064_v44 }
 0x25b   : > { %v3124_v36 = vpop.eup %3123  ;;  %v1568_v12 = vmin.f32 %v1479_v59, 0.0  ;;  %1871 = vadd.xlane.f32.xlu0 %v1822_v31  ;;  %v4748_v49 = vadd.f32 1e-05, %v1967_v8  ;;  %vm1536_vm10 = vcmp.gt.f32.partialorder %v1479_v59, 0.0 }
 0x25c   : > { %v2066_v50 = vmul.f32 %v3120_v5, %v2065_v54  ;;  %v2072_v46 = vmul.f32 %v3124_v36, %v4729_v57  ;;  %v1716_v24 = vpop.xlane.xlu1 %1715  ;;  %vm2078_vm7 = vweird.f32 %v3124_v36 }
 0x25d   : > { %v3126_v62 = vpop.eup %3125  ;;  %v1619_v45 = vmul.f32 1.442695, %v1568_v12  ;;  %v4750_v23 = vmul.f32 0.015625, %v1716_v24  ;;  %3127 = vrsqrt.f32 %v4748_v49  ;;  %vm2079_vm9 = vmor %vm2077_vm8, %vm2078_vm7  ;;  %vm2087_vm12 = vweird.f32 %v4748_v49 }
 0x25e   : > { %v2070_v15 = vsel %vm4743_vm5, %v3120_v5, %v2066_v50  ;;  %v2073_v63 = vmul.f32 %v3124_v36, %v2072_v46  ;;  %v1844_v28 = vpop.xlane.xlu2 %1843  ;;  %v2855_v42 = vadd.f32 -1.0, %v3126_v62 }
 0x25f   : > { %3129 = vpow2.f32 %v1619_v45  ;;  %v1936_v56 = vmul.f32 %v4750_v23, %v4750_v23  ;;  %v1904_v4 = vmul.f32 0.015625, %v1844_v28  ;;  %v2381_v9 = vmul.f32 %v2070_v15, %v1997_v51 }
 0x260   : > { %v2074_v37 = vmul.f32 0.5, %v2073_v63  ;;  %v4764_v53 = vsel %vm1535_vm6, %v1476_v3, %v2855_v42  ;;  %v1999_v63 = vsub.f32 %v4180_v0, %v4732_v20  ;;  %v2000_v20 = vsub.f32 %v4197_v21, %v4750_v23 }
 0x261   : > { %v1968_v27 = vsub.f32 %v1904_v4, %v1936_v56  ;;  %1745 = vadd.xlane.f32.xlu1 %v4764_v53  ;;  %v1823_v14 = vmul.f32 %v4764_v53, %v4764_v53  ;;  %v2414_v32 = vmul.f32 %v4760_v48, %v2381_v9 }
 0x262   : > { %v2075_v5 = vsub.f32 1.5, %v2074_v37 }
 0x263   : > { %v2032_v18 = vadd.f32 1e-05, %v1968_v27  ;;  %1873 = vadd.xlane.f32.xlu2 %v1823_v14  ;;  %v3128_v3 = vpop.eup %3127  ;;  %v2447_v10 = vadd.f32 %v4769_v43, %v2414_v32 }
 0x264   : > { %v2076_v19 = vmul.f32 %v3124_v36, %v2075_v5  ;;  %v2082_v38 = vmul.f32 %v3128_v3, %v4748_v49  ;;  %v1718_v39 = vpop.xlane.xlu0 %1717  ;;  %vm2088_vm11 = vweird.f32 %v3128_v3 }
 0x265   : > { %v3130_v47 = vpop.eup %3129  ;;  %3131 = vrsqrt.f32 %v2032_v18  ;;  %v4780_v33 = vmul.f32 0.015625, %v1718_v39  ;;  %2512 = vmatmul.f32.vlgmr.msra.gmra.mxu2 %v2447_v10  ;;  %vm2089_vm13 = vmor %vm2087_vm12, %vm2088_vm11  ;;  %vm2097_vm15 = vweird.f32 %v2032_v18 }
 0x266   : > { %v2856_v44 = vadd.f32 -1.0, %v3130_v47  ;;  %v2080_v34 = vsel %vm2079_vm9, %v3124_v36, %v2076_v19  ;;  %v2083_v17 = vmul.f32 %v3128_v3, %v2082_v38  ;;  %v1846_v54 = vpop.xlane.xlu1 %1845 }
 0x267   : > { %v2382_v57 = vmul.f32 %v2080_v34, %v1998_v22  ;;  %v1937_v25 = vmul.f32 %v4780_v33, %v4780_v33  ;;  %v1905_v41 = vmul.f32 0.015625, %v1846_v54 }
 0x268   : > { %v4784_v31 = vsel %vm1536_vm10, %v1479_v59, %v2856_v44  ;;  %v2084_v52 = vmul.f32 0.5, %v2083_v17 }
 0x269   : > { %1747 = vadd.xlane.f32.xlu0 %v4784_v31  ;;  %v1824_v8 = vmul.f32 %v4784_v31, %v4784_v31  ;;  %v2415_v12 = vmul.f32 %v4760_v48, %v2382_v57  ;;  %v1969_v55 = vsub.f32 %v1905_v41, %v1937_v25 }
 0x26a   : > { %v2085_v36 = vsub.f32 1.5, %v2084_v52 }
 0x26b   : > { %v3132_v50 = vpop.eup %3131  ;;  %1875 = vadd.xlane.f32.xlu2 %v1824_v8  ;;  %v2448_v46 = vadd.f32 %v4769_v43, %v2415_v12  ;;  %v2033_v59 = vadd.f32 1e-05, %v1969_v55 }
 0x26c   : > { %v2092_v24 = vmul.f32 %v3132_v50, %v2032_v18  ;;  %v1720_v62 = vpop.xlane.xlu2 %1719  ;;  %v2086_v15 = vmul.f32 %v3128_v3, %v2085_v36  ;;  %vm2098_vm14 = vweird.f32 %v3132_v50  ;;  %v2001_v36 = vsub.f32 %v4231_v61, %v4780_v33 }
 0x26d   : > { %v4791_v45 = vmul.f32 0.015625, %v1720_v62  ;;  %2515 = vmatmul.f32.gmra.mxu2 %v2448_v46  ;;  %3133 = vrsqrt.f32 %v2033_v59  ;;  %vm2099_vm0 = vmor %vm2097_vm15, %vm2098_vm14  ;;  %vm2107_vm2 = vweird.f32 %v2033_v59 }
 0x26e   : > { %v2093_v51 = vmul.f32 %v3132_v50, %v2092_v24  ;;  %v1848_v42 = vpop.xlane.xlu0 %1847  ;;  %v2090_v37 = vsel %vm2089_vm13, %v3128_v3, %v2086_v15 }
 0x26f   : > { %v1938_v28 = vmul.f32 %v4791_v45, %v4791_v45  ;;  %v1906_v4 = vmul.f32 0.015625, %v1848_v42  ;;  %v2383_v9 = vmul.f32 %v2090_v37, %v1999_v63 }
 0x270   : > { %v2094_v56 = vmul.f32 0.5, %v2093_v51 }
 0x271   : > { %v1970_v14 = vsub.f32 %v1906_v4, %v1938_v28  ;;  %v2416_v49 = vmul.f32 %v4760_v48, %v2383_v9 }
 0x272   : > { %v2095_v27 = vsub.f32 1.5, %v2094_v56 }
 0x273   : > { %v2034_v5 = vadd.f32 1e-05, %v1970_v14  ;;  %v3134_v10 = vpop.eup %3133  ;;  %v2449_v0 = vadd.f32 %v4769_v43, %v2416_v49 }
 0x274   : > { %v2096_v32 = vmul.f32 %v3132_v50, %v2095_v27  ;;  %v2102_v19 = vmul.f32 %v3134_v10, %v2033_v59  ;;  %v1722_v47 = vpop.xlane.xlu1 %1721  ;;  %vm2108_vm1 = vweird.f32 %v3134_v10 }
 0x275   : > { %3135 = vrsqrt.f32 %v2034_v5  ;;  %v4802_v3 = vmul.f32 0.015625, %v1722_v47  ;;  %2518 = vmatmul.f32.gmra.mxu2 %v2449_v0  ;;  %vm2109_vm3 = vmor %vm2107_vm2, %vm2108_vm1  ;;  %vm2117_vm5 = vweird.f32 %v2034_v5 }
 0x276   : > { %v2100_v22 = vsel %vm2099_vm0, %v3132_v50, %v2096_v32  ;;  %v2103_v38 = vmul.f32 %v3134_v10, %v2102_v19  ;;  %v1850_v39 = vpop.xlane.xlu2 %1849  ;;  %v2002_v32 = vsub.f32 %v4266_v6, %v4791_v45 }
 0x277   : > { %v2384_v44 = vmul.f32 %v2100_v22, %v2000_v20  ;;  %v1939_v34 = vmul.f32 %v4802_v3, %v4802_v3  ;;  %v1907_v18 = vmul.f32 0.015625, %v1850_v39 }
 0x278   : > { %v2104_v17 = vmul.f32 0.5, %v2103_v38 }
 0x279   : > { %v2417_v57 = vmul.f32 %v4760_v48, %v2384_v44  ;;  %v1971_v25 = vsub.f32 %v1907_v18, %v1939_v34 }
 0x27a   : > { %v2105_v23 = vsub.f32 1.5, %v2104_v17 }
 0x27b   : > { %v3136_v21 = vpop.eup %3135  ;;  %v2450_v54 = vadd.f32 %v4769_v43, %v2417_v57  ;;  %v2035_v41 = vadd.f32 1e-05, %v1971_v25 }
 0x27c   : > { %v2112_v52 = vmul.f32 %v3136_v21, %v2034_v5  ;;  %v1724_v8 = vpop.xlane.xlu0 %1723  ;;  %v2106_v50 = vmul.f32 %v3134_v10, %v2105_v23  ;;  %vm2118_vm4 = vweird.f32 %v3136_v21 }
 0x27d   : > { %v4808_v12 = vmul.f32 0.015625, %v1724_v8  ;;  %3137 = vrsqrt.f32 %v2035_v41  ;;  %2521 = vmatmul.f32.gmra.mxu2 %v2450_v54  ;;  %vm2119_vm6 = vmor %vm2117_vm5, %vm2118_vm4  ;;  %vm2127_vm8 = vweird.f32 %v2035_v41 }
 0x27e   : > { %v2113_v55 = vmul.f32 %v3136_v21, %v2112_v52  ;;  %v1852_v46 = vpop.xlane.xlu1 %1851  ;;  %v2110_v15 = vsel %vm2109_vm3, %v3134_v10, %v2106_v50  ;;  %v2003_v50 = vsub.f32 %v4330_v35, %v4802_v3 }
 0x27f   : > { %v1940_v24 = vmul.f32 %v4808_v12, %v4808_v12  ;;  %v1908_v62 = vmul.f32 0.015625, %v1852_v46  ;;  %v2385_v63 = vmul.f32 %v2110_v15, %v2001_v36 }
 0x280   : > { %v2114_v51 = vmul.f32 0.5, %v2113_v55 }
 0x281   : > { %v1972_v28 = vsub.f32 %v1908_v62, %v1940_v24  ;;  %v2418_v42 = vmul.f32 %v4760_v48, %v2385_v63  ;;  %v1481_v61 = vpop.f32.mrf.mxu1  ;;  %v1493_v33 = vpop.f32.mrf.mxu3 }
 0x282   : > { %v2115_v59 = vsub.f32 1.5, %v2114_v51  ;;  %v1482_v37 = vadd.f32 %v4671_v30, %v1481_v61  ;;  %v4819_v9 = vadd.f32 %v4671_v30, %v1493_v33 }
 0x283   : > { %v4815_v56 = vadd.f32 1e-05, %v1972_v28  ;;  %v3138_v4 = vpop.eup %3137  ;;  %v2451_v14 = vadd.f32 %v4769_v43, %v2418_v42 }
 0x284   : > { %v1726_v27 = vpop.xlane.xlu2 %1725  ;;  %v2116_v49 = vmul.f32 %v3136_v21, %v2115_v59  ;;  %v2122_v10 = vmul.f32 %v3138_v4, %v2035_v41  ;;  %v1569_v5 = vmin.f32 %v1482_v37, 0.0  ;;  %v1573_v0 = vmin.f32 %v4819_v9, 0.0 }
 0x285   : > { %3139 = vrsqrt.f32 %v4815_v56  ;;  %v4826_v20 = vmul.f32 0.015625, %v1726_v27  ;;  %2524 = vmatmul.f32.gmra.mxu2 %v2451_v14  ;;  %vm2128_vm7 = vweird.f32 %v3138_v4  ;;  %vm1537_vm10 = vcmp.gt.f32.partialorder %v1482_v37, 0.0 }
 0x286   : > { %v2120_v19 = vsel %vm2119_vm6, %v3136_v21, %v2116_v49  ;;  %v2123_v47 = vmul.f32 %v3138_v4, %v2122_v10  ;;  %v1621_v39 = vmul.f32 1.442695, %v1569_v5  ;;  %v1629_v44 = vmul.f32 1.442695, %v1573_v0  ;;  %vm2129_vm9 = vmor %vm2127_vm8, %vm2128_vm7 }
 0x287   : > { %v1854_v22 = vpop.xlane.xlu0 %1853  ;;  %v2386_v38 = vmul.f32 %v2120_v19, %v2002_v32  ;;  %v1941_v34 = vmul.f32 %v4826_v20, %v4826_v20  ;;  %vm2137_vm11 = vweird.f32 %v4815_v56  ;;  %vm1541_vm13 = vcmp.gt.f32.partialorder %v4819_v9, 0.0 }
 0x288   : > { %v2124_v6 = vmul.f32 0.5, %v2123_v47  ;;  %v1909_v45 = vmul.f32 0.015625, %v1854_v22  ;;  %3141 = vpow2.f32 %v1621_v39 }
 0x289   : > { %v2419_v18 = vmul.f32 %v4760_v48, %v2386_v38  ;;  %3143 = vpow2.f32 %v1629_v44 }
 0x28a   : > { %v2125_v57 = vsub.f32 1.5, %v2124_v6  ;;  %v1973_v25 = vsub.f32 %v1909_v45, %v1941_v34 }
 0x28b   : > { %v4831_v17 = vpop.eup %3139  ;;  %v2452_v21 = vadd.f32 %v4769_v43, %v2419_v18 }
 0x28c   : > { %v2132_v23 = vmul.f32 %v4831_v17, %v4815_v56  ;;  %v4836_v54 = vadd.f32 1e-05, %v1973_v25  ;;  %v1728_v52 = vpop.xlane.xlu1 %1727  ;;  %v2126_v8 = vmul.f32 %v3138_v4, %v2125_v57  ;;  %vm2138_vm12 = vweird.f32 %v4831_v17 }
 0x28d   : > { %v4841_v55 = vmul.f32 0.015625, %v1728_v52  ;;  %2527 = vmatmul.f32.gmra.mxu2 %v2452_v21  ;;  %v2004_v57 = vsub.f32 %v4372_v13, %v4808_v12  ;;  %vm2139_vm14 = vmor %vm2137_vm11, %vm2138_vm12 }
 0x28e   : > { %v2133_v36 = vmul.f32 %v4831_v17, %v2132_v23  ;;  %3145 = vrsqrt.f32 %v4836_v54  ;;  %v2130_v46 = vsel %vm2129_vm9, %v3138_v4, %v2126_v8  ;;  %v3142_v24 = vpop.eup %3141  ;;  %v1856_v15 = vpop.xlane.xlu2 %1855  ;;  %vm2147_vm0 = vweird.f32 %v4836_v54 }
 0x28f   : > { %v1942_v41 = vmul.f32 %v4841_v55, %v4841_v55  ;;  %v2387_v51 = vmul.f32 %v2130_v46, %v2003_v50  ;;  %v3144_v63 = vpop.eup %3143  ;;  %v1910_v28 = vmul.f32 0.015625, %v1856_v15  ;;  %v2857_v59 = vadd.f32 -1.0, %v3142_v24 }
 0x290   : > { %v2134_v62 = vmul.f32 0.5, %v2133_v36  ;;  %v2861_v10 = vadd.f32 -1.0, %v3144_v63 }
 0x291   : > { %v2420_v35 = vmul.f32 %v4760_v48, %v2387_v51  ;;  %v1974_v42 = vsub.f32 %v1910_v28, %v1942_v41  ;;  %v4847_v61 = vsel %vm1537_vm10, %v1482_v37, %v2857_v59 }
 0x292   : > { %v2135_v3 = vsub.f32 1.5, %v2134_v62  ;;  %1749 = vadd.xlane.f32.xlu1 %v4847_v61  ;;  %v1825_v14 = vmul.f32 %v4847_v61, %v4847_v61  ;;  %v4877_v45 = vsel %vm1541_vm13, %v4819_v9, %v2861_v10 }
 0x293   : > { %v1496_v27 = vpop.f32.mrf.mxu3  ;;  %v1484_v4 = vpop.f32.mrf.mxu1  ;;  %v2453_v32 = vadd.f32 %v4769_v43, %v2420_v35  ;;  %v4857_v0 = vadd.f32 1e-05, %v1974_v42  ;;  %v1829_v50 = vmul.f32 %v4877_v45, %v4877_v45  ;;  %v2005_v42 = vsub.f32 %v4437_v60, %v4826_v20 }
 0x294   : > { %v1730_v33 = vpop.xlane.xlu0 %1729  ;;  %v4855_v5 = vpop.eup %3145  ;;  %v4860_v37 = vadd.f32 %v4671_v30, %v1496_v27  ;;  %v4863_v19 = vadd.f32 %v4671_v30, %v1484_v4  ;;  %1877 = vadd.xlane.f32.xlu0 %v1825_v14  ;;  %v2136_v18 = vmul.f32 %v4831_v17, %v2135_v3  ;;  %v2006_v14 = vsub.f32 %v4495_v26, %v4841_v55 }
 0x295   : > { %v4852_v49 = vmul.f32 0.015625, %v1730_v33  ;;  %v2142_v22 = vmul.f32 %v4855_v5, %v4836_v54  ;;  %2530 = vmatmul.f32.gmra.mxu2 %v2453_v32  ;;  %3147 = vrsqrt.f32 %v4857_v0  ;;  %vm2148_vm15 = vweird.f32 %v4855_v5 }
 0x296   : > { %v1858_v47 = vpop.xlane.xlu1 %1857  ;;  %v1574_v39 = vmin.f32 %v4860_v37, 0.0  ;;  %v1570_v44 = vmin.f32 %v4863_v19, 0.0  ;;  %v2140_v8 = vsel %vm2139_vm14, %v4831_v17, %v2136_v18  ;;  %vm4911_vm1 = vmor %vm2147_vm0, %vm2148_vm15  ;;  %vm1538_vm2 = vcmp.gt.f32.partialorder %v4863_v19, 0.0 }
 0x297   : > { %v1943_v38 = vmul.f32 %v4852_v49, %v4852_v49  ;;  %v2143_v34 = vmul.f32 %v4855_v5, %v2142_v22  ;;  %v1911_v6 = vmul.f32 0.015625, %v1858_v47  ;;  %v2388_v9 = vmul.f32 %v2140_v8, %v2004_v57 }
 0x298   : > { %v1631_v25 = vmul.f32 1.442695, %v1574_v39  ;;  %v1623_v21 = vmul.f32 1.442695, %v1570_v44  ;;  %vm2157_vm3 = vweird.f32 %v4857_v0  ;;  %vm1542_vm5 = vcmp.gt.f32.partialorder %v4860_v37, 0.0 }
 0x299   : > { %v2144_v23 = vmul.f32 0.5, %v2143_v34  ;;  %v1975_v52 = vsub.f32 %v1911_v6, %v1943_v38  ;;  %v2421_v17 = vmul.f32 %v4760_v48, %v2388_v9 }
 0x29a   : > { %3149 = vpow2.f32 %v1623_v21  ;;  %1757 = vadd.xlane.f32.xlu1 %v4877_v45 }
 0x29b   : > { %v2145_v46 = vsub.f32 1.5, %v2144_v23  ;;  %v4887_v24 = vadd.f32 1e-05, %v1975_v52  ;;  %v4892_v12 = vpop.eup %3147  ;;  %3151 = vpow2.f32 %v1631_v25  ;;  %v2454_v28 = vadd.f32 %v4769_v43, %v2421_v17 }
 0x29c   : > { %v1732_v36 = vpop.xlane.xlu2 %1731  ;;  %v2152_v15 = vmul.f32 %v4892_v12, %v4857_v0  ;;  %1885 = vadd.xlane.f32.xlu0 %v1829_v50  ;;  %vm2158_vm4 = vweird.f32 %v4892_v12 }
 0x29d   : > { %v1499_v62 = vpop.f32.mrf.mxu3  ;;  %v4890_v13 = vmul.f32 0.015625, %v1732_v36  ;;  %3153 = vrsqrt.f32 %v4887_v24  ;;  %v2146_v3 = vmul.f32 %v4855_v5, %v2145_v46  ;;  %2533 = vmatmul.f32.gmra.mxu2 %v2454_v28  ;;  %vm2159_vm6 = vmor %vm2157_vm3, %vm2158_vm4  ;;  %vm2167_vm9 = vweird.f32 %v4887_v24 }
 0x29e   : > { %v4895_v56 = vadd.f32 %v4671_v30, %v1499_v62  ;;  %v1860_v41 = vpop.xlane.xlu0 %1859  ;;  %v2153_v59 = vmul.f32 %v4892_v12, %v2152_v15 }
 0x29f   : > { %v1944_v63 = vmul.f32 %v4890_v13, %v4890_v13  ;;  %v1912_v35 = vmul.f32 0.015625, %v1860_v41  ;;  %v2150_v47 = vsel %vm4911_vm1, %v4855_v5, %v2146_v3 }
 0x2a0   : > { %v1575_v51 = vmin.f32 %v4895_v56, 0.0  ;;  %v3150_v4 = vpop.eup %3149  ;;  %v2154_v32 = vmul.f32 0.5, %v2153_v59  ;;  %v2389_v34 = vmul.f32 %v2150_v47, %v2005_v42  ;;  %vm1543_vm7 = vcmp.gt.f32.partialorder %v4895_v56, 0.0 }
 0x2a1   : > { %v1976_v10 = vsub.f32 %v1912_v35, %v1944_v63  ;;  %v3152_v22 = vpop.eup %3151  ;;  %v2858_v20 = vadd.f32 -1.0, %v3150_v4 }
 0x2a2   : > { %v1633_v27 = vmul.f32 1.442695, %v1575_v51  ;;  %v2155_v44 = vsub.f32 1.5, %v2154_v32  ;;  %v2862_v50 = vadd.f32 -1.0, %v3152_v22  ;;  %v2422_v36 = vmul.f32 %v4760_v48, %v2389_v34 }
 0x2a3   : > { %v1487_v54 = vpop.f32.mrf.mxu1  ;;  %v4924_v39 = vpop.eup %3153  ;;  %v4926_v26 = vadd.f32 1e-05, %v1976_v10  ;;  %v4935_v18 = vsel %vm1538_vm2, %v4863_v19, %v2858_v20 }
 0x2a4   : > { %3155 = vpow2.f32 %v1633_v27  ;;  %v4921_v60 = vadd.f32 %v4671_v30, %v1487_v54  ;;  %v1734_v38 = vpop.xlane.xlu1 %1733  ;;  %v2162_v5 = vmul.f32 %v4924_v39, %v4887_v24  ;;  %1751 = vadd.xlane.f32.xlu2 %v4935_v18  ;;  %v1826_v21 = vmul.f32 %v4935_v18, %v4935_v18 }
 0x2a5   : > { %v4928_v55 = vmul.f32 0.015625, %v1734_v38  ;;  %3157 = vrsqrt.f32 %v4926_v26  ;;  %v2156_v46 = vmul.f32 %v4892_v12, %v2155_v44  ;;  %v2455_v15 = vadd.f32 %v4769_v43, %v2422_v36 }
 0x2a6   : > { %v1571_v6 = vmin.f32 %v4921_v60, 0.0  ;;  %v1862_v57 = vpop.xlane.xlu2 %1861  ;;  %v2163_v52 = vmul.f32 %v4924_v39, %v2162_v5  ;;  %1879 = vadd.xlane.f32.xlu1 %v1826_v21  ;;  %v4963_v0 = vsel %vm1542_vm5, %v4860_v37, %v2862_v50  ;;  %vm2168_vm8 = vweird.f32 %v4924_v39 }
 0x2a7   : > { %v1502_v25 = vpop.f32.mrf.mxu3  ;;  %v1945_v23 = vmul.f32 %v4928_v55, %v4928_v55  ;;  %v1913_v9 = vmul.f32 0.015625, %v1862_v57  ;;  %v2160_v59 = vsel %vm2159_vm6, %v4892_v12, %v2156_v46  ;;  %2536 = vmatmul.f32.gmra.mxu2 %v2455_v15  ;;  %v2007_v12 = vsub.f32 %v4535_v16, %v4852_v49  ;;  %vm2169_vm10 = vmor %vm2167_vm9, %vm2168_vm8 }
 0x2a8   : > { %v1625_v8 = vmul.f32 1.442695, %v1571_v6  ;;  %v4946_v19 = vadd.f32 %v4671_v30, %v1502_v25  ;;  %v2164_v17 = vmul.f32 0.5, %v2163_v52  ;;  %v2390_v33 = vmul.f32 %v2160_v59, %v2006_v14 }
 0x2a9   : > { %v1977_v51 = vsub.f32 %v1913_v9, %v1945_v23  ;;  %v1830_v22 = vmul.f32 %v4963_v0, %v4963_v0  ;;  %vm1539_vm11 = vcmp.gt.f32.partialorder %v4921_v60, 0.0  ;;  %vm2177_vm14 = vweird.f32 %v4926_v26 }
 0x2aa   : > { %v3156_v62 = vpop.eup %3155  ;;  %3159 = vpow2.f32 %v1625_v8  ;;  %v1576_v41 = vmin.f32 %v4946_v19, 0.0  ;;  %v2165_v4 = vsub.f32 1.5, %v2164_v17  ;;  %v2423_v34 = vmul.f32 %v4760_v48, %v2390_v33 }
 0x2ab   : > { %v2863_v63 = vadd.f32 -1.0, %v3156_v62  ;;  %v1490_v28 = vpop.f32.mrf.mxu1  ;;  %v4965_v27 = vpop.eup %3157  ;;  %v4967_v32 = vadd.f32 1e-05, %v1977_v51  ;;  %vm1544_vm13 = vcmp.gt.f32.partialorder %v4946_v19, 0.0 }
 0x2ac   : > { %v1635_v35 = vmul.f32 1.442695, %v1576_v41  ;;  %v4960_v3 = vadd.f32 %v4671_v30, %v1490_v28  ;;  %v1736_v42 = vpop.xlane.xlu0 %1735  ;;  %v2172_v37 = vmul.f32 %v4965_v27, %v4926_v26  ;;  %1759 = vadd.xlane.f32.xlu2 %v4963_v0  ;;  %v2166_v57 = vmul.f32 %v4924_v39, %v2165_v4 }
 0x2ad   : > { %v4970_v54 = vsel %vm1543_vm7, %v4895_v56, %v2863_v63  ;;  %v4972_v10 = vmul.f32 0.015625, %v1736_v42  ;;  %v2456_v23 = vadd.f32 %v4769_v43, %v2423_v34  ;;  %vm2178_vm12 = vweird.f32 %v4965_v27 }
 0x2ae   : > { %3161 = vpow2.f32 %v1635_v35  ;;  %1761 = vadd.xlane.f32.xlu0 %v4970_v54  ;;  %v1572_v14 = vmin.f32 %v4960_v3, 0.0  ;;  %v1864_v47 = vpop.xlane.xlu1 %1863  ;;  %v2173_v20 = vmul.f32 %v4965_v27, %v2172_v37  ;;  %1887 = vadd.xlane.f32.xlu1 %v1830_v22  ;;  %v2170_v8 = vsel %vm2169_vm10, %v4924_v39, %v2166_v57  ;;  %vm2179_vm15 = vmor %vm2177_vm14, %vm2178_vm12 }
 0x2af   : > { %3163 = vrsqrt.f32 %v4967_v32  ;;  %v1505_v56 = vpop.f32.mrf.mxu3  ;;  %v1946_v16 = vmul.f32 %v4972_v10, %v4972_v10  ;;  %v1914_v5 = vmul.f32 0.015625, %v1864_v47  ;;  %v1831_v9 = vmul.f32 %v4970_v54, %v4970_v54  ;;  %2539 = vmatmul.f32.gmra.mxu2 %v2456_v23 }
 0x2b0   : > { %v3160_v49 = vpop.eup %3159  ;;  %v4989_v38 = vadd.f32 %v4671_v30, %v1505_v56  ;;  %v1627_v44 = vmul.f32 1.442695, %v1572_v14  ;;  %v2174_v25 = vmul.f32 0.5, %v2173_v20  ;;  %v2391_v62 = vmul.f32 %v2170_v8, %v2007_v12 }
 0x2b1   : > { %v2859_v6 = vadd.f32 -1.0, %v3160_v49  ;;  %v1978_v52 = vsub.f32 %v1914_v5, %v1946_v16  ;;  %v2008_v56 = vsub.f32 %v4595_v2, %v4890_v13  ;;  %vm1540_vm0 = vcmp.gt.f32.partialorder %v4960_v3, 0.0 }
 0x2b2   : > { %v1577_v21 = vmin.f32 %v4989_v38, 0.0  ;;  %3165 = vpow2.f32 %v1627_v44  ;;  %v2175_v41 = vsub.f32 1.5, %v2174_v25  ;;  %vm2187_vm2 = vweird.f32 %v4967_v32 }
 0x2b3   : > { %v5001_v36 = vsel %vm1539_vm11, %v4921_v60, %v2859_v6  ;;  %v5007_v15 = vadd.f32 1e-05, %v1978_v52  ;;  %v2424_v60 = vmul.f32 %v4760_v48, %v2391_v62  ;;  %vm1545_vm4 = vcmp.gt.f32.partialorder %v4989_v38, 0.0 }
 0x2b4   : > { %v3162_v24 = vpop.eup %3161  ;;  %v1637_v50 = vmul.f32 1.442695, %v1577_v21  ;;  %v1738_v46 = vpop.xlane.xlu2 %1737  ;;  %1889 = vadd.xlane.f32.xlu2 %v1831_v9  ;;  %v2176_v47 = vmul.f32 %v4965_v27, %v2175_v41  ;;  %v1827_v25 = vmul.f32 %v5001_v36, %v5001_v36 }
 0x2b5   : > { %v5005_v17 = vpop.eup %3163  ;;  %v2864_v51 = vadd.f32 -1.0, %v3162_v24  ;;  %v5009_v63 = vmul.f32 0.015625, %v1738_v46  ;;  %v2457_v37 = vadd.f32 %v4769_v43, %v2424_v60  ;;  %vm2197_vm7 = vweird.f32 %v5007_v15 }
 0x2b6   : > { %v2182_v39 = vmul.f32 %v5005_v17, %v4967_v32  ;;  %3167 = vpow2.f32 %v1637_v50  ;;  %1753 = vadd.xlane.f32.xlu0 %v5001_v36  ;;  %v1866_v28 = vpop.xlane.xlu0 %1865  ;;  %v2180_v26 = vsel %vm2179_vm15, %v4965_v27, %v2176_v47  ;;  %vm2188_vm1 = vweird.f32 %v5005_v17 }
 0x2b7   : > { %3169 = vrsqrt.f32 %v5007_v15  ;;  %v1508_v59 = vpop.f32.mrf.mxu3  ;;  %v1947_v35 = vmul.f32 %v5009_v63, %v5009_v63  ;;  %v5025_v12 = vsel %vm1544_vm13, %v4946_v19, %v2864_v51  ;;  %v1915_v14 = vmul.f32 0.015625, %v1866_v28  ;;  %2542 = vmatmul.f32.gmra.mxu2 %v2457_v37  ;;  %vm2189_vm3 = vmor %vm2187_vm2, %vm2188_vm1 }
 0x2b8   : > { %v3166_v42 = vpop.eup %3165  ;;  %v2183_v33 = vmul.f32 %v5005_v17, %v2182_v39  ;;  %v5022_v4 = vadd.f32 %v4671_v30, %v1508_v59  ;;  %1763 = vadd.xlane.f32.xlu1 %v5025_v12  ;;  %v1832_v34 = vmul.f32 %v5025_v12, %v5025_v12  ;;  %v2392_v6 = vmul.f32 %v2180_v26, %v2008_v56 }
 0x2b9   : > { %v1979_v19 = vsub.f32 %v1915_v14, %v1947_v35  ;;  %v2860_v49 = vadd.f32 -1.0, %v3166_v42 }
 0x2ba   : > { %v2184_v22 = vmul.f32 0.5, %v2183_v33  ;;  %v1578_v16 = vmin.f32 %v5022_v4, 0.0  ;;  %v2425_v23 = vmul.f32 %v4760_v48, %v2392_v6  ;;  %vm1546_vm6 = vcmp.gt.f32.partialorder %v5022_v4, 0.0 }
 0x2bb   : > { %v5041_v13 = vadd.f32 1e-05, %v1979_v19  ;;  %v5054_v24 = vsel %vm1540_vm0, %v4960_v3, %v2860_v49  ;;  %v2009_v3 = vsub.f32 %v4621_v29, %v4928_v55 }
 0x2bc   : > { %v3168_v20 = vpop.eup %3167  ;;  %v1639_v44 = vmul.f32 1.442695, %v1578_v16  ;;  %v1740_v5 = vpop.xlane.xlu1 %1739  ;;  %v2185_v2 = vsub.f32 1.5, %v2184_v22  ;;  %1881 = vadd.xlane.f32.xlu2 %v1827_v25  ;;  %v2458_v51 = vadd.f32 %v4769_v43, %v2425_v23  ;;  %v1828_v59 = vmul.f32 %v5054_v24, %v5054_v24 }
 0x2bd   : > { %v5039_v57 = vpop.eup %3169  ;;  %v5045_v21 = vmul.f32 0.015625, %v1740_v5  ;;  %v2865_v41 = vadd.f32 -1.0, %v3168_v20  ;;  %vm2207_vm11 = vweird.f32 %v5041_v13 }
 0x2be   : > { %v2192_v27 = vmul.f32 %v5039_v57, %v5007_v15  ;;  %3171 = vpow2.f32 %v1639_v44  ;;  %1891 = vadd.xlane.f32.xlu0 %v1832_v34  ;;  %v1868_v52 = vpop.xlane.xlu2 %1867  ;;  %v2186_v39 = vmul.f32 %v5005_v17, %v2185_v2  ;;  %vm2198_vm5 = vweird.f32 %v5039_v57  ;;  %v3217_v44 = vld [vmem:[%s5419_s2 + $0x3] ss:$0 sm:$0xff] }
 0x2bf   : > { %v1511_v8 = vpop.f32.mrf.mxu3  ;;  %3173 = vrsqrt.f32 %v5041_v13  ;;  %v1948_v50 = vmul.f32 %v5045_v21, %v5045_v21  ;;  %v1916_v62 = vmul.f32 0.015625, %v1868_v52  ;;  %v5078_v29 = vsel %vm1545_vm4, %v4989_v38, %v2865_v41  ;;  %2545 = vmatmul.f32.gmra.mxu2 %v2458_v51  ;;  %vm2199_vm8 = vmor %vm2197_vm7, %vm2198_vm5 }
 0x2c0   : > { %v2193_v9 = vmul.f32 %v5039_v57, %v2192_v27  ;;  %v5060_v46 = vadd.f32 %v4671_v30, %v1511_v8  ;;  %1755 = vadd.xlane.f32.xlu1 %v5054_v24  ;;  %v2190_v32 = vsel %vm2189_vm3, %v5005_v17, %v2186_v39  ;;  %v1833_v19 = vmul.f32 %v5078_v29, %v5078_v29 }
 0x2c1   : > { %v1980_v28 = vsub.f32 %v1916_v62, %v1948_v50  ;;  %v2393_v37 = vmul.f32 %v2190_v32, %v2009_v3  ;;  %v2010_v27 = vsub.f32 %v4644_v7, %v4972_v10 }
 0x2c2   : > { %v2194_v60 = vmul.f32 0.5, %v2193_v9  ;;  %v1579_v30 = vmin.f32 %v5060_v46, 0.0  ;;  %vm1547_vm10 = vcmp.gt.f32.partialorder %v5060_v46, 0.0 }
 0x2c3   : > { %v5075_v33 = vadd.f32 1e-05, %v1980_v28  ;;  %v2426_v26 = vmul.f32 %v4760_v48, %v2393_v37 }
 0x2c4   : > { %v3172_v35 = vpop.eup %3171  ;;  %v1641_v42 = vmul.f32 1.442695, %v1579_v30  ;;  %v1742_v55 = vpop.xlane.xlu0 %1741  ;;  %v2195_v47 = vsub.f32 1.5, %v2194_v60  ;;  %1765 = vadd.xlane.f32.xlu2 %v5078_v29 }
 0x2c5   : > { %v5080_v14 = vpop.eup %3173  ;;  %v2866_v56 = vadd.f32 -1.0, %v3172_v35  ;;  %v5082_v22 = vmul.f32 0.015625, %v1742_v55  ;;  %v2459_v6 = vadd.f32 %v4769_v43, %v2426_v26  ;;  %v2011_v55 = vsub.f32 %v4663_v40, %v5009_v63 }
 0x2c6   : > { %3175 = vpow2.f32 %v1641_v42  ;;  %v2202_v17 = vmul.f32 %v5080_v14, %v5041_v13  ;;  %1883 = vadd.xlane.f32.xlu0 %v1828_v59  ;;  %v1870_v16 = vpop.xlane.xlu1 %1869  ;;  %v2196_v25 = vmul.f32 %v5039_v57, %v2195_v47  ;;  %vm2208_vm9 = vweird.f32 %v5080_v14 }
 0x2c7   : > { %3177 = vrsqrt.f32 %v5075_v33  ;;  %v1514_v38 = vpop.f32.mrf.mxu3  ;;  %v1949_v49 = vmul.f32 %v5082_v22, %v5082_v22  ;;  %v1917_v5 = vmul.f32 0.015625, %v1870_v16  ;;  %v5104_v2 = vsel %vm1546_vm6, %v5022_v4, %v2866_v56  ;;  %2548 = vmatmul.f32.gmra.mxu2 %v2459_v6  ;;  %vm2209_vm12 = vmor %vm2207_vm11, %vm2208_vm9 }
 0x2c8   : > { %v2203_v20 = vmul.f32 %v5080_v14, %v2202_v17  ;;  %v5099_v34 = vadd.f32 %v3217_v44, %v1514_v38  ;;  %1893 = vadd.xlane.f32.xlu1 %v1833_v19  ;;  %v2200_v15 = vsel %vm2199_vm8, %v5039_v57, %v2196_v25  ;;  %v1834_v4 = vmul.f32 %v5104_v2, %v5104_v2 }
 0x2c9   : > { %v1981_v8 = vsub.f32 %v1917_v5, %v1949_v49  ;;  %v2394_v51 = vmul.f32 %v2200_v15, %v2010_v27  ;;  %vm2217_vm15 = vweird.f32 %v5075_v33 }
 0x2ca   : > { %v2204_v23 = vmul.f32 0.5, %v2203_v20  ;;  %v1580_v52 = vmin.f32 %v5099_v34, 0.0  ;;  %vm1548_vm14 = vcmp.gt.f32.partialorder %v5099_v34, 0.0 }
 0x2cb   : > { %v5113_v62 = vadd.f32 1e-05, %v1981_v8  ;;  %v2427_v32 = vmul.f32 %v4760_v48, %v2394_v51 }
 0x2cc   : > { %v3176_v50 = vpop.eup %3175  ;;  %v1643_v9 = vmul.f32 1.442695, %v1580_v52  ;;  %v1744_v41 = vpop.xlane.xlu2 %1743  ;;  %v2205_v7 = vsub.f32 1.5, %v2204_v23  ;;  %1767 = vadd.xlane.f32.xlu2 %v5104_v2 }
 0x2cd   : > { %v3178_v39 = vpop.eup %3177  ;;  %v2867_v10 = vadd.f32 -1.0, %v3176_v50  ;;  %v5117_v3 = vmul.f32 0.015625, %v1744_v41  ;;  %v2460_v47 = vadd.f32 %v4769_v43, %v2427_v32  ;;  %vm2227_vm2 = vweird.f32 %v5113_v62 }
 0x2ce   : > { %v2212_v60 = vmul.f32 %v3178_v39, %v5075_v33  ;;  %3179 = vpow2.f32 %v1643_v9  ;;  %1895 = vadd.xlane.f32.xlu0 %v1834_v4  ;;  %v1872_v57 = vpop.xlane.xlu0 %1871  ;;  %v2206_v42 = vmul.f32 %v5080_v14, %v2205_v7  ;;  %vm2218_vm13 = vweird.f32 %v3178_v39 }
 0x2cf   : > { %3181 = vrsqrt.f32 %v5113_v62  ;;  %v1950_v30 = vmul.f32 %v5117_v3, %v5117_v3  ;;  %v5127_v59 = vsel %vm1547_vm10, %v5060_v46, %v2867_v10  ;;  %v1918_v35 = vmul.f32 0.015625, %v1872_v57  ;;  %2551 = vmatmul.f32.gmra.mxu2 %v2460_v47  ;;  %vm2219_vm0 = vmor %vm2217_vm15, %vm2218_vm13 }
 0x2d0   : > { %v2213_v28 = vmul.f32 %v3178_v39, %v2212_v60  ;;  %1769 = vadd.xlane.f32.xlu1 %v5127_v59  ;;  %v2210_v46 = vsel %vm2209_vm12, %v5080_v14, %v2206_v42  ;;  %v1835_v20 = vmul.f32 %v5127_v59, %v5127_v59  ;;  %v2012_v33 = vsub.f32 %v4691_v11, %v5045_v21  ;;  %v5166_v11 = vld [vmem:[%s5419_s2 + $0x4] ss:$0 sm:$0xff]  ;;  %v5177_v42 = vld [vmem:[%s5419_s2 + $0x5] ss:$0 sm:$0xff] }
 0x2d1   : > { %v1982_v56 = vsub.f32 %v1918_v35, %v1950_v30  ;;  %v2395_v13 = vmul.f32 %v2210_v46, %v2011_v55  ;;  %v2013_v60 = vsub.f32 %v4716_v1, %v5082_v22 }
 0x2d2   : > { %v2214_v37 = vmul.f32 0.5, %v2213_v28 }
 0x2d3   : > { %v5137_v38 = vadd.f32 1e-05, %v1982_v56  ;;  %v2428_v6 = vmul.f32 %v4760_v48, %v2395_v13 }
 0x2d4   : > { %v3180_v17 = vpop.eup %3179  ;;  %v2215_v16 = vsub.f32 1.5, %v2214_v37  ;;  %v1746_v19 = vpop.xlane.xlu1 %1745  ;;  %1897 = vadd.xlane.f32.xlu2 %v1835_v20 }
 0x2d5   : > { %v3182_v49 = vpop.eup %3181  ;;  %v2868_v26 = vadd.f32 -1.0, %v3180_v17  ;;  %v5141_v40 = vmul.f32 0.015625, %v1746_v19  ;;  %3183 = vrsqrt.f32 %v5137_v38  ;;  %vm2237_vm5 = vweird.f32 %v5137_v38 }
 0x2d6   : > { %v2222_v63 = vmul.f32 %v3182_v49, %v5113_v62  ;;  %v1874_v14 = vpop.xlane.xlu2 %1873  ;;  %v2216_v52 = vmul.f32 %v3178_v39, %v2215_v16  ;;  %vm2228_vm1 = vweird.f32 %v3182_v49  ;;  %v2014_v16 = vsub.f32 %v4736_v58, %v5117_v3 }
 0x2d7   : > { %v5148_v44 = vsel %vm1548_vm14, %v5099_v34, %v2868_v26  ;;  %v1951_v5 = vmul.f32 %v5141_v40, %v5141_v40  ;;  %v1919_v23 = vmul.f32 0.015625, %v1874_v14  ;;  %v2461_v34 = vadd.f32 %v4769_v43, %v2428_v6  ;;  %vm2229_vm3 = vmor %vm2227_vm2, %vm2228_vm1 }
 0x2d8   : > { %v2223_v25 = vmul.f32 %v3182_v49, %v2222_v63  ;;  %1771 = vadd.xlane.f32.xlu0 %v5148_v44  ;;  %v1836_v27 = vmul.f32 %v5148_v44, %v5148_v44  ;;  %v2220_v50 = vsel %vm2219_vm0, %v3178_v39, %v2216_v52  ;;  %v2015_v58 = vsub.f32 %v4764_v53, %v5141_v40 }
 0x2d9   : > { %v1983_v15 = vsub.f32 %v1919_v23, %v1951_v5  ;;  %v2396_v48 = vmul.f32 %v2220_v50, %v2012_v33  ;;  %2554 = vmatmul.f32.gmra.mxu2 %v2461_v34 }
 0x2da   : > { %v2224_v8 = vmul.f32 0.5, %v2223_v25  ;;  %1899 = vadd.xlane.f32.xlu1 %v1836_v27 }
 0x2db   : > { %v3184_v9 = vpop.eup %3183  ;;  %v2047_v41 = vadd.f32 1e-05, %v1983_v15  ;;  %v2429_v43 = vmul.f32 %v5166_v11, %v2396_v48 }
 0x2dc   : > { %v2225_v4 = vsub.f32 1.5, %v2224_v8  ;;  %v1748_v51 = vpop.xlane.xlu0 %1747  ;;  %v2232_v7 = vmul.f32 %v3184_v9, %v5137_v38  ;;  %vm2238_vm4 = vweird.f32 %v3184_v9 }
 0x2dd   : > { %v5161_v10 = vmul.f32 0.015625, %v1748_v51  ;;  %3185 = vrsqrt.f32 %v2047_v41  ;;  %v2462_v62 = vadd.f32 %v5177_v42, %v2429_v43  ;;  %vm2239_vm6 = vmor %vm2237_vm5, %vm2238_vm4  ;;  %vm2247_vm8 = vweird.f32 %v2047_v41 }
 0x2de   : > { %v1876_v21 = vpop.xlane.xlu2 %1875  ;;  %v2226_v39 = vmul.f32 %v3182_v49, %v2225_v4  ;;  %v2233_v57 = vmul.f32 %v3184_v9, %v2232_v7 }
 0x2df   : > { %v1952_v30 = vmul.f32 %v5161_v10, %v5161_v10  ;;  %v1920_v28 = vmul.f32 0.015625, %v1876_v21  ;;  %v2016_v48 = vsub.f32 %v4784_v31, %v5161_v10 }
 0x2e0   : > { %v2230_v32 = vsel %vm2229_vm3, %v3182_v49, %v2226_v39  ;;  %v2234_v35 = vmul.f32 0.5, %v2233_v57 }
 0x2e1   : > { %v2397_v55 = vmul.f32 %v2230_v32, %v2013_v60  ;;  %v1984_v37 = vsub.f32 %v1920_v28, %v1952_v30  ;;  %2557 = vmatmul.f32.gmra.mxu2 %v2462_v62 }
 0x2e2   : > { %v2235_v47 = vsub.f32 1.5, %v2234_v35 }
 0x2e3   : > { %v3186_v1 = vpop.eup %3185  ;;  %v2048_v22 = vadd.f32 1e-05, %v1984_v37  ;;  %v2430_v46 = vmul.f32 %v5166_v11, %v2397_v55 }
 0x2e4   : > { %v2242_v56 = vmul.f32 %v3186_v1, %v2047_v41  ;;  %v2236_v17 = vmul.f32 %v3184_v9, %v2235_v47  ;;  %vm2248_vm7 = vweird.f32 %v3186_v1 }
 0x2e5   : > { %3187 = vrsqrt.f32 %v2048_v22  ;;  %v2463_v26 = vadd.f32 %v5177_v42, %v2430_v46  ;;  %vm2249_vm9 = vmor %vm2247_vm8, %vm2248_vm7  ;;  %vm2257_vm11 = vweird.f32 %v2048_v22 }
 0x2e6   : > { %v2243_v19 = vmul.f32 %v3186_v1, %v2242_v56  ;;  %v2240_v13 = vsel %vm2239_vm6, %v3184_v9, %v2236_v17 }
 0x2e7   : > { %v2398_v63 = vmul.f32 %v2240_v13, %v2014_v16 }
 0x2e8   : > { %v2244_v49 = vmul.f32 0.5, %v2243_v19  ;;  %v2513_v20 = vpop.f32.mrf.mxu2 }
 0x2e9   : > { %2560 = vmatmul.f32.gmra.mxu2 %v2463_v26  ;;  %v2431_v6 = vmul.f32 %v5166_v11, %v2398_v63 }
 0x2ea   : > { %v2245_v14 = vsub.f32 1.5, %v2244_v49 }
 0x2eb   : > { %v3188_v38 = vpop.eup %3187  ;;  %v2464_v52 = vadd.f32 %v5177_v42, %v2431_v6 }
 0x2ec   : > { %v2252_v5 = vmul.f32 %v3188_v38, %v2048_v22  ;;  %v2246_v25 = vmul.f32 %v3186_v1, %v2245_v14  ;;  %vm2258_vm10 = vweird.f32 %v3188_v38 }
 0x2ed   : > { %vm2259_vm12 = vmor %vm2257_vm11, %vm2258_vm10 }
 0x2ee   : > { %v2253_v3 = vmul.f32 %v3188_v38, %v2252_v5  ;;  %v2250_v27 = vsel %vm2249_vm9, %v3186_v1, %v2246_v25 }
 0x2ef   : > { %v2399_v34 = vmul.f32 %v2250_v27, %v2015_v58 }
 0x2f0   : > { %v2254_v23 = vmul.f32 0.5, %v2253_v3  ;;  %v2516_v33 = vpop.f32.mrf.mxu2 }
 0x2f1   : > { %2563 = vmatmul.f32.gmra.mxu2 %v2464_v52  ;;  %v2432_v15 = vmul.f32 %v5166_v11, %v2399_v34 }
 0x2f2   : > { %v2255_v8 = vsub.f32 1.5, %v2254_v23 }
 0x2f3   : > { %v2465_v53 = vadd.f32 %v5177_v42, %v2432_v15 }
 0x2f4   : > { %v2256_v50 = vmul.f32 %v3188_v38, %v2255_v8 }
 0x2f6   : > { %v2260_v9 = vsel %vm2259_vm12, %v3188_v38, %v2256_v50 }
 0x2f7   : > { %v2400_v40 = vmul.f32 %v2260_v9, %v2016_v48 }
 0x2f8   : > { %v2519_v4 = vpop.f32.mrf.mxu2 }
 0x2f9   : > { %2566 = vmatmul.f32.gmra.mxu2 %v2465_v53  ;;  %v2433_v41 = vmul.f32 %v5166_v11, %v2400_v40 }
 0x2fb   : > { %v2466_v51 = vadd.f32 %v5177_v42, %v2433_v41 }
 0x2fd   : > { %2609 = vxpose.xlu2.b32.start [1/16] (narrow) %v2513_v20, 8 }
 0x300   : > { %v2522_v7 = vpop.f32.mrf.mxu2 }
 0x301   : > { %2569 = vmatmul.f32.gmra.mxu2 %v2466_v51 }
 0x305   : > { %2610 = vxpose.xlu2.b32.cont [2/16] (narrow) %v2516_v33, 8  ;;  %v1750_v43 = vpop.xlane.xlu1 %1749 }
 0x306   : > { %v1793_v21 = vmul.f32 0.015625, %v1750_v43 }
 0x307   : > { %v1878_v39 = vpop.xlane.xlu0 %1877 }
 0x308   : > { %v2525_v60 = vpop.f32.mrf.mxu2  ;;  %v1953_v57 = vmul.f32 %v1793_v21, %v1793_v21  ;;  %v1921_v31 = vmul.f32 0.015625, %v1878_v39  ;;  %v2017_v25 = vsub.f32 %v4847_v61, %v1793_v21 }
 0x30a   : > { %v1985_v10 = vsub.f32 %v1921_v31, %v1953_v57 }
 0x30c   : > { %v2049_v30 = vadd.f32 1e-05, %v1985_v10 }
 0x30d   : > { %2611 = vxpose.xlu2.b32.cont [3/16] (narrow) %v2519_v4, 8  ;;  %v1758_v28 = vpop.xlane.xlu1 %1757 }
 0x30e   : > { %3189 = vrsqrt.f32 %v2049_v30  ;;  %v5195_v32 = vmul.f32 0.015625, %v1758_v28  ;;  %vm2267_vm14 = vweird.f32 %v2049_v30 }
 0x30f   : > { %v1886_v35 = vpop.xlane.xlu0 %1885 }
 0x310   : > { %v2528_v62 = vpop.f32.mrf.mxu2  ;;  %v1957_v55 = vmul.f32 %v5195_v32, %v5195_v32  ;;  %v1925_v37 = vmul.f32 0.015625, %v1886_v35  ;;  %v2021_v43 = vsub.f32 %v4877_v45, %v5195_v32 }
 0x312   : > { %v1989_v47 = vsub.f32 %v1925_v37, %v1957_v55 }
 0x314   : > { %v3190_v1 = vpop.eup %3189  ;;  %v2053_v22 = vadd.f32 1e-05, %v1989_v47 }
 0x315   : > { %v2262_v56 = vmul.f32 %v3190_v1, %v2049_v30  ;;  %2612 = vxpose.xlu2.b32.cont [4/16] (narrow) %v2522_v7, 8  ;;  %vm2268_vm13 = vweird.f32 %v3190_v1 }
 0x316   : > { %3191 = vrsqrt.f32 %v2053_v22  ;;  %vm2269_vm15 = vmor %vm2267_vm14, %vm2268_vm13  ;;  %vm2307_vm1 = vweird.f32 %v2053_v22 }
 0x317   : > { %v2263_v46 = vmul.f32 %v3190_v1, %v2262_v56  ;;  %v1752_v17 = vpop.xlane.xlu2 %1751 }
 0x318   : > { %v5199_v16 = vmul.f32 0.015625, %v1752_v17  ;;  %v2531_v49 = vpop.f32.mrf.mxu2 }
 0x319   : > { %v2264_v19 = vmul.f32 0.5, %v2263_v46  ;;  %v1880_v13 = vpop.xlane.xlu1 %1879 }
 0x31a   : > { %v1954_v26 = vmul.f32 %v5199_v16, %v5199_v16  ;;  %v1922_v20 = vmul.f32 0.015625, %v1880_v13 }
 0x31b   : > { %v2265_v63 = vsub.f32 1.5, %v2264_v19 }
 0x31c   : > { %v3192_v14 = vpop.eup %3191  ;;  %v1986_v38 = vsub.f32 %v1922_v20, %v1954_v26 }
 0x31d   : > { %v2302_v5 = vmul.f32 %v3192_v14, %v2053_v22  ;;  %2613 = vxpose.xlu2.b32.cont [5/16] (narrow) %v2525_v60, 8  ;;  %v2266_v6 = vmul.f32 %v3190_v1, %v2265_v63  ;;  %vm2308_vm0 = vweird.f32 %v3192_v14 }
 0x31e   : > { %v2050_v58 = vadd.f32 1e-05, %v1986_v38  ;;  %vm2309_vm2 = vmor %vm2307_vm1, %vm2308_vm0  ;;  %v2018_v38 = vsub.f32 %v4935_v18, %v5199_v16 }
 0x31f   : > { %v2303_v27 = vmul.f32 %v3192_v14, %v2302_v5  ;;  %v1760_v23 = vpop.xlane.xlu2 %1759  ;;  %v2270_v52 = vsel %vm2269_vm15, %v3190_v1, %v2266_v6 }
 0x320   : > { %3193 = vrsqrt.f32 %v2050_v58  ;;  %v5204_v33 = vmul.f32 0.015625, %v1760_v23  ;;  %v2401_v34 = vmul.f32 %v2270_v52, %v2017_v25  ;;  %v5209_v61 = vpop.f32.mrf.mxu2  ;;  %vm2277_vm4 = vweird.f32 %v2050_v58 }
 0x321   : > { %v1762_v3 = vpop.xlane.xlu0 %1761  ;;  %v2304_v8 = vmul.f32 0.5, %v2303_v27  ;;  %v1888_v15 = vpop.xlane.xlu1 %1887 }
 0x322   : > { %v1958_v50 = vmul.f32 %v5204_v33, %v5204_v33  ;;  %v1926_v48 = vmul.f32 0.015625, %v1888_v15  ;;  %v2434_v9 = vmul.f32 %v5166_v11, %v2401_v34  ;;  %v5211_v40 = vmul.f32 0.015625, %v1762_v3 }
 0x323   : > { %v2305_v53 = vsub.f32 1.5, %v2304_v8 }
 0x324   : > { %v1990_v4 = vsub.f32 %v1926_v48, %v1958_v50  ;;  %v2467_v41 = vadd.f32 %v5177_v42, %v2434_v9  ;;  %v1959_v10 = vmul.f32 %v5211_v40, %v5211_v40 }
 0x325   : > { %v2306_v51 = vmul.f32 %v3192_v14, %v2305_v53  ;;  %2614 = vxpose.xlu2.b32.cont [6/16] (narrow) %v2528_v62, 8 }
 0x326   : > { %v3194_v7 = vpop.eup %3193  ;;  %v5216_v21 = vadd.f32 1e-05, %v1990_v4  ;;  %2572 = vmatmul.f32.gmra.mxu2 %v2467_v41 }
 0x327   : > { %v2310_v60 = vsel %vm2309_vm2, %v3192_v14, %v2306_v51  ;;  %v2272_v57 = vmul.f32 %v3194_v7, %v2050_v58  ;;  %v1890_v31 = vpop.xlane.xlu2 %1889  ;;  %vm2278_vm3 = vweird.f32 %v3194_v7 }
 0x328   : > { %3195 = vrsqrt.f32 %v5216_v21  ;;  %v1927_v30 = vmul.f32 0.015625, %v1890_v31  ;;  %v2405_v28 = vmul.f32 %v2310_v60, %v2021_v43  ;;  %vm2279_vm5 = vmor %vm2277_vm4, %vm2278_vm3  ;;  %vm2317_vm7 = vweird.f32 %v5216_v21 }
 0x329   : > { %v1754_v39 = vpop.xlane.xlu0 %1753  ;;  %v2273_v35 = vmul.f32 %v3194_v7, %v2272_v57  ;;  %v2022_v60 = vsub.f32 %v4963_v0, %v5204_v33 }
 0x32a   : > { %v1991_v55 = vsub.f32 %v1927_v30, %v1959_v10  ;;  %v2438_v45 = vmul.f32 %v5166_v11, %v2405_v28  ;;  %v5224_v47 = vmul.f32 0.015625, %v1754_v39  ;;  %v5229_v46 = vpop.f32.mrf.mxu2 }
 0x32b   : > { %v1764_v62 = vpop.xlane.xlu1 %1763  ;;  %v2274_v32 = vmul.f32 0.5, %v2273_v35 }
 0x32c   : > { %v5222_v37 = vmul.f32 0.015625, %v1764_v62  ;;  %v5226_v1 = vadd.f32 1e-05, %v1991_v55  ;;  %v2471_v22 = vadd.f32 %v5177_v42, %v2438_v45 }
 0x32d   : > { %v2275_v56 = vsub.f32 1.5, %v2274_v32  ;;  %2615 = vxpose.xlu2.b32.cont [7/16] (narrow) %v2531_v49, 8  ;;  %v1955_v49 = vmul.f32 %v5224_v47, %v5224_v47 }
 0x32e   : > { %v3196_v17 = vpop.eup %3195  ;;  %3197 = vrsqrt.f32 %v5226_v1  ;;  %2584 = vmatmul.f32.vlgmr.msra.gmra.mxu3 %v2471_v22  ;;  %v1960_v26 = vmul.f32 %v5222_v37, %v5222_v37  ;;  %vm2327_vm10 = vweird.f32 %v5226_v1 }
 0x32f   : > { %v2312_v13 = vmul.f32 %v3196_v17, %v5216_v21  ;;  %v1882_v63 = vpop.xlane.xlu2 %1881  ;;  %v2276_v14 = vmul.f32 %v3194_v7, %v2275_v56  ;;  %vm2318_vm6 = vweird.f32 %v3196_v17 }
 0x330   : > { %v1923_v5 = vmul.f32 0.015625, %v1882_v63  ;;  %vm2319_vm8 = vmor %vm2317_vm7, %vm2318_vm6 }
 0x331   : > { %v1892_v19 = vpop.xlane.xlu0 %1891  ;;  %v2313_v6 = vmul.f32 %v3196_v17, %v2312_v13  ;;  %v2280_v3 = vsel %vm2279_vm5, %v3194_v7, %v2276_v14 }
 0x332   : > { %v1928_v20 = vmul.f32 0.015625, %v1892_v19  ;;  %v1987_v27 = vsub.f32 %v1923_v5, %v1955_v49  ;;  %v2402_v23 = vmul.f32 %v2280_v3, %v2018_v38  ;;  %v5251_v9 = vpop.f32.mrf.mxu2 }
 0x333   : > { %v1756_v58 = vpop.xlane.xlu1 %1755  ;;  %v2314_v52 = vmul.f32 0.5, %v2313_v6 }
 0x334   : > { %v1992_v25 = vsub.f32 %v1928_v20, %v1960_v26  ;;  %v5241_v8 = vmul.f32 0.015625, %v1756_v58  ;;  %v5243_v15 = vpop.eup %3197  ;;  %v5245_v50 = vadd.f32 1e-05, %v1987_v27  ;;  %v2435_v18 = vmul.f32 %v5166_v11, %v2402_v23 }
 0x335   : > { %v2315_v16 = vsub.f32 1.5, %v2314_v52  ;;  %v2322_v48 = vmul.f32 %v5243_v15, %v5226_v1  ;;  %2616 = vxpose.xlu2.b32.cont [8/16] (narrow) %v5209_v61, 8  ;;  %vm2328_vm9 = vweird.f32 %v5243_v15 }
 0x336   : > { %v5239_v34 = vadd.f32 1e-05, %v1992_v25  ;;  %v2468_v4 = vadd.f32 %v5177_v42, %v2435_v18  ;;  %v1956_v51 = vmul.f32 %v5241_v8, %v5241_v8  ;;  %vm2329_vm11 = vmor %vm2327_vm10, %vm2328_vm9  ;;  %vm2287_vm13 = vweird.f32 %v5245_v50 }
 0x337   : > { %v2323_v41 = vmul.f32 %v5243_v15, %v2322_v48  ;;  %v1766_v43 = vpop.xlane.xlu2 %1765  ;;  %v2316_v39 = vmul.f32 %v3196_v17, %v2315_v16 }
 0x338   : > { %3199 = vrsqrt.f32 %v5239_v34  ;;  %v5263_v61 = vmul.f32 0.015625, %v1766_v43  ;;  %2575 = vmatmul.f32.gmra.mxu2 %v2468_v4  ;;  %vm2337_vm0 = vweird.f32 %v5239_v34 }
 0x339   : > { %3201 = vrsqrt.f32 %v5245_v50  ;;  %v1884_v53 = vpop.xlane.xlu0 %1883  ;;  %v2324_v21 = vmul.f32 0.5, %v2323_v41  ;;  %v2320_v10 = vsel %vm2319_vm8, %v3196_v17, %v2316_v39 }
 0x33a   : > { %v1924_v7 = vmul.f32 0.015625, %v1884_v53  ;;  %v1961_v30 = vmul.f32 %v5263_v61, %v5263_v61  ;;  %v2406_v35 = vmul.f32 %v2320_v10, %v2022_v60  ;;  %v5280_v17 = vpop.f32.mrf.mxu2 }
 0x33b   : > { %v1894_v31 = vpop.xlane.xlu1 %1893  ;;  %v2325_v55 = vsub.f32 1.5, %v2324_v21 }
 0x33c   : > { %v1988_v57 = vsub.f32 %v1924_v7, %v1956_v51  ;;  %v1929_v28 = vmul.f32 0.015625, %v1894_v31  ;;  %v2439_v22 = vmul.f32 %v5166_v11, %v2406_v35  ;;  %v2024_v51 = vsub.f32 %v5025_v12, %v5222_v37 }
 0x33d   : > { %2617 = vxpose.xlu2.b32.cont [9/16] (narrow) %v5229_v46, 8  ;;  %v2326_v63 = vmul.f32 %v5243_v15, %v2325_v55  ;;  %v2023_v46 = vsub.f32 %v4970_v54, %v5211_v40 }
 0x33e   : > { %v5267_v62 = vpop.eup %3199  ;;  %v5269_v45 = vadd.f32 1e-05, %v1988_v57  ;;  %v1993_v32 = vsub.f32 %v1929_v28, %v1961_v30  ;;  %v2472_v20 = vadd.f32 %v5177_v42, %v2439_v22 }
 0x33f   : > { %v5271_v0 = vpop.eup %3201  ;;  %v2332_v33 = vmul.f32 %v5267_v62, %v5239_v34  ;;  %v1768_v38 = vpop.xlane.xlu2 %1767  ;;  %v2330_v58 = vsel %vm2329_vm11, %v5243_v15, %v2326_v63  ;;  %vm2338_vm14 = vweird.f32 %v5267_v62 }
 0x340   : > { %v2282_v56 = vmul.f32 %v5271_v0, %v5245_v50  ;;  %3203 = vrsqrt.f32 %v5269_v45  ;;  %v5284_v13 = vadd.f32 1e-05, %v1993_v32  ;;  %v5291_v5 = vmul.f32 0.015625, %v1768_v38  ;;  %2587 = vmatmul.f32.gmra.mxu3 %v2472_v20  ;;  %vm2339_vm1 = vmor %vm2337_vm0, %vm2338_vm14 }
 0x341   : > { %v2333_v19 = vmul.f32 %v5267_v62, %v2332_v33  ;;  %v1896_v26 = vpop.xlane.xlu0 %1895  ;;  %vm2288_vm12 = vweird.f32 %v5271_v0  ;;  %v2407_v18 = vmul.f32 %v2330_v58, %v2023_v46  ;;  %v2019_v50 = vsub.f32 %v5001_v36, %v5224_v47 }
 0x342   : > { %v2283_v14 = vmul.f32 %v5271_v0, %v2282_v56  ;;  %3205 = vrsqrt.f32 %v5284_v13  ;;  %v1930_v27 = vmul.f32 0.015625, %v1896_v26  ;;  %v1962_v1 = vmul.f32 %v5291_v5, %v5291_v5  ;;  %v5307_v15 = vpop.f32.mrf.mxu2  ;;  %vm5319_vm15 = vmor %vm2287_vm13, %vm2288_vm12 }
 0x343   : > { %v2334_v49 = vmul.f32 0.5, %v2333_v19  ;;  %v1770_v25 = vpop.xlane.xlu1 %1769  ;;  %v2440_v48 = vmul.f32 %v5166_v11, %v2407_v18  ;;  %vm2297_vm3 = vweird.f32 %v5269_v45  ;;  %vm2347_vm6 = vweird.f32 %v5284_v13 }
 0x344   : > { %v2284_v6 = vmul.f32 0.5, %v2283_v14  ;;  %v1994_v40 = vsub.f32 %v1930_v27, %v1962_v1  ;;  %v5304_v16 = vmul.f32 0.015625, %v1770_v25 }
 0x345   : > { %v2335_v3 = vsub.f32 1.5, %v2334_v49  ;;  %2618 = vxpose.xlu2.b32.cont [10/16] (narrow) %v5251_v9, 8  ;;  %v2473_v36 = vadd.f32 %v5177_v42, %v2440_v48  ;;  %v2020_v49 = vsub.f32 %v5054_v24, %v5241_v8  ;;  %v2025_v8 = vsub.f32 %v5078_v29, %v5263_v61 }
 0x346   : > { %v5298_v23 = vpop.eup %3203  ;;  %v2285_v52 = vsub.f32 1.5, %v2284_v6  ;;  %v5324_v43 = vadd.f32 1e-05, %v1994_v40  ;;  %v1963_v47 = vmul.f32 %v5304_v16, %v5304_v16 }
 0x347   : > { %v2292_v54 = vmul.f32 %v5298_v23, %v5269_v45  ;;  %v2336_v4 = vmul.f32 %v5267_v62, %v2335_v3  ;;  %v1898_v60 = vpop.xlane.xlu2 %1897  ;;  %vm2298_vm2 = vweird.f32 %v5298_v23 }
 0x348   : > { %v2286_v53 = vmul.f32 %v5271_v0, %v2285_v52  ;;  %v3206_v41 = vpop.eup %3205  ;;  %3207 = vrsqrt.f32 %v5324_v43  ;;  %v1931_v34 = vmul.f32 0.015625, %v1898_v60  ;;  %2590 = vmatmul.f32.gmra.mxu3 %v2473_v36  ;;  %vm2299_vm4 = vmor %vm2297_vm3, %vm2298_vm2  ;;  %vm2357_vm9 = vweird.f32 %v5324_v43 }
 0x349   : > { %v2293_v9 = vmul.f32 %v5298_v23, %v2292_v54  ;;  %v2342_v39 = vmul.f32 %v3206_v41, %v5284_v13  ;;  %v2340_v30 = vsel %vm2339_vm1, %v5267_v62, %v2336_v4  ;;  %vm2348_vm5 = vweird.f32 %v3206_v41 }
 0x34a   : > { %v2290_v12 = vsel %vm5319_vm15, %v5271_v0, %v2286_v53  ;;  %v1995_v35 = vsub.f32 %v1931_v34, %v1963_v47  ;;  %v2408_v0 = vmul.f32 %v2340_v30, %v2024_v51  ;;  %v2549_v14 = vpop.f32.mrf.mxu2  ;;  %vm2349_vm7 = vmor %vm2347_vm6, %vm2348_vm5  ;;  %vm2683_vm1 = vcmask 1040384  }
 0x34b   : > { %v2294_v37 = vmul.f32 0.5, %v2293_v9  ;;  %v1772_v21 = vpop.xlane.xlu0 %1771  ;;  %v2343_v57 = vmul.f32 %v3206_v41, %v2342_v39  ;;  %v2403_v10 = vmul.f32 %v2290_v12, %v2019_v50  ;;  %v2026_v50 = vsub.f32 %v5104_v2, %v5291_v5 }
 0x34c   : > { %v5337_v31 = vmul.f32 0.015625, %v1772_v21  ;;  %v5343_v56 = vadd.f32 1e-05, %v1995_v35  ;;  %v2441_v26 = vmul.f32 %v5166_v11, %v2408_v0  ;;  %v2027_v2 = vsub.f32 %v5127_v59, %v5304_v16 }
 0x34d   : > { %v2295_v28 = vsub.f32 1.5, %v2294_v37  ;;  %v1900_v55 = vpop.xlane.xlu1 %1899  ;;  %v2344_v33 = vmul.f32 0.5, %v2343_v57  ;;  %v2436_v19 = vmul.f32 %v5166_v11, %v2403_v10  ;;  %2619 = vxpose.xlu2.b32.cont [11/16] (narrow) %v5280_v17, 8 }
 0x34e   : > { %v1964_v32 = vmul.f32 %v5337_v31, %v5337_v31  ;;  %v1932_v22 = vmul.f32 0.015625, %v1900_v55  ;;  %v3208_v38 = vpop.eup %3207  ;;  %3209 = vrsqrt.f32 %v5343_v56  ;;  %v2474_v25 = vadd.f32 %v5177_v42, %v2441_v26 }
 0x34f   : > { %v2296_v20 = vmul.f32 %v5298_v23, %v2295_v28  ;;  %v2345_v62 = vsub.f32 1.5, %v2344_v33  ;;  %v2469_v46 = vadd.f32 %v5177_v42, %v2436_v19  ;;  %v2352_v6 = vmul.f32 %v3208_v38, %v5324_v43 }
 0x350   : > { %v1996_v63 = vsub.f32 %v1932_v22, %v1964_v32  ;;  %2593 = vmatmul.f32.gmra.mxu3 %v2474_v25  ;;  %vm2358_vm8 = vweird.f32 %v3208_v38  ;;  %vm2367_vm12 = vweird.f32 %v5343_v56  ;;  %v2028_v28 = vsub.f32 %v5148_v44, %v5337_v31 }
 0x351   : > { %v2300_v58 = vsel %vm2299_vm4, %v5298_v23, %v2296_v20  ;;  %2578 = vmatmul.f32.gmra.mxu2 %v2469_v46  ;;  %v2346_v24 = vmul.f32 %v3206_v41, %v2345_v62  ;;  %v2353_v3 = vmul.f32 %v3208_v38, %v2352_v6  ;;  %vm2359_vm10 = vmor %vm2357_vm9, %vm2358_vm8  ;;  %v3284_v62 = vmov 0  }
 0x352   : > { %v2060_v45 = vadd.f32 1e-05, %v1996_v63  ;;  %v2404_v17 = vmul.f32 %v2300_v58, %v2020_v49  ;;  %v2552_v23 = vpop.f32.mrf.mxu2  ;;  %2949 = vset.pattern.permute.xlu1 %v3284_v62 }
 0x353   : > { %v2350_v1 = vsel %vm2349_vm7, %v3206_v41, %v2346_v24  ;;  %v2354_v52 = vmul.f32 0.5, %v2353_v3 }
 0x354   : > { %3211 = vrsqrt.f32 %v2060_v45  ;;  %v2437_v27 = vmul.f32 %v5166_v11, %v2404_v17  ;;  %v2409_v18 = vmul.f32 %v2350_v1, %v2025_v8  ;;  %v3210_v54 = vpop.eup %3209  ;;  %vm2377_vm15 = vweird.f32 %v2060_v45 }
 0x355   : > { %v2355_v40 = vsub.f32 1.5, %v2354_v52  ;;  %v2362_v13 = vmul.f32 %v3210_v54, %v5343_v56  ;;  %2620 = vxpose.xlu2.b32.cont [12/16] (narrow) %v5307_v15, 8  ;;  %vm2368_vm11 = vweird.f32 %v3210_v54 }
 0x356   : > { %v2442_v48 = vmul.f32 %v5166_v11, %v2409_v18  ;;  %v2470_v29 = vadd.f32 %v5177_v42, %v2437_v27  ;;  %vm2369_vm13 = vmor %vm2367_vm12, %vm2368_vm11  ;;  %v2686_v27 = vlaneseq }
 0x357   : > { %v2356_v53 = vmul.f32 %v3208_v38, %v2355_v40  ;;  %v2363_v4 = vmul.f32 %v3210_v54, %v2362_v13 }
 0x358   : > { %v2475_v41 = vadd.f32 %v5177_v42, %v2442_v48  ;;  %vm2688_vm2 = vcmp.lt.s32.totalorder %v2686_v27, 256 }
 0x359   : > { %2581 = vmatmul.f32.gmra.mxu2 %v2470_v29  ;;  %v2360_v7 = vsel %vm2359_vm10, %v3208_v38, %v2356_v53  ;;  %v2364_v9 = vmul.f32 0.5, %v2363_v4 }
 0x35a   : > { %v3212_v61 = vpop.eup %3211  ;;  %2596 = vmatmul.f32.gmra.mxu3 %v2475_v41  ;;  %v2410_v15 = vmul.f32 %v2360_v7, %v2026_v50 }
 0x35b   : > { %v2372_v51 = vmul.f32 %v3212_v61, %v2060_v45  ;;  %v2365_v60 = vsub.f32 1.5, %v2364_v9  ;;  %vm2378_vm14 = vweird.f32 %v3212_v61 }
 0x35c   : > { %v2443_v12 = vmul.f32 %v5166_v11, %v2410_v15  ;;  %v2555_v43 = vpop.f32.mrf.mxu2  ;;  %vm2379_vm0 = vmor %vm2377_vm15, %vm2378_vm14 }
 0x35d   : > { %v2373_v39 = vmul.f32 %v3212_v61, %v2372_v51  ;;  %2621 = vxpose.xlu2.b32.cont [13/16] (narrow) %v2549_v14, 8  ;;  %v2366_v37 = vmul.f32 %v3210_v54, %v2365_v60 }
 0x35e   : > { %v2476_v47 = vadd.f32 %v5177_v42, %v2443_v12 }
 0x35f   : > { %v2374_v36 = vmul.f32 0.5, %v2373_v39  ;;  %v2370_v21 = vsel %vm2369_vm13, %v3210_v54, %v2366_v37 }
 0x360   : > { %v2411_v34 = vmul.f32 %v2370_v21, %v2027_v2 }
 0x361   : > { %v2375_v5 = vsub.f32 1.5, %v2374_v36 }
 0x362   : > { %2599 = vmatmul.f32.gmra.mxu3 %v2476_v47  ;;  %v2444_v10 = vmul.f32 %v5166_v11, %v2411_v34 }
 0x363   : > { %v2376_v57 = vmul.f32 %v3212_v61, %v2375_v5 }
 0x364   : > { %v2558_v35 = vpop.f32.mrf.mxu2  ;;  %v2477_v59 = vadd.f32 %v5177_v42, %v2444_v10 }
 0x365   : > { %v2380_v30 = vsel %vm2379_vm0, %v3212_v61, %v2376_v57  ;;  %2622 = vxpose.xlu2.b32.cont [14/16] (narrow) %v2552_v23, 8 }
 0x366   : > { %v2412_v16 = vmul.f32 %v2380_v30, %v2028_v28 }
 0x368   : > { %v2445_v55 = vmul.f32 %v5166_v11, %v2412_v16 }
 0x36a   : > { %2602 = vmatmul.f32.gmra.mxu3 %v2477_v59  ;;  %v2478_v33 = vadd.f32 %v5177_v42, %v2445_v55  ;;  %v2495_v42 = vld [vmem:[%s5419_s2 + $0x6] sm:$0x1] }
 0x36b   : > { %2675 = vperm.xlu1 %2949, %v2495_v42  }
 0x36c   : > { %v2561_v0 = vpop.f32.mrf.mxu2 }
 0x36d   : > { %2623 = vxpose.xlu2.b32.cont [15/16] (narrow) %v2555_v43, 8  ;;  %2641 = vxpose.xlu0.b32.start [1/16] (narrow) %v2561_v0, 8 }
 0x372   : > { %2605 = vmatmul.f32.gmra.mxu3 %v2478_v33 }
 0x374   : > { %v2564_v32 = vpop.f32.mrf.mxu2 }
 0x375   : > { %2624 = vxpose.xlu2.b32.end [16/16] (narrow) %v2558_v35, 8  ;;  %2642 = vxpose.xlu0.b32.cont [2/16] (narrow) %v2564_v32, 8 }
 0x37c   : > { %v2567_v22 = vpop.f32.mrf.mxu2 }
 0x37d   : > { %2643 = vxpose.xlu0.b32.cont [3/16] (narrow) %v2567_v22, 8 }
 0x384   : > { %v2570_v44 = vpop.f32.mrf.mxu2 }
 0x385   : > { %2644 = vxpose.xlu0.b32.cont [4/16] (narrow) %v2570_v44, 8 }
 0x396   : > { %v2625_v17 = vpop.trf.xlu2 }
 0x3a9   : > { %v2573_v31 = vpop.f32.mrf.mxu2 }
 0x3aa   : > { %2645 = vxpose.xlu0.b32.cont [5/16] (narrow) %v2573_v31, 8 }
 0x3b1   : > { %v2585_v11 = vpop.f32.mrf.mxu3 }
 0x3bb   : > { %v2576_v56 = vpop.f32.mrf.mxu2 }
 0x3bc   : > { %2646 = vxpose.xlu0.b32.cont [6/16] (narrow) %v2576_v56, 8 }
 0x3c3   : > { %v2588_v20 = vpop.f32.mrf.mxu3 }
 0x3cb   : > { %v2591_v63 = vpop.f32.mrf.mxu3 }
 0x3d3   : > { %v2594_v14 = vpop.f32.mrf.mxu3 }
 0x3d4   : > { %v2579_v19 = vpop.f32.mrf.mxu2 }
 0x3d5   : > { %2647 = vxpose.xlu0.b32.cont [7/16] (narrow) %v2579_v19, 8 }
 0x3dc   : > { %v2582_v26 = vpop.f32.mrf.mxu2 }
 0x3dd   : > { %2648 = vxpose.xlu0.b32.cont [8/16] (narrow) %v2582_v26, 8  ;;  %v2597_v38 = vpop.f32.mrf.mxu3  ;;  %v2676_v45 = vpop.permute.xlu1 %2675 }
 0x3de   : > { %v2678_v8 = vadd.f32 %v2676_v45, %v2625_v17 }
 0x3e5   : > { %2649 = vxpose.xlu0.b32.cont [9/16] (narrow) %v2585_v11, 8  ;;  %v2600_v49 = vpop.f32.mrf.mxu3 }
 0x3ed   : > { %2650 = vxpose.xlu0.b32.cont [10/16] (narrow) %v2588_v20, 8  ;;  %v2603_v46 = vpop.f32.mrf.mxu3 }
 0x3f5   : > { %2651 = vxpose.xlu0.b32.cont [11/16] (narrow) %v2591_v63, 8  ;;  %v2606_v6 = vpop.f32.mrf.mxu3 }
 0x3fd   : > { %2652 = vxpose.xlu0.b32.cont [12/16] (narrow) %v2594_v14, 8 }
 0x405   : > { %2653 = vxpose.xlu0.b32.cont [13/16] (narrow) %v2597_v38, 8 }
 0x40d   : > { %2654 = vxpose.xlu0.b32.cont [14/16] (narrow) %v2600_v49, 8 }
 0x415   : > { %2655 = vxpose.xlu0.b32.cont [15/16] (narrow) %v2603_v46, 8 }
 0x41d   : > { %2656 = vxpose.xlu0.b32.end [16/16] (narrow) %v2606_v6, 8 }
 0x449   : > { %v2657_v25 = vpop.trf.xlu0 }
 0x44a   : > { %v2679_v58 = vadd.f32 %v2676_v45, %v2657_v25 }
 0x44c   : > { %v2682_v24 = vrot.slane %v2679_v58, 7 }
 0x44e   : > { %v2684_v3 = vsel %vm2683_vm1, %v2678_v8, %v2682_v24 }
 0x44f   : > { %2690 = vst.msk [vmem:[%s164_s27] sm:$0x3] %vm2688_vm2, %v2684_v3 }
 0x450   : > { %3247 = shalt.err (!%p3244_p3)
}
 0x451   : > { %2909 = dma.vmem_to_hbm [thread:$0]  (%p3343_p5), %s2705_s28, 32, %s2707_s29, %s2692_s30  }
 0x484   : > { %2950 = vset.pattern.permute.xlu0 %v3284_v62 }
 0x485 PF: > { %p2915_p4 = scmp.ge.s32.totalorder %s3282_s15, 2  ;;  %s2718_s10 = sand.u32 1, %s3270_s12  }
 0x486   : > { %s2719_s11 = scalar_lea.sflag [#allocation3], %s2718_s10 }
 0x487   : > { %p2912_p7 = pnand %p2915_p4, %p3347_p6 }
 0x489   : > { %p2913_p8 = pneg %p2912_p7 }
 0x48b   : > { %3265 = dma.done.wait (%p2913_p8), %s2719_s11, 32  }
 0x48c   : > { %3267 = vsyncadd (%p2913_p8), %s2719_s11, 4294967264  ;;  %p13_p9 = scmp.ge.s32.totalorder %s3330_s18, 4   ;;  %s5471_s12 = smov %s3274_s13 }
 0x48d   : > { %s5472_s13 = smov %s3278_s14  ;;  %s5473_s14 = smov %s3341_s21 }
 0x48e   : > { %s5474_s15 = smov %s3330_s18  ;;  %15 = sbr.rel (!%p13_p9) target bundleno = 3 (0x3), region = 67 }
 0x493   :  { %2725 = vsyncpa [#allocation3], 1 }
 0x494   :  { %2727 = vsyncpa [#allocation3 + $0x1], 1 }

</bundles_post_ra>
